<compile_context>
chip_gen: v5e
topology: v5e:2x2
jax: 0.10.0
libtpu: 0.0.40
codegen_flags: <defaults>
</compile_context>

<pallas_src>
import functools

import jax
import jax.numpy as jnp
from jax import lax
from jax.experimental import pallas as pl
from jax.experimental.pallas import tpu as pltpu

_LANES = 128


def _round_up(x, m):
    return (x + m - 1) // m * m


# ---------------------------------------------------------------------------
# Fused kernel: maxpool2x2 -> 1x1 proj -> ResidualBlock -> ResidualBlock
# ---------------------------------------------------------------------------
def _my_down_kernel(x_ref, pw_ref, pb_ref, ws_ref, bs_ref, o_ref, pad_ref,
                    *, Hh, Wh, Cin, Cp):
    P = Hh * Wh

    # ---- 2x2 max-pool (VPU, in VMEM) --------------------------------------
    # x_ref block: (1, H, Wh, 2*Cin); last axis packs (horizontal offset, Cin) so only
    # cheap leading-dim reshapes / static lane slices are needed (no strided loads).
    xv = x_ref[0].reshape(Hh, 2, Wh, 2 * Cin)          # free leading-dim split
    trow = jnp.maximum(xv[:, 0], xv[:, 1])             # (Hh, Wh, 2*Cin)  vertical max
    m = jnp.maximum(trow[..., :Cin], trow[..., Cin:])  # (Hh, Wh, Cin)    horizontal max
    m2 = m.reshape(P, Cin)

    # ---- 1x1 projection (MXU) ---------------------------------------------
    y = jnp.dot(m2, pw_ref[...], preferred_element_type=jnp.float32) + pb_ref[...]

    # ---- residual blocks, fully VMEM resident ------------------------------
    # Zero the padded scratch every grid step (do NOT gate on program_id==0: with a
    # "parallel" batch axis each core owns its own scratch).  51 KiB memset — trivial.
    pad_ref[...] = jnp.zeros((Hh + 2, Wh + 2, Cp), jnp.float32)

    def write_interior(v):                             # v: (P, Cp)
        pad_ref[1:Hh + 1, 1:Wh + 1, :] = v.reshape(Hh, Wh, Cp)

    def conv3x3(idx, skip):
        # Per-dy packed matmul: slab (P, 3*Cp) @ weight (3*Cp, Cp).  The concat is
        # 128-lane aligned and the reshapes are layout-identical leading collapses.
        acc = jnp.zeros((P, Cp), jnp.float32)
        for dy in range(3):
            taps = [pad_ref[dy:dy + Hh, dx:dx + Wh, :].reshape(P, Cp)
                    for dx in range(3)]
            slab = jnp.concatenate(taps, axis=1)       # (P, 3*Cp)
            acc = acc + jnp.dot(slab, ws_ref[idx, dy],
                                preferred_element_type=jnp.float32)
        acc = acc + bs_ref[idx]
        if skip is not None:
            acc = acc + skip
        return jnp.maximum(acc, 0.0)

    for blk in range(2):
        write_interior(y)
        h = conv3x3(2 * blk, None)                     # conv1 + ReLU (h never leaves VMEM)
        write_interior(h)
        y = conv3x3(2 * blk + 1, y)                    # conv2 + skip + ReLU

    o_ref[0] = y.astype(o_ref.dtype)                   # (P, Cp): unmasked full-lane store


# ---------------------------------------------------------------------------
# One-time parameter packing (lane padding + (3, 3*Cp, Cp) weight layout)
# ---------------------------------------------------------------------------
def pack_params(params, cin, cout):
    cp = _round_up(cout, _LANES)

    pw = jnp.zeros((cin, cp), jnp.float32).at[:, :cout].set(params["proj_w"])
    pb = jnp.zeros((1, cp), jnp.float32).at[0, :cout].set(params["proj_b"])

    ws, bs = [], []
    for name in ("res1_w1", "res1_w2", "res2_w1", "res2_w2"):
        w = params[name]                                                # (3,3,cout,cout) HWIO
        wp = jnp.zeros((3, 3, cp, cp), jnp.float32).at[:, :, :cout, :cout].set(w)
        ws.append(wp.reshape(3, 3 * cp, cp))                            # (3, 3*Cp, Cp)
    for name in ("res1_b1", "res1_b2", "res2_b1", "res2_b2"):
        bs.append(jnp.zeros((cp,), jnp.float32).at[:cout].set(params[name]))

    return {"proj_w": pw, "proj_b": pb,
            "conv_w": jnp.stack(ws),                                    # (4, 3, 3*Cp, Cp)
            "conv_b": jnp.stack(bs)[:, None, :],                        # (4, 1, Cp)
            "cout": cout, "cp": cp}


# ---------------------------------------------------------------------------
# MyDown forward (NCHW in / NCHW out, like the PyTorch module)
# ---------------------------------------------------------------------------
def my_down(x_nchw, packed):
    N, Cin, H, W = x_nchw.shape
    assert H % 2 == 0 and W % 2 == 0
    Hh, Wh = H // 2, W // 2
    P = Hh * Wh
    Cp, Cout = packed["cp"], packed["cout"]

    x = jnp.transpose(x_nchw, (0, 2, 3, 1))            # NCHW -> NHWC (interface glue)
    xr = x.reshape(N, H, Wh, 2 * Cin)                  # metadata-only reshape (no copy)

    kernel = functools.partial(_my_down_kernel, Hh=Hh, Wh=Wh, Cin=Cin, Cp=Cp)
    out = pl.pallas_call(
        kernel,
        out_shape=jax.ShapeDtypeStruct((N, P, Cp), x.dtype),
        grid=(N,),
        in_specs=[
            pl.BlockSpec((1, H, Wh, 2 * Cin), lambda n: (n, 0, 0, 0)),
            pl.BlockSpec((Cin, Cp), lambda n: (0, 0)),
            pl.BlockSpec((1, Cp), lambda n: (0, 0)),
            pl.BlockSpec((4, 3, 3 * Cp, Cp), lambda n: (0, 0, 0, 0)),
            pl.BlockSpec((4, 1, Cp), lambda n: (0, 0, 0)),
        ],
        out_specs=pl.BlockSpec((1, P, Cp), lambda n: (n, 0, 0)),
        scratch_shapes=[pltpu.VMEM((Hh + 2, Wh + 2, Cp), jnp.float32)],
        compiler_params=pltpu.CompilerParams(
            dimension_semantics=("parallel",),
            vmem_limit_bytes=32 * 1024 * 1024),
    )(xr, packed["proj_w"], packed["proj_b"], packed["conv_w"], packed["conv_b"])

    out = out[:, :, :Cout].reshape(N, Hh, Wh, Cout)    # drop lane padding (tiny)
    return jnp.transpose(out, (0, 3, 1, 2))            # NHWC -> NCHW


# ---------------------------------------------------------------------------
# Pure-JAX reference (for correctness check)
# ---------------------------------------------------------------------------
def my_down_reference(x_nchw, params):
    x = jnp.transpose(x_nchw, (0, 2, 3, 1))
    N, H, W, C = x.shape
    m = x.reshape(N, H // 2, 2, W // 2, 2, C).max(axis=(2, 4))
    y = jnp.einsum("nhwc,cd->nhwd", m, params["proj_w"]) + params["proj_b"]

    def c3(z, w, b):
        return lax.conv_general_dilated(
            z, w, window_strides=(1, 1), padding="SAME",
            dimension_numbers=("NHWC", "HWIO", "NHWC")) + b

    for blk in ("res1", "res2"):
        h = jnp.maximum(c3(y, params[f"{blk}_w1"], params[f"{blk}_b1"]), 0.0)
        y = jnp.maximum(c3(h, params[f"{blk}_w2"], params[f"{blk}_b2"]) + y, 0.0)
    return jnp.transpose(y, (0, 3, 1, 2))


if __name__ == "__main__":
    N, Cin, Cout, H, W = 2, 4, 8, 16, 16

    key = jax.random.PRNGKey(0)
    ks = jax.random.split(key, 12)

    # Deterministic synthetic parameters (kernel-native layouts; PyTorch OIHW would be transposed).
    params = {
        "proj_w": 0.2 * jax.random.normal(ks[1], (Cin, Cout), jnp.float32),
        "proj_b": 0.1 * jax.random.normal(ks[2], (Cout,), jnp.float32),
        "res1_w1": 0.1 * jax.random.normal(ks[3], (3, 3, Cout, Cout), jnp.float32),
        "res1_b1": 0.1 * jax.random.normal(ks[4], (Cout,), jnp.float32),
        "res1_w2": 0.1 * jax.random.normal(ks[5], (3, 3, Cout, Cout), jnp.float32),
        "res1_b2": 0.1 * jax.random.normal(ks[6], (Cout,), jnp.float32),
        "res2_w1": 0.1 * jax.random.normal(ks[7], (3, 3, Cout, Cout), jnp.float32),
        "res2_b1": 0.1 * jax.random.normal(ks[8], (Cout,), jnp.float32),
        "res2_w2": 0.1 * jax.random.normal(ks[9], (3, 3, Cout, Cout), jnp.float32),
        "res2_b2": 0.1 * jax.random.normal(ks[10], (Cout,), jnp.float32),
    }

    x = jax.random.normal(ks[0], (N, Cin, H, W), jnp.float32)     # NCHW like PyTorch

    packed = pack_params(params, Cin, Cout)                       # one-time packing
    out = jax.block_until_ready(my_down(x, packed))
    ref = my_down_reference(x, params)

    assert out.shape == (N, Cout, H // 2, W // 2), out.shape
    assert jnp.allclose(out, ref, atol=1e-3, rtol=1e-3), float(jnp.abs(out - ref).max())

    print("KERNEL_OK")
</pallas_src>

<mosaic_0001>
module attributes {stable_mosaic.version = 11 : i64} {
  func.func @_my_down_kernel(%arg0: i32, %arg1: memref<1x16x8x8xf32, #tpu.memory_space<vmem>>, %arg2: memref<4x128xf32, #tpu.memory_space<vmem>>, %arg3: memref<1x128xf32, #tpu.memory_space<vmem>>, %arg4: memref<4x3x384x128xf32, #tpu.memory_space<vmem>>, %arg5: memref<4x1x128xf32, #tpu.memory_space<vmem>>, %arg6: memref<1x64x128xf32, #tpu.memory_space<vmem>>, %arg7: memref<10x10x128xf32, #tpu.memory_space<vmem>>) attributes {dimension_semantics = [#tpu.dimension_semantics<parallel>], iteration_bounds = array<i64: 2>, scalar_prefetch = 0 : i64, scratch_operands = 1 : i64, tpu.core_type = #tpu.core_type<tc>, window_params = [{transform_indices = @transform_0, window_bounds = array<i64: 1, 16, 8, 8>}, {pipeline_mode = #tpu.pipeline_mode<synchronous>, transform_indices = @transform_1, window_bounds = array<i64: 4, 128>}, {pipeline_mode = #tpu.pipeline_mode<synchronous>, transform_indices = @transform_2, window_bounds = array<i64: 1, 128>}, {pipeline_mode = #tpu.pipeline_mode<synchronous>, transform_indices = @transform_3, window_bounds = array<i64: 4, 3, 384, 128>}, {pipeline_mode = #tpu.pipeline_mode<synchronous>, transform_indices = @transform_4, window_bounds = array<i64: 4, 1, 128>}, {transform_indices = @transform_5, window_bounds = array<i64: 1, 64, 128>}]} {
    %c0 = arith.constant 0 : index
    %c0_0 = arith.constant 0 : index
    %c0_1 = arith.constant 0 : index
    %c0_2 = arith.constant 0 : index
    %0 = vector.load %arg1[%c0, %c0_0, %c0_1, %c0_2] : memref<1x16x8x8xf32, #tpu.memory_space<vmem>>, vector<1x16x8x8xf32>
    %1 = vector.shape_cast %0 : vector<1x16x8x8xf32> to vector<16x8x8xf32>
    %2 = vector.shape_cast %1 : vector<16x8x8xf32> to vector<8x2x8x8xf32>
    %3 = vector.extract_strided_slice %2 {offsets = [0, 0, 0, 0], sizes = [8, 1, 8, 8], strides = [1, 1, 1, 1]} : vector<8x2x8x8xf32> to vector<8x1x8x8xf32>
    %4 = vector.shape_cast %3 : vector<8x1x8x8xf32> to vector<8x8x8xf32>
    %5 = vector.extract_strided_slice %2 {offsets = [0, 1, 0, 0], sizes = [8, 1, 8, 8], strides = [1, 1, 1, 1]} : vector<8x2x8x8xf32> to vector<8x1x8x8xf32>
    %6 = vector.shape_cast %5 : vector<8x1x8x8xf32> to vector<8x8x8xf32>
    %7 = arith.maximumf %4, %6 : vector<8x8x8xf32>
    %8 = vector.extract_strided_slice %7 {offsets = [0, 0, 0], sizes = [8, 8, 4], strides = [1, 1, 1]} : vector<8x8x8xf32> to vector<8x8x4xf32>
    %9 = vector.extract_strided_slice %7 {offsets = [0, 0, 4], sizes = [8, 8, 4], strides = [1, 1, 1]} : vector<8x8x8xf32> to vector<8x8x4xf32>
    %10 = arith.maximumf %8, %9 : vector<8x8x4xf32>
    %11 = vector.shape_cast %10 : vector<8x8x4xf32> to vector<64x4xf32>
    %c0_3 = arith.constant 0 : index
    %c0_4 = arith.constant 0 : index
    %12 = vector.load %arg2[%c0_3, %c0_4] : memref<4x128xf32, #tpu.memory_space<vmem>>, vector<4x128xf32>
    %cst = arith.constant dense<0.000000e+00> : vector<64x128xf32>
    %13 = tpu.matmul %11, %12, %cst {dimension_numbers = #tpu.dot_dimension_numbers<[1], [0], [0], [1], [0, 0, 1, 1], [], []>} : vector<64x4xf32>, vector<4x128xf32>, vector<64x128xf32> -> vector<64x128xf32>
    %c0_5 = arith.constant 0 : index
    %c0_6 = arith.constant 0 : index
    %14 = vector.load %arg3[%c0_5, %c0_6] : memref<1x128xf32, #tpu.memory_space<vmem>>, vector<1x128xf32>
    %15 = vector.broadcast %14 : vector<1x128xf32> to vector<64x128xf32>
    %16 = arith.addf %13, %15 : vector<64x128xf32>
    %cst_7 = arith.constant 0.000000e+00 : f32
    %17 = vector.broadcast %cst_7 : f32 to vector<10x10x128xf32>
    %c0_8 = arith.constant 0 : index
    %c0_9 = arith.constant 0 : index
    %c0_10 = arith.constant 0 : index
    %18 = vector.load %arg7[%c0_8, %c0_9, %c0_10] : memref<10x10x128xf32, #tpu.memory_space<vmem>>, vector<10x10x128xf32>
    tpu.vector_store %arg7[%c0_8, %c0_9, %c0_10], %17 {strides = array<i32>} : memref<10x10x128xf32, #tpu.memory_space<vmem>>, vector<10x10x128xf32>,
    %19 = vector.shape_cast %16 : vector<64x128xf32> to vector<8x8x128xf32>
    %c1 = arith.constant 1 : index
    %c1_11 = arith.constant 1 : index
    %c0_12 = arith.constant 0 : index
    %20 = vector.load %arg7[%c1, %c1_11, %c0_12] : memref<10x10x128xf32, #tpu.memory_space<vmem>>, vector<8x8x128xf32>
    tpu.vector_store %arg7[%c1, %c1_11, %c0_12], %19 {strides = array<i32>} : memref<10x10x128xf32, #tpu.memory_space<vmem>>, vector<8x8x128xf32>,
    %cst_13 = arith.constant 0.000000e+00 : f32
    %21 = vector.broadcast %cst_13 : f32 to vector<64x128xf32>
    %c0_14 = arith.constant 0 : index
    %c0_15 = arith.constant 0 : index
    %c0_16 = arith.constant 0 : index
    %22 = vector.load %arg7[%c0_14, %c0_15, %c0_16] : memref<10x10x128xf32, #tpu.memory_space<vmem>>, vector<8x8x128xf32>
    %23 = vector.shape_cast %22 : vector<8x8x128xf32> to vector<64x128xf32>
    %c0_17 = arith.constant 0 : index
    %c1_18 = arith.constant 1 : index
    %c0_19 = arith.constant 0 : index
    %24 = vector.load %arg7[%c0_17, %c1_18, %c0_19] : memref<10x10x128xf32, #tpu.memory_space<vmem>>, vector<8x8x128xf32>
    %25 = vector.shape_cast %24 : vector<8x8x128xf32> to vector<64x128xf32>
    %c0_20 = arith.constant 0 : index
    %c2 = arith.constant 2 : index
    %c0_21 = arith.constant 0 : index
    %26 = vector.load %arg7[%c0_20, %c2, %c0_21] : memref<10x10x128xf32, #tpu.memory_space<vmem>>, vector<8x8x128xf32>
    %27 = vector.shape_cast %26 : vector<8x8x128xf32> to vector<64x128xf32>
    %28 = tpu.concatenate %23, %25, %27 in 1 : vector<64x128xf32>, vector<64x128xf32>, vector<64x128xf32> -> vector<64x384xf32>
    %c0_22 = arith.constant 0 : index
    %c0_23 = arith.constant 0 : index
    %c0_24 = arith.constant 0 : index
    %c0_25 = arith.constant 0 : index
    %29 = vector.load %arg4[%c0_22, %c0_23, %c0_24, %c0_25] : memref<4x3x384x128xf32, #tpu.memory_space<vmem>>, vector<1x1x384x128xf32>
    %30 = vector.shape_cast %29 : vector<1x1x384x128xf32> to vector<384x128xf32>
    %cst_26 = arith.constant dense<0.000000e+00> : vector<64x128xf32>
    %31 = tpu.matmul %28, %30, %cst_26 {dimension_numbers = #tpu.dot_dimension_numbers<[1], [0], [0], [1], [0, 0, 1, 1], [], []>} : vector<64x384xf32>, vector<384x128xf32>, vector<64x128xf32> -> vector<64x128xf32>
    %32 = arith.addf %21, %31 : vector<64x128xf32>
    %c1_27 = arith.constant 1 : index
    %c0_28 = arith.constant 0 : index
    %c0_29 = arith.constant 0 : index
    %33 = vector.load %arg7[%c1_27, %c0_28, %c0_29] : memref<10x10x128xf32, #tpu.memory_space<vmem>>, vector<8x8x128xf32>
    %34 = vector.shape_cast %33 : vector<8x8x128xf32> to vector<64x128xf32>
    %c1_30 = arith.constant 1 : index
    %c1_31 = arith.constant 1 : index
    %c0_32 = arith.constant 0 : index
    %35 = vector.load %arg7[%c1_30, %c1_31, %c0_32] : memref<10x10x128xf32, #tpu.memory_space<vmem>>, vector<8x8x128xf32>
    %36 = vector.shape_cast %35 : vector<8x8x128xf32> to vector<64x128xf32>
    %c1_33 = arith.constant 1 : index
    %c2_34 = arith.constant 2 : index
    %c0_35 = arith.constant 0 : index
    %37 = vector.load %arg7[%c1_33, %c2_34, %c0_35] : memref<10x10x128xf32, #tpu.memory_space<vmem>>, vector<8x8x128xf32>
    %38 = vector.shape_cast %37 : vector<8x8x128xf32> to vector<64x128xf32>
    %39 = tpu.concatenate %34, %36, %38 in 1 : vector<64x128xf32>, vector<64x128xf32>, vector<64x128xf32> -> vector<64x384xf32>
    %c0_36 = arith.constant 0 : index
    %c1_37 = arith.constant 1 : index
    %c0_38 = arith.constant 0 : index
    %c0_39 = arith.constant 0 : index
    %40 = vector.load %arg4[%c0_36, %c1_37, %c0_38, %c0_39] : memref<4x3x384x128xf32, #tpu.memory_space<vmem>>, vector<1x1x384x128xf32>
    %41 = vector.shape_cast %40 : vector<1x1x384x128xf32> to vector<384x128xf32>
    %cst_40 = arith.constant dense<0.000000e+00> : vector<64x128xf32>
    %42 = tpu.matmul %39, %41, %cst_40 {dimension_numbers = #tpu.dot_dimension_numbers<[1], [0], [0], [1], [0, 0, 1, 1], [], []>} : vector<64x384xf32>, vector<384x128xf32>, vector<64x128xf32> -> vector<64x128xf32>
    %43 = arith.addf %32, %42 : vector<64x128xf32>
    %c2_41 = arith.constant 2 : index
    %c0_42 = arith.constant 0 : index
    %c0_43 = arith.constant 0 : index
    %44 = vector.load %arg7[%c2_41, %c0_42, %c0_43] : memref<10x10x128xf32, #tpu.memory_space<vmem>>, vector<8x8x128xf32>
    %45 = vector.shape_cast %44 : vector<8x8x128xf32> to vector<64x128xf32>
    %c2_44 = arith.constant 2 : index
    %c1_45 = arith.constant 1 : index
    %c0_46 = arith.constant 0 : index
    %46 = vector.load %arg7[%c2_44, %c1_45, %c0_46] : memref<10x10x128xf32, #tpu.memory_space<vmem>>, vector<8x8x128xf32>
    %47 = vector.shape_cast %46 : vector<8x8x128xf32> to vector<64x128xf32>
    %c2_47 = arith.constant 2 : index
    %c2_48 = arith.constant 2 : index
    %c0_49 = arith.constant 0 : index
    %48 = vector.load %arg7[%c2_47, %c2_48, %c0_49] : memref<10x10x128xf32, #tpu.memory_space<vmem>>, vector<8x8x128xf32>
    %49 = vector.shape_cast %48 : vector<8x8x128xf32> to vector<64x128xf32>
    %50 = tpu.concatenate %45, %47, %49 in 1 : vector<64x128xf32>, vector<64x128xf32>, vector<64x128xf32> -> vector<64x384xf32>
    %c0_50 = arith.constant 0 : index
    %c2_51 = arith.constant 2 : index
    %c0_52 = arith.constant 0 : index
    %c0_53 = arith.constant 0 : index
    %51 = vector.load %arg4[%c0_50, %c2_51, %c0_52, %c0_53] : memref<4x3x384x128xf32, #tpu.memory_space<vmem>>, vector<1x1x384x128xf32>
    %52 = vector.shape_cast %51 : vector<1x1x384x128xf32> to vector<384x128xf32>
    %cst_54 = arith.constant dense<0.000000e+00> : vector<64x128xf32>
    %53 = tpu.matmul %50, %52, %cst_54 {dimension_numbers = #tpu.dot_dimension_numbers<[1], [0], [0], [1], [0, 0, 1, 1], [], []>} : vector<64x384xf32>, vector<384x128xf32>, vector<64x128xf32> -> vector<64x128xf32>
    %54 = arith.addf %43, %53 : vector<64x128xf32>
    %c0_55 = arith.constant 0 : index
    %c0_56 = arith.constant 0 : index
    %c0_57 = arith.constant 0 : index
    %55 = vector.load %arg5[%c0_55, %c0_56, %c0_57] : memref<4x1x128xf32, #tpu.memory_space<vmem>>, vector<1x1x128xf32>
    %56 = vector.shape_cast %55 : vector<1x1x128xf32> to vector<1x128xf32>
    %57 = vector.broadcast %56 : vector<1x128xf32> to vector<64x128xf32>
    %58 = arith.addf %54, %57 : vector<64x128xf32>
    %cst_58 = arith.constant 0.000000e+00 : f32
    %59 = vector.broadcast %cst_58 : f32 to vector<64x128xf32>
    %60 = arith.maximumf %58, %59 : vector<64x128xf32>
    %61 = vector.shape_cast %60 : vector<64x128xf32> to vector<8x8x128xf32>
    %c1_59 = arith.constant 1 : index
    %c1_60 = arith.constant 1 : index
    %c0_61 = arith.constant 0 : index
    %62 = vector.load %arg7[%c1_59, %c1_60, %c0_61] : memref<10x10x128xf32, #tpu.memory_space<vmem>>, vector<8x8x128xf32>
    tpu.vector_store %arg7[%c1_59, %c1_60, %c0_61], %61 {strides = array<i32>} : memref<10x10x128xf32, #tpu.memory_space<vmem>>, vector<8x8x128xf32>,
    %cst_62 = arith.constant 0.000000e+00 : f32
    %63 = vector.broadcast %cst_62 : f32 to vector<64x128xf32>
    %c0_63 = arith.constant 0 : index
    %c0_64 = arith.constant 0 : index
    %c0_65 = arith.constant 0 : index
    %64 = vector.load %arg7[%c0_63, %c0_64, %c0_65] : memref<10x10x128xf32, #tpu.memory_space<vmem>>, vector<8x8x128xf32>
    %65 = vector.shape_cast %64 : vector<8x8x128xf32> to vector<64x128xf32>
    %c0_66 = arith.constant 0 : index
    %c1_67 = arith.constant 1 : index
    %c0_68 = arith.constant 0 : index
    %66 = vector.load %arg7[%c0_66, %c1_67, %c0_68] : memref<10x10x128xf32, #tpu.memory_space<vmem>>, vector<8x8x128xf32>
    %67 = vector.shape_cast %66 : vector<8x8x128xf32> to vector<64x128xf32>
    %c0_69 = arith.constant 0 : index
    %c2_70 = arith.constant 2 : index
    %c0_71 = arith.constant 0 : index
    %68 = vector.load %arg7[%c0_69, %c2_70, %c0_71] : memref<10x10x128xf32, #tpu.memory_space<vmem>>, vector<8x8x128xf32>
    %69 = vector.shape_cast %68 : vector<8x8x128xf32> to vector<64x128xf32>
    %70 = tpu.concatenate %65, %67, %69 in 1 : vector<64x128xf32>, vector<64x128xf32>, vector<64x128xf32> -> vector<64x384xf32>
    %c1_72 = arith.constant 1 : index
    %c0_73 = arith.constant 0 : index
    %c0_74 = arith.constant 0 : index
    %c0_75 = arith.constant 0 : index
    %71 = vector.load %arg4[%c1_72, %c0_73, %c0_74, %c0_75] : memref<4x3x384x128xf32, #tpu.memory_space<vmem>>, vector<1x1x384x128xf32>
    %72 = vector.shape_cast %71 : vector<1x1x384x128xf32> to vector<384x128xf32>
    %cst_76 = arith.constant dense<0.000000e+00> : vector<64x128xf32>
    %73 = tpu.matmul %70, %72, %cst_76 {dimension_numbers = #tpu.dot_dimension_numbers<[1], [0], [0], [1], [0, 0, 1, 1], [], []>} : vector<64x384xf32>, vector<384x128xf32>, vector<64x128xf32> -> vector<64x128xf32>
    %74 = arith.addf %63, %73 : vector<64x128xf32>
    %c1_77 = arith.constant 1 : index
    %c0_78 = arith.constant 0 : index
    %c0_79 = arith.constant 0 : index
    %75 = vector.load %arg7[%c1_77, %c0_78, %c0_79] : memref<10x10x128xf32, #tpu.memory_space<vmem>>, vector<8x8x128xf32>
    %76 = vector.shape_cast %75 : vector<8x8x128xf32> to vector<64x128xf32>
    %c1_80 = arith.constant 1 : index
    %c1_81 = arith.constant 1 : index
    %c0_82 = arith.constant 0 : index
    %77 = vector.load %arg7[%c1_80, %c1_81, %c0_82] : memref<10x10x128xf32, #tpu.memory_space<vmem>>, vector<8x8x128xf32>
    %78 = vector.shape_cast %77 : vector<8x8x128xf32> to vector<64x128xf32>
    %c1_83 = arith.constant 1 : index
    %c2_84 = arith.constant 2 : index
    %c0_85 = arith.constant 0 : index
    %79 = vector.load %arg7[%c1_83, %c2_84, %c0_85] : memref<10x10x128xf32, #tpu.memory_space<vmem>>, vector<8x8x128xf32>
    %80 = vector.shape_cast %79 : vector<8x8x128xf32> to vector<64x128xf32>
    %81 = tpu.concatenate %76, %78, %80 in 1 : vector<64x128xf32>, vector<64x128xf32>, vector<64x128xf32> -> vector<64x384xf32>
    %c1_86 = arith.constant 1 : index
    %c1_87 = arith.constant 1 : index
    %c0_88 = arith.constant 0 : index
    %c0_89 = arith.constant 0 : index
    %82 = vector.load %arg4[%c1_86, %c1_87, %c0_88, %c0_89] : memref<4x3x384x128xf32, #tpu.memory_space<vmem>>, vector<1x1x384x128xf32>
    %83 = vector.shape_cast %82 : vector<1x1x384x128xf32> to vector<384x128xf32>
    %cst_90 = arith.constant dense<0.000000e+00> : vector<64x128xf32>
    %84 = tpu.matmul %81, %83, %cst_90 {dimension_numbers = #tpu.dot_dimension_numbers<[1], [0], [0], [1], [0, 0, 1, 1], [], []>} : vector<64x384xf32>, vector<384x128xf32>, vector<64x128xf32> -> vector<64x128xf32>
    %85 = arith.addf %74, %84 : vector<64x128xf32>
    %c2_91 = arith.constant 2 : index
    %c0_92 = arith.constant 0 : index
    %c0_93 = arith.constant 0 : index
    %86 = vector.load %arg7[%c2_91, %c0_92, %c0_93] : memref<10x10x128xf32, #tpu.memory_space<vmem>>, vector<8x8x128xf32>
    %87 = vector.shape_cast %86 : vector<8x8x128xf32> to vector<64x128xf32>
    %c2_94 = arith.constant 2 : index
    %c1_95 = arith.constant 1 : index
    %c0_96 = arith.constant 0 : index
    %88 = vector.load %arg7[%c2_94, %c1_95, %c0_96] : memref<10x10x128xf32, #tpu.memory_space<vmem>>, vector<8x8x128xf32>
    %89 = vector.shape_cast %88 : vector<8x8x128xf32> to vector<64x128xf32>
    %c2_97 = arith.constant 2 : index
    %c2_98 = arith.constant 2 : index
    %c0_99 = arith.constant 0 : index
    %90 = vector.load %arg7[%c2_97, %c2_98, %c0_99] : memref<10x10x128xf32, #tpu.memory_space<vmem>>, vector<8x8x128xf32>
    %91 = vector.shape_cast %90 : vector<8x8x128xf32> to vector<64x128xf32>
    %92 = tpu.concatenate %87, %89, %91 in 1 : vector<64x128xf32>, vector<64x128xf32>, vector<64x128xf32> -> vector<64x384xf32>
    %c1_100 = arith.constant 1 : index
    %c2_101 = arith.constant 2 : index
    %c0_102 = arith.constant 0 : index
    %c0_103 = arith.constant 0 : index
    %93 = vector.load %arg4[%c1_100, %c2_101, %c0_102, %c0_103] : memref<4x3x384x128xf32, #tpu.memory_space<vmem>>, vector<1x1x384x128xf32>
    %94 = vector.shape_cast %93 : vector<1x1x384x128xf32> to vector<384x128xf32>
    %cst_104 = arith.constant dense<0.000000e+00> : vector<64x128xf32>
    %95 = tpu.matmul %92, %94, %cst_104 {dimension_numbers = #tpu.dot_dimension_numbers<[1], [0], [0], [1], [0, 0, 1, 1], [], []>} : vector<64x384xf32>, vector<384x128xf32>, vector<64x128xf32> -> vector<64x128xf32>
    %96 = arith.addf %85, %95 : vector<64x128xf32>
    %c1_105 = arith.constant 1 : index
    %c0_106 = arith.constant 0 : index
    %c0_107 = arith.constant 0 : index
    %97 = vector.load %arg5[%c1_105, %c0_106, %c0_107] : memref<4x1x128xf32, #tpu.memory_space<vmem>>, vector<1x1x128xf32>
    %98 = vector.shape_cast %97 : vector<1x1x128xf32> to vector<1x128xf32>
    %99 = vector.broadcast %98 : vector<1x128xf32> to vector<64x128xf32>
    %100 = arith.addf %96, %99 : vector<64x128xf32>
    %101 = arith.addf %100, %16 : vector<64x128xf32>
    %cst_108 = arith.constant 0.000000e+00 : f32
    %102 = vector.broadcast %cst_108 : f32 to vector<64x128xf32>
    %103 = arith.maximumf %101, %102 : vector<64x128xf32>
    %104 = vector.shape_cast %103 : vector<64x128xf32> to vector<8x8x128xf32>
    %c1_109 = arith.constant 1 : index
    %c1_110 = arith.constant 1 : index
    %c0_111 = arith.constant 0 : index
    %105 = vector.load %arg7[%c1_109, %c1_110, %c0_111] : memref<10x10x128xf32, #tpu.memory_space<vmem>>, vector<8x8x128xf32>
    tpu.vector_store %arg7[%c1_109, %c1_110, %c0_111], %104 {strides = array<i32>} : memref<10x10x128xf32, #tpu.memory_space<vmem>>, vector<8x8x128xf32>,
    %cst_112 = arith.constant 0.000000e+00 : f32
    %106 = vector.broadcast %cst_112 : f32 to vector<64x128xf32>
    %c0_113 = arith.constant 0 : index
    %c0_114 = arith.constant 0 : index
    %c0_115 = arith.constant 0 : index
    %107 = vector.load %arg7[%c0_113, %c0_114, %c0_115] : memref<10x10x128xf32, #tpu.memory_space<vmem>>, vector<8x8x128xf32>
    %108 = vector.shape_cast %107 : vector<8x8x128xf32> to vector<64x128xf32>
    %c0_116 = arith.constant 0 : index
    %c1_117 = arith.constant 1 : index
    %c0_118 = arith.constant 0 : index
    %109 = vector.load %arg7[%c0_116, %c1_117, %c0_118] : memref<10x10x128xf32, #tpu.memory_space<vmem>>, vector<8x8x128xf32>
    %110 = vector.shape_cast %109 : vector<8x8x128xf32> to vector<64x128xf32>
    %c0_119 = arith.constant 0 : index
    %c2_120 = arith.constant 2 : index
    %c0_121 = arith.constant 0 : index
    %111 = vector.load %arg7[%c0_119, %c2_120, %c0_121] : memref<10x10x128xf32, #tpu.memory_space<vmem>>, vector<8x8x128xf32>
    %112 = vector.shape_cast %111 : vector<8x8x128xf32> to vector<64x128xf32>
    %113 = tpu.concatenate %108, %110, %112 in 1 : vector<64x128xf32>, vector<64x128xf32>, vector<64x128xf32> -> vector<64x384xf32>
    %c2_122 = arith.constant 2 : index
    %c0_123 = arith.constant 0 : index
    %c0_124 = arith.constant 0 : index
    %c0_125 = arith.constant 0 : index
    %114 = vector.load %arg4[%c2_122, %c0_123, %c0_124, %c0_125] : memref<4x3x384x128xf32, #tpu.memory_space<vmem>>, vector<1x1x384x128xf32>
    %115 = vector.shape_cast %114 : vector<1x1x384x128xf32> to vector<384x128xf32>
    %cst_126 = arith.constant dense<0.000000e+00> : vector<64x128xf32>
    %116 = tpu.matmul %113, %115, %cst_126 {dimension_numbers = #tpu.dot_dimension_numbers<[1], [0], [0], [1], [0, 0, 1, 1], [], []>} : vector<64x384xf32>, vector<384x128xf32>, vector<64x128xf32> -> vector<64x128xf32>
    %117 = arith.addf %106, %116 : vector<64x128xf32>
    %c1_127 = arith.constant 1 : index
    %c0_128 = arith.constant 0 : index
    %c0_129 = arith.constant 0 : index
    %118 = vector.load %arg7[%c1_127, %c0_128, %c0_129] : memref<10x10x128xf32, #tpu.memory_space<vmem>>, vector<8x8x128xf32>
    %119 = vector.shape_cast %118 : vector<8x8x128xf32> to vector<64x128xf32>
    %c1_130 = arith.constant 1 : index
    %c1_131 = arith.constant 1 : index
    %c0_132 = arith.constant 0 : index
    %120 = vector.load %arg7[%c1_130, %c1_131, %c0_132] : memref<10x10x128xf32, #tpu.memory_space<vmem>>, vector<8x8x128xf32>
    %121 = vector.shape_cast %120 : vector<8x8x128xf32> to vector<64x128xf32>
    %c1_133 = arith.constant 1 : index
    %c2_134 = arith.constant 2 : index
    %c0_135 = arith.constant 0 : index
    %122 = vector.load %arg7[%c1_133, %c2_134, %c0_135] : memref<10x10x128xf32, #tpu.memory_space<vmem>>, vector<8x8x128xf32>
    %123 = vector.shape_cast %122 : vector<8x8x128xf32> to vector<64x128xf32>
    %124 = tpu.concatenate %119, %121, %123 in 1 : vector<64x128xf32>, vector<64x128xf32>, vector<64x128xf32> -> vector<64x384xf32>
    %c2_136 = arith.constant 2 : index
    %c1_137 = arith.constant 1 : index
    %c0_138 = arith.constant 0 : index
    %c0_139 = arith.constant 0 : index
    %125 = vector.load %arg4[%c2_136, %c1_137, %c0_138, %c0_139] : memref<4x3x384x128xf32, #tpu.memory_space<vmem>>, vector<1x1x384x128xf32>
    %126 = vector.shape_cast %125 : vector<1x1x384x128xf32> to vector<384x128xf32>
    %cst_140 = arith.constant dense<0.000000e+00> : vector<64x128xf32>
    %127 = tpu.matmul %124, %126, %cst_140 {dimension_numbers = #tpu.dot_dimension_numbers<[1], [0], [0], [1], [0, 0, 1, 1], [], []>} : vector<64x384xf32>, vector<384x128xf32>, vector<64x128xf32> -> vector<64x128xf32>
    %128 = arith.addf %117, %127 : vector<64x128xf32>
    %c2_141 = arith.constant 2 : index
    %c0_142 = arith.constant 0 : index
    %c0_143 = arith.constant 0 : index
    %129 = vector.load %arg7[%c2_141, %c0_142, %c0_143] : memref<10x10x128xf32, #tpu.memory_space<vmem>>, vector<8x8x128xf32>
    %130 = vector.shape_cast %129 : vector<8x8x128xf32> to vector<64x128xf32>
    %c2_144 = arith.constant 2 : index
    %c1_145 = arith.constant 1 : index
    %c0_146 = arith.constant 0 : index
    %131 = vector.load %arg7[%c2_144, %c1_145, %c0_146] : memref<10x10x128xf32, #tpu.memory_space<vmem>>, vector<8x8x128xf32>
    %132 = vector.shape_cast %131 : vector<8x8x128xf32> to vector<64x128xf32>
    %c2_147 = arith.constant 2 : index
    %c2_148 = arith.constant 2 : index
    %c0_149 = arith.constant 0 : index
    %133 = vector.load %arg7[%c2_147, %c2_148, %c0_149] : memref<10x10x128xf32, #tpu.memory_space<vmem>>, vector<8x8x128xf32>
    %134 = vector.shape_cast %133 : vector<8x8x128xf32> to vector<64x128xf32>
    %135 = tpu.concatenate %130, %132, %134 in 1 : vector<64x128xf32>, vector<64x128xf32>, vector<64x128xf32> -> vector<64x384xf32>
    %c2_150 = arith.constant 2 : index
    %c2_151 = arith.constant 2 : index
    %c0_152 = arith.constant 0 : index
    %c0_153 = arith.constant 0 : index
    %136 = vector.load %arg4[%c2_150, %c2_151, %c0_152, %c0_153] : memref<4x3x384x128xf32, #tpu.memory_space<vmem>>, vector<1x1x384x128xf32>
    %137 = vector.shape_cast %136 : vector<1x1x384x128xf32> to vector<384x128xf32>
    %cst_154 = arith.constant dense<0.000000e+00> : vector<64x128xf32>
    %138 = tpu.matmul %135, %137, %cst_154 {dimension_numbers = #tpu.dot_dimension_numbers<[1], [0], [0], [1], [0, 0, 1, 1], [], []>} : vector<64x384xf32>, vector<384x128xf32>, vector<64x128xf32> -> vector<64x128xf32>
    %139 = arith.addf %128, %138 : vector<64x128xf32>
    %c2_155 = arith.constant 2 : index
    %c0_156 = arith.constant 0 : index
    %c0_157 = arith.constant 0 : index
    %140 = vector.load %arg5[%c2_155, %c0_156, %c0_157] : memref<4x1x128xf32, #tpu.memory_space<vmem>>, vector<1x1x128xf32>
    %141 = vector.shape_cast %140 : vector<1x1x128xf32> to vector<1x128xf32>
    %142 = vector.broadcast %141 : vector<1x128xf32> to vector<64x128xf32>
    %143 = arith.addf %139, %142 : vector<64x128xf32>
    %cst_158 = arith.constant 0.000000e+00 : f32
    %144 = vector.broadcast %cst_158 : f32 to vector<64x128xf32>
    %145 = arith.maximumf %143, %144 : vector<64x128xf32>
    %146 = vector.shape_cast %145 : vector<64x128xf32> to vector<8x8x128xf32>
    %c1_159 = arith.constant 1 : index
    %c1_160 = arith.constant 1 : index
    %c0_161 = arith.constant 0 : index
    %147 = vector.load %arg7[%c1_159, %c1_160, %c0_161] : memref<10x10x128xf32, #tpu.memory_space<vmem>>, vector<8x8x128xf32>
    tpu.vector_store %arg7[%c1_159, %c1_160, %c0_161], %146 {strides = array<i32>} : memref<10x10x128xf32, #tpu.memory_space<vmem>>, vector<8x8x128xf32>,
    %cst_162 = arith.constant 0.000000e+00 : f32
    %148 = vector.broadcast %cst_162 : f32 to vector<64x128xf32>
    %c0_163 = arith.constant 0 : index
    %c0_164 = arith.constant 0 : index
    %c0_165 = arith.constant 0 : index
    %149 = vector.load %arg7[%c0_163, %c0_164, %c0_165] : memref<10x10x128xf32, #tpu.memory_space<vmem>>, vector<8x8x128xf32>
    %150 = vector.shape_cast %149 : vector<8x8x128xf32> to vector<64x128xf32>
    %c0_166 = arith.constant 0 : index
    %c1_167 = arith.constant 1 : index
    %c0_168 = arith.constant 0 : index
    %151 = vector.load %arg7[%c0_166, %c1_167, %c0_168] : memref<10x10x128xf32, #tpu.memory_space<vmem>>, vector<8x8x128xf32>
    %152 = vector.shape_cast %151 : vector<8x8x128xf32> to vector<64x128xf32>
    %c0_169 = arith.constant 0 : index
    %c2_170 = arith.constant 2 : index
    %c0_171 = arith.constant 0 : index
    %153 = vector.load %arg7[%c0_169, %c2_170, %c0_171] : memref<10x10x128xf32, #tpu.memory_space<vmem>>, vector<8x8x128xf32>
    %154 = vector.shape_cast %153 : vector<8x8x128xf32> to vector<64x128xf32>
    %155 = tpu.concatenate %150, %152, %154 in 1 : vector<64x128xf32>, vector<64x128xf32>, vector<64x128xf32> -> vector<64x384xf32>
    %c3 = arith.constant 3 : index
    %c0_172 = arith.constant 0 : index
    %c0_173 = arith.constant 0 : index
    %c0_174 = arith.constant 0 : index
    %156 = vector.load %arg4[%c3, %c0_172, %c0_173, %c0_174] : memref<4x3x384x128xf32, #tpu.memory_space<vmem>>, vector<1x1x384x128xf32>
    %157 = vector.shape_cast %156 : vector<1x1x384x128xf32> to vector<384x128xf32>
    %cst_175 = arith.constant dense<0.000000e+00> : vector<64x128xf32>
    %158 = tpu.matmul %155, %157, %cst_175 {dimension_numbers = #tpu.dot_dimension_numbers<[1], [0], [0], [1], [0, 0, 1, 1], [], []>} : vector<64x384xf32>, vector<384x128xf32>, vector<64x128xf32> -> vector<64x128xf32>
    %159 = arith.addf %148, %158 : vector<64x128xf32>
    %c1_176 = arith.constant 1 : index
    %c0_177 = arith.constant 0 : index
    %c0_178 = arith.constant 0 : index
    %160 = vector.load %arg7[%c1_176, %c0_177, %c0_178] : memref<10x10x128xf32, #tpu.memory_space<vmem>>, vector<8x8x128xf32>
    %161 = vector.shape_cast %160 : vector<8x8x128xf32> to vector<64x128xf32>
    %c1_179 = arith.constant 1 : index
    %c1_180 = arith.constant 1 : index
    %c0_181 = arith.constant 0 : index
    %162 = vector.load %arg7[%c1_179, %c1_180, %c0_181] : memref<10x10x128xf32, #tpu.memory_space<vmem>>, vector<8x8x128xf32>
    %163 = vector.shape_cast %162 : vector<8x8x128xf32> to vector<64x128xf32>
    %c1_182 = arith.constant 1 : index
    %c2_183 = arith.constant 2 : index
    %c0_184 = arith.constant 0 : index
    %164 = vector.load %arg7[%c1_182, %c2_183, %c0_184] : memref<10x10x128xf32, #tpu.memory_space<vmem>>, vector<8x8x128xf32>
    %165 = vector.shape_cast %164 : vector<8x8x128xf32> to vector<64x128xf32>
    %166 = tpu.concatenate %161, %163, %165 in 1 : vector<64x128xf32>, vector<64x128xf32>, vector<64x128xf32> -> vector<64x384xf32>
    %c3_185 = arith.constant 3 : index
    %c1_186 = arith.constant 1 : index
    %c0_187 = arith.constant 0 : index
    %c0_188 = arith.constant 0 : index
    %167 = vector.load %arg4[%c3_185, %c1_186, %c0_187, %c0_188] : memref<4x3x384x128xf32, #tpu.memory_space<vmem>>, vector<1x1x384x128xf32>
    %168 = vector.shape_cast %167 : vector<1x1x384x128xf32> to vector<384x128xf32>
    %cst_189 = arith.constant dense<0.000000e+00> : vector<64x128xf32>
    %169 = tpu.matmul %166, %168, %cst_189 {dimension_numbers = #tpu.dot_dimension_numbers<[1], [0], [0], [1], [0, 0, 1, 1], [], []>} : vector<64x384xf32>, vector<384x128xf32>, vector<64x128xf32> -> vector<64x128xf32>
    %170 = arith.addf %159, %169 : vector<64x128xf32>
    %c2_190 = arith.constant 2 : index
    %c0_191 = arith.constant 0 : index
    %c0_192 = arith.constant 0 : index
    %171 = vector.load %arg7[%c2_190, %c0_191, %c0_192] : memref<10x10x128xf32, #tpu.memory_space<vmem>>, vector<8x8x128xf32>
    %172 = vector.shape_cast %171 : vector<8x8x128xf32> to vector<64x128xf32>
    %c2_193 = arith.constant 2 : index
    %c1_194 = arith.constant 1 : index
    %c0_195 = arith.constant 0 : index
    %173 = vector.load %arg7[%c2_193, %c1_194, %c0_195] : memref<10x10x128xf32, #tpu.memory_space<vmem>>, vector<8x8x128xf32>
    %174 = vector.shape_cast %173 : vector<8x8x128xf32> to vector<64x128xf32>
    %c2_196 = arith.constant 2 : index
    %c2_197 = arith.constant 2 : index
    %c0_198 = arith.constant 0 : index
    %175 = vector.load %arg7[%c2_196, %c2_197, %c0_198] : memref<10x10x128xf32, #tpu.memory_space<vmem>>, vector<8x8x128xf32>
    %176 = vector.shape_cast %175 : vector<8x8x128xf32> to vector<64x128xf32>
    %177 = tpu.concatenate %172, %174, %176 in 1 : vector<64x128xf32>, vector<64x128xf32>, vector<64x128xf32> -> vector<64x384xf32>
    %c3_199 = arith.constant 3 : index
    %c2_200 = arith.constant 2 : index
    %c0_201 = arith.constant 0 : index
    %c0_202 = arith.constant 0 : index
    %178 = vector.load %arg4[%c3_199, %c2_200, %c0_201, %c0_202] : memref<4x3x384x128xf32, #tpu.memory_space<vmem>>, vector<1x1x384x128xf32>
    %179 = vector.shape_cast %178 : vector<1x1x384x128xf32> to vector<384x128xf32>
    %cst_203 = arith.constant dense<0.000000e+00> : vector<64x128xf32>
    %180 = tpu.matmul %177, %179, %cst_203 {dimension_numbers = #tpu.dot_dimension_numbers<[1], [0], [0], [1], [0, 0, 1, 1], [], []>} : vector<64x384xf32>, vector<384x128xf32>, vector<64x128xf32> -> vector<64x128xf32>
    %181 = arith.addf %170, %180 : vector<64x128xf32>
    %c3_204 = arith.constant 3 : index
    %c0_205 = arith.constant 0 : index
    %c0_206 = arith.constant 0 : index
    %182 = vector.load %arg5[%c3_204, %c0_205, %c0_206] : memref<4x1x128xf32, #tpu.memory_space<vmem>>, vector<1x1x128xf32>
    %183 = vector.shape_cast %182 : vector<1x1x128xf32> to vector<1x128xf32>
    %184 = vector.broadcast %183 : vector<1x128xf32> to vector<64x128xf32>
    %185 = arith.addf %181, %184 : vector<64x128xf32>
    %186 = arith.addf %185, %103 : vector<64x128xf32>
    %cst_207 = arith.constant 0.000000e+00 : f32
    %187 = vector.broadcast %cst_207 : f32 to vector<64x128xf32>
    %188 = arith.maximumf %186, %187 : vector<64x128xf32>
    %c0_208 = arith.constant 0 : index
    %c0_209 = arith.constant 0 : index
    %c0_210 = arith.constant 0 : index
    %189 = vector.load %arg6[%c0_208, %c0_209, %c0_210] : memref<1x64x128xf32, #tpu.memory_space<vmem>>, vector<1x64x128xf32>
    %190 = vector.shape_cast %189 : vector<1x64x128xf32> to vector<64x128xf32>
    %191 = vector.shape_cast %188 : vector<64x128xf32> to vector<1x64x128xf32>
    tpu.vector_store %arg6[%c0_208, %c0_209, %c0_210], %191 {strides = array<i32>} : memref<1x64x128xf32, #tpu.memory_space<vmem>>, vector<1x64x128xf32>,
    return
  }
  func.func @transform_0(%arg0: i32) -> (i32, i32, i32, i32) {
    %c0_i32 = arith.constant 0 : i32
    %c0_i32_0 = arith.constant 0 : i32
    %c0_i32_1 = arith.constant 0 : i32
    %c0_i32_2 = arith.constant 0 : i32
    return %arg0, %c0_i32, %c0_i32_0, %c0_i32_1 : i32, i32, i32, i32
  }
  func.func @transform_1(%arg0: i32) -> (i32, i32) {
    %c0_i32 = arith.constant 0 : i32
    %c0_i32_0 = arith.constant 0 : i32
    %c0_i32_1 = arith.constant 0 : i32
    return %c0_i32, %c0_i32_0 : i32, i32
  }
  func.func @transform_2(%arg0: i32) -> (i32, i32) {
    %c0_i32 = arith.constant 0 : i32
    %c0_i32_0 = arith.constant 0 : i32
    %c0_i32_1 = arith.constant 0 : i32
    return %c0_i32, %c0_i32_0 : i32, i32
  }
  func.func @transform_3(%arg0: i32) -> (i32, i32, i32, i32) {
    %c0_i32 = arith.constant 0 : i32
    %c0_i32_0 = arith.constant 0 : i32
    %c0_i32_1 = arith.constant 0 : i32
    %c0_i32_2 = arith.constant 0 : i32
    %c0_i32_3 = arith.constant 0 : i32
    return %c0_i32, %c0_i32_0, %c0_i32_1, %c0_i32_2 : i32, i32, i32, i32
  }
  func.func @transform_4(%arg0: i32) -> (i32, i32, i32) {
    %c0_i32 = arith.constant 0 : i32
    %c0_i32_0 = arith.constant 0 : i32
    %c0_i32_1 = arith.constant 0 : i32
    %c0_i32_2 = arith.constant 0 : i32
    return %c0_i32, %c0_i32_0, %c0_i32_1 : i32, i32, i32
  }
  func.func @transform_5(%arg0: i32) -> (i32, i32, i32) {
    %c0_i32 = arith.constant 0 : i32
    %c0_i32_0 = arith.constant 0 : i32
    %c0_i32_1 = arith.constant 0 : i32
    return %arg0, %c0_i32, %c0_i32_0 : i32, i32, i32
  }
}

</mosaic_0001>

<bundles_post_ra>
// kernel: tpu_custom_call.1
= control target key start
LH: loop header
LB: loop body
LE: loop exit
PB: predicated region body
PF: predicated region fallthrough
CT: control target
= control target key end

     0   :  { %s4601_s0 = inlined_call_operand.vmem [shape: f32[2,16,8,8], index: 0, kind: input, shape index: {}]   ;;  %s4602_s1 = inlined_call_operand.hbm [shape: f32[4,128], index: 1, kind: input, shape index: {}]   ;;  %s4603_s2 = inlined_call_operand.hbm [shape: f32[1,128], index: 2, kind: input, shape index: {}]   ;;  %s4604_s3 = inlined_call_operand.hbm [shape: f32[4,3,384,128], index: 3, kind: input, shape index: {}]   ;;  %s4605_s4 = inlined_call_operand.hbm [shape: f32[4,1,128], index: 4, kind: input, shape index: {}]   ;;  %s4606_s5 = inlined_call_operand.hbm [shape: f32[2,64,128], index: 5, kind: output, shape index: {}]  }
   0x1   :  { %4611 = sst [smem:[#allocation19_spill]] %s4602_s1 }
   0x2   :  { %10 = vsyncpa [#allocation4], 0 }
   0x3   :  { %11 = vsyncpa [#allocation7], 0 }
   0x4   :  { %12 = vsyncpa [#allocation10], 0 }
   0x5   :  { %13 = vsyncpa [#allocation5], 0 }
   0x6   :  { %15 = vsyncpa [#allocation5 + $0x1], 0  ;;  %s3454_s18 = smov 0   ;;  %s3456_s19 = smov 0  }
   0x7   :  { %s3458_s20 = smov 0   ;;  %s3460_s21 = smov 0  }
   0x8 LB: > { %s3475_s22 = sadd.s32 4294967295, %s3410_s21   ;;  %s3088_s23 = sadd.s32 4294967294, %s3410_s21   ;;  %s3410_s21 = sphi %s3460_s21, %s4630_s21   ;;  %s3406_s20 = sphi %s3458_s20, %s4629_s20   ;;  %s3402_s19 = sphi %s3456_s19, %s4628_s19   ;;  %s3398_s18 = sphi %s3454_s18, %s4627_s18  }
   0x9   : > { %s3479_s24 = sadd.s32 1, %s3410_s21   ;;  %s138_s25 = sadd.s32 1, %s3406_s20 }
   0xa   : > { %s135_s26 = ssub.s32 %s3410_s21, %s3479_s24  ;;  %p148_p0 = scmp.ne.s32.totalorder %s3406_s20, %s3402_s19 }
   0xb   : > { %p136_p1 = scmp.eq.s32.totalorder %s135_s26, 0  ;;  %p149_p2 = scmp.eq.s32.totalorder %s3475_s22, 1 }
   0xc   : > { %p154_p3 = scmp.ne.s32.totalorder %s3402_s19, %s3398_s18  ;;  %p155_p4 = scmp.eq.s32.totalorder %s3088_s23, 1 }
   0xd   : > { %s3490_s27 = scalar_select %p136_p1, %s3406_s20, %s138_s25  }
   0xe   : > { %p3492_p5 = por %p149_p2, %p148_p0  ;;  %p3496_p6 = por %p155_p4, %p154_p3 }
   0xf   : > { %p3089_p7 = scmp.ge.s32.totalorder %s3410_s21, 1  ;;  %p162_p8 = scmp.lt.s32.totalorder %s3410_s21, 3 }
  0x10   : > { %p3155_p9 = scmp.eq.s32.totalorder %s3475_s22, 0  ;;  %s186_s8 = sshll.u32 %s4603_s2, 4  ;;  %s187_s8 = int_to_ptr.hbm [resolvable:$true] %s186_s8 }
  0x11   : > { %p3503_p10 = pnand %p3089_p7, %p162_p8  ;;  %s3412_s9 = smov [#allocation6]  }
  0x12   : > { %s188_s10 = sshll.u32 %s3412_s9, 4  ;;  %s4615_s1 = sld [smem:[#allocation19_spill]]  ;;  %s189_s10 = int_to_ptr.vmem [resolvable:$true] %s188_s10 }
  0x13   : > { %p3138_p11 = pneg %p3503_p10  ;;  %s197_s17 = sshll.u32 %s4604_s3, 4  ;;  %s198_s17 = int_to_ptr.hbm [resolvable:$true] %s197_s17 }
  0x14   : > { %s3413_s23 = smov [#allocation3]   ;;  %s3414_s26 = smov [#allocation8]  }
  0x15   : > { %p3517_p12 = pnand %p3155_p9, %p3138_p11  ;;  %s176_s25 = sshll.u32 %s3413_s23, 4  ;;  %s177_s25 = int_to_ptr.vmem [resolvable:$true] %s176_s25 }
  0x16   : > { %s199_s6 = sshll.u32 %s3414_s26, 4  ;;  %s211_s11 = sshll.u32 %s4605_s4, 4  ;;  %s200_s6 = int_to_ptr.vmem [resolvable:$true] %s199_s6  ;;  %s212_s11 = int_to_ptr.hbm [resolvable:$true] %s211_s11 }
  0x17   : > { %3144 = dma.hbm_to_vmem [thread:$0]  (!%p3517_p12), %s187_s8, 16, %s189_s10, [#allocation7]  }
  0x18   : > { %s174_s13 = sshll.u32 %s4615_s1, 4  ;;  %s3415_s12 = smov 128   ;;  %s175_s13 = int_to_ptr.hbm [resolvable:$true] %s174_s13 }
  0x19   : > { %3141 = dma.hbm_to_vmem [thread:$0]  (!%p3517_p12), %s175_s13, 64, %s177_s25, [#allocation4]  }
  0x1a   : > { %s3416_s1 = smov 8   ;;  %s3417_s15 = smov [#allocation9]  }
  0x1b   : > { %3147 = dma.hbm_to_vmem [thread:$0]  (!%p3517_p12), %s198_s17, 73728, %s200_s6, [#allocation7], %s3415_s12, %s3415_s12, %s3416_s1  }
  0x1c   : > { %s213_s16 = sshll.u32 %s3417_s15, 4  ;;  %s3418_s8 = smov 16   ;;  %s214_s16 = int_to_ptr.vmem [resolvable:$true] %s213_s16 }
  0x1d   : > { %s3419_s10 = smov 1   ;;  %237 = sbr.rel (%p3503_p10) target bundleno = 1451 (0x5ab), region = 40 }
  0x1e   : > { %3150 = dma.hbm_to_vmem [thread:$0]  (!%p3517_p12), %s212_s11, 64, %s214_s16, [#allocation10], %s3418_s8, %s3418_s8, %s3419_s10  }
  0x22   : > { %3381 = dma.done.wait (%p3155_p9), [#allocation4], 64  }
  0x23   : > { %3383 = vsyncadd (%p3155_p9), [#allocation4], 4294967232 }
  0x24   : > { %3385 = dma.done.wait (%p3155_p9), [#allocation7], 73744  }
  0x25   : > { %3387 = vsyncadd (%p3155_p9), [#allocation7], 4294893552 }
  0x26   : > { %3389 = dma.done.wait (%p3155_p9), [#allocation10], 64  }
  0x27   : > { %3391 = vsyncadd (%p3155_p9), [#allocation10], 4294967232  ;;  %p281_p13 = scmp.lt.s32.totalorder %s3475_s22, 1  ;;  %s3420_s23 = smov 124   ;;  %v350_v24 = vld [vmem:[#allocation3] sm:$0xf] }
  0x28   : > { %vm380_vm0 = vcmask 1043456   ;;  %v493_v26 = vld [vmem:[#allocation8 + $0x78] sm:$0xff]  ;;  %v492_v27 = vld [vmem:[#allocation8 + $0x70] sm:$0xff]  ;;  %vm355_vm1 = vcmask 31744   ;;  %v491_v31 = vld [vmem:[#allocation8 + $0x68] sm:$0xff]  ;;  %s278_s25 = sand.u32 1, %s3402_s19  }
  0x29   : > { %s282_s1 = scalar_select %p281_p13, %s3475_s22, 1  ;;  %3103 = vmatpush.msk.msra.mxu0 %vm380_vm0, %v350_v24  ;;  %3119 = vmatpush.msk.msra.mxu1 %vm380_vm0, %v350_v24  ;;  %v566_v29 = vld [vmem:[#allocation8 + $0x1f8] sm:$0xff]  ;;  %v565_v33 = vld [vmem:[#allocation8 + $0x1f0] sm:$0xff]  ;;  %v490_v36 = vld [vmem:[#allocation8 + $0x60] sm:$0xff] }
  0x2a   : > { %v582_v30 = vld [vmem:[#allocation8 + $0x278] sm:$0xff]  ;;  %v581_v34 = vld [vmem:[#allocation8 + $0x270] sm:$0xff]  ;;  %v564_v37 = vld [vmem:[#allocation8 + $0x1e8] sm:$0xff]  ;;  %s3100_s26 = sshll.u32 %s278_s25, 6  ;;  %s3118_s7 = sshll.u32 %s3475_s22, 6 }
  0x2b   : > { %s3117_s30 = sshll.u32 %s282_s1, 7  ;;  %722 = vmatpush.msrb.mxu0 %v493_v26  ;;  %599 = vmatpush.msrb.mxu1 %v566_v29  ;;  %v598_v32 = vld [vmem:[#allocation8 + $0x2f8] sm:$0xff]  ;;  %v597_v35 = vld [vmem:[#allocation8 + $0x2f0] sm:$0xff]  ;;  %v580_v38 = vld [vmem:[#allocation8 + $0x268] sm:$0xff]  ;;  %s4519_s6 = scalar_lea.vmem [#allocation11], %s3100_s26 }
  0x2c   : > { %s285_s17 = scalar_lea.vmem %s4601_s0, %s3117_s30  ;;  %640 = vmatpush.msra.mxu2 %v582_v30  ;;  %681 = vmatpush.msra.mxu3 %v598_v32  ;;  %v596_v40 = vld [vmem:[#allocation8 + $0x2e8] sm:$0xff]  ;;  %v489_v42 = vld [vmem:[#allocation8 + $0x58] sm:$0xff]  ;;  %v563_v43 = vld [vmem:[#allocation8 + $0x1e0] sm:$0xff]  ;;  %v3421_v32 = vmov 0.0   ;;  %s2981_s12 = scalar_lea.hbm %s4606_s5, %s3118_s7 }
  0x2d   : > { %v286_v0 = vld [vmem:[%s285_s17] sm:$0xff]  ;;  %v287_v1 = vld [vmem:[%s285_s17 + $0x8] sm:$0xff]  ;;  %v288_v8 = vld [vmem:[%s285_s17 + $0x10] sm:$0xff]  ;;  %723 = vmatpush.msrb.mxu0 %v492_v27  ;;  %600 = vmatpush.msrb.mxu1 %v565_v33  ;;  %427 = vst [vmem:[#allocation2 + $0x10] sm:$0xff] %v3421_v32  ;;  %s2982_s15 = sshll.u32 %s4519_s6, 4  ;;  %s2984_s16 = sshll.u32 %s2981_s12, 4  ;;  %s2983_s15 = int_to_ptr.vmem [resolvable:$true] %s2982_s15  ;;  %s2985_s16 = int_to_ptr.hbm [resolvable:$true] %s2984_s16 }
  0x2e   : > { %v3554_v2 = vmax.f32 %v286_v0, %v287_v1  ;;  %v290_v3 = vld [vmem:[%s285_s17 + $0x20] sm:$0xff]  ;;  %v291_v4 = vld [vmem:[%s285_s17 + $0x28] sm:$0xff]  ;;  %v289_v9 = vld [vmem:[%s285_s17 + $0x18] sm:$0xff]  ;;  %641 = vmatpush.msra.mxu2 %v581_v34  ;;  %682 = vmatpush.msra.mxu3 %v597_v35  ;;  %428 = vst [vmem:[#allocation2 + $0x18] sm:$0x3] %v3421_v32  ;;  %s2970_s22 = scalar_lea.sflag [#allocation5], %s278_s25 }
  0x2f   : > { %v3556_v5 = vmax.f32 %v290_v3, %v291_v4  ;;  %v294_v6 = vld [vmem:[%s285_s17 + $0x40] sm:$0xff]  ;;  %v295_v7 = vld [vmem:[%s285_s17 + $0x48] sm:$0xff]  ;;  %v292_v10 = vld [vmem:[%s285_s17 + $0x30] sm:$0xff]  ;;  %v3560_v13 = vmax.f32 %v288_v8, %v289_v9  ;;  %724 = vmatpush.msrb.mxu0 %v491_v31  ;;  %601 = vmatpush.msrb.mxu1 %v564_v37  ;;  %425 = vst [vmem:[#allocation2] sm:$0xff] %v3421_v32  ;;  %s3350_s8 = sshra.s32 %s2985_s16, 4  ;;  %s3356_s13 = scalar_lea.hbm %s4606_s5, 128  ;;  %s3351_s8 = int_to_ptr.hbm [resolvable:$true] %s3350_s8 }
  0x30   : > { %318 = vrot.lane.b32.xlu0 %v3554_v2, %s3420_s23  ;;  %v306_v11 = vmax.f32 %v294_v6, %v295_v7  ;;  %v293_v12 = vld [vmem:[%s285_s17 + $0x38] sm:$0xff]  ;;  %v296_v14 = vld [vmem:[%s285_s17 + $0x50] sm:$0xff]  ;;  %v298_v18 = vld [vmem:[%s285_s17 + $0x60] sm:$0xff]  ;;  %642 = vmatpush.msra.mxu2 %v580_v38  ;;  %426 = vst [vmem:[#allocation2 + $0x8] sm:$0x3] %v3421_v32  ;;  %s3352_s10 = scalar_lea.hbm %s3351_s8, 64  ;;  %p3357_p3 = scmp.lt.s32.totalorder %s3351_s8, %s4606_s5 }
  0x31   : > { %322 = vrot.lane.b32.xlu1 %v3556_v5, %s3420_s23  ;;  %v297_v15 = vld [vmem:[%s285_s17 + $0x58] sm:$0xff]  ;;  %v3562_v16 = vmax.f32 %v292_v10, %v293_v12  ;;  %v299_v19 = vld [vmem:[%s285_s17 + $0x68] sm:$0xff]  ;;  %v300_v20 = vld [vmem:[%s285_s17 + $0x70] sm:$0xff]  ;;  %725 = vmatpush.msrb.mxu0 %v490_v36  ;;  %429 = vst [vmem:[#allocation2 + $0x20] sm:$0xff] %v3421_v32  ;;  %p3353_p0 = scmp.ne.s32.totalorder %s3351_s8, %s3352_s10  ;;  %p3358_p4 = scmp.lt.s32.totalorder %s3356_s13, %s3352_s10 }
  0x32   : > { %326 = vrot.lane.b32.xlu2 %v306_v11, %s3420_s23  ;;  %v3564_v17 = vmax.f32 %v296_v14, %v297_v15  ;;  %v301_v21 = vld [vmem:[%s285_s17 + $0x78] sm:$0xff]  ;;  %v3569_v22 = vmax.f32 %v298_v18, %v299_v19  ;;  %v579_v45 = vld [vmem:[#allocation8 + $0x260] sm:$0xff]  ;;  %683 = vmatpush.msra.mxu3 %v596_v40  ;;  %v487_v52 = vld [vmem:[#allocation8 + $0x48] sm:$0xff]  ;;  %430 = vst [vmem:[#allocation2 + $0x28] sm:$0x3] %v3421_v32 }
  0x33   : > { %v3571_v23 = vmax.f32 %v300_v20, %v301_v21  ;;  %v595_v46 = vld [vmem:[#allocation8 + $0x2e0] sm:$0xff]  ;;  %v488_v48 = vld [vmem:[#allocation8 + $0x50] sm:$0xff]  ;;  %726 = vmatpush.msrb.mxu0 %v489_v42  ;;  %602 = vmatpush.msrb.mxu1 %v563_v43  ;;  %v562_v50 = vld [vmem:[#allocation8 + $0x1d8] sm:$0xff]  ;;  %431 = vst [vmem:[#allocation2 + $0x30] sm:$0xff] %v3421_v32  ;;  %p3354_p1 = pnand %p3353_p0, %p3492_p5  ;;  %p3359_p7 = por %p3358_p4, %p3357_p3 }
  0x34   : > { %v578_v51 = vld [vmem:[#allocation8 + $0x258] sm:$0xff]  ;;  %643 = vmatpush.msra.mxu2 %v579_v45  ;;  %684 = vmatpush.msra.mxu3 %v595_v46  ;;  %v561_v54 = vld [vmem:[#allocation8 + $0x1d0] sm:$0xff]  ;;  %v486_v56 = vld [vmem:[#allocation8 + $0x40] sm:$0xff]  ;;  %432 = vst [vmem:[#allocation2 + $0x38] sm:$0x3] %v3421_v32 }
  0x35   : > { %v594_v53 = vld [vmem:[#allocation8 + $0x2d8] sm:$0xff]  ;;  %727 = vmatpush.msrb.mxu0 %v488_v48  ;;  %v577_v55 = vld [vmem:[#allocation8 + $0x250] sm:$0xff]  ;;  %603 = vmatpush.msrb.mxu1 %v562_v50  ;;  %v560_v59 = vld [vmem:[#allocation8 + $0x1c8] sm:$0xff]  ;;  %433 = vst [vmem:[#allocation2 + $0x40] sm:$0xff] %v3421_v32  ;;  %p3355_p2 = pneg %p3354_p1 }
  0x36   : > { %644 = vmatpush.msra.mxu2 %v578_v51  ;;  %v593_v57 = vld [vmem:[#allocation8 + $0x2d0] sm:$0xff]  ;;  %685 = vmatpush.msra.mxu3 %v594_v53  ;;  %v485_v61 = vld [vmem:[#allocation8 + $0x38] sm:$0xff]  ;;  %v576_v62 = vld [vmem:[#allocation8 + $0x248] sm:$0xff]  ;;  %434 = vst [vmem:[#allocation2 + $0x48] sm:$0x3] %v3421_v32 }
  0x37   : > { %728 = vmatpush.msrb.mxu0 %v487_v52  ;;  %604 = vmatpush.msrb.mxu1 %v561_v54  ;;  %v592_v63 = vld [vmem:[#allocation8 + $0x2c8] sm:$0xff]  ;;  %v559_v0 = vld [vmem:[#allocation8 + $0x1c0] sm:$0xff]  ;;  %v484_v1 = vld [vmem:[#allocation8 + $0x30] sm:$0xff]  ;;  %435 = vst [vmem:[#allocation2 + $0x50] sm:$0xff] %v3421_v32  ;;  %p3360_p8 = pnand %p3359_p7, %p3355_p2 }
  0x38   : > { %320 = vrot.lane.b32.xlu0 %v3560_v13, %s3420_s23  ;;  %645 = vmatpush.msra.mxu2 %v577_v55  ;;  %v591_v4 = vld [vmem:[#allocation8 + $0x2c0] sm:$0xff]  ;;  %v558_v6 = vld [vmem:[#allocation8 + $0x1b8] sm:$0xff]  ;;  %v483_v7 = vld [vmem:[#allocation8 + $0x28] sm:$0xff]  ;;  %436 = vst [vmem:[#allocation2 + $0x58] sm:$0x3] %v3421_v32 }
  0x39   : > { %324 = vrot.lane.b32.xlu1 %v3562_v16, %s3420_s23  ;;  %729 = vmatpush.msrb.mxu0 %v486_v56  ;;  %v574_v8 = vld [vmem:[#allocation8 + $0x238] sm:$0xff]  ;;  %v557_v10 = vld [vmem:[#allocation8 + $0x1b0] sm:$0xff]  ;;  %v482_v12 = vld [vmem:[#allocation8 + $0x20] sm:$0xff]  ;;  %437 = vst [vmem:[#allocation2 + $0x60] sm:$0xff] %v3421_v32 }
  0x3a   : > { %328 = vrot.lane.b32.xlu2 %v3564_v17, %s3420_s23  ;;  %686 = vmatpush.msra.mxu3 %v593_v57  ;;  %v590_v9 = vld [vmem:[#allocation8 + $0x2b8] sm:$0xff]  ;;  %v589_v18 = vld [vmem:[#allocation8 + $0x2b0] sm:$0xff]  ;;  %v556_v19 = vld [vmem:[#allocation8 + $0x1a8] sm:$0xff]  ;;  %438 = vst [vmem:[#allocation2 + $0x68] sm:$0x3] %v3421_v32 }
  0x3b   : > { %605 = vmatpush.msrb.mxu1 %v560_v59  ;;  %730 = vmatpush.msrb.mxu0 %v485_v61  ;;  %v572_v24 = vld [vmem:[#allocation8 + $0x228] sm:$0xff]  ;;  %v570_v26 = vld [vmem:[#allocation8 + $0x218] sm:$0xff]  ;;  %v569_v27 = vld [vmem:[#allocation8 + $0x210] sm:$0xff]  ;;  %439 = vst [vmem:[#allocation2 + $0x70] sm:$0xff] %v3421_v32 }
  0x3c   : > { %646 = vmatpush.msra.mxu2 %v576_v62  ;;  %687 = vmatpush.msra.mxu3 %v592_v63  ;;  %v479_v29 = vld [vmem:[#allocation8 + $0x8] sm:$0xff]  ;;  %v587_v31 = vld [vmem:[#allocation8 + $0x2a0] sm:$0xff]  ;;  %v554_v34 = vld [vmem:[#allocation8 + $0x198] sm:$0xff]  ;;  %440 = vst [vmem:[#allocation2 + $0x78] sm:$0x3] %v3421_v32 }
  0x3d   : > { %606 = vmatpush.msrb.mxu1 %v559_v0  ;;  %731 = vmatpush.msrb.mxu0 %v484_v1  ;;  %v568_v30 = vld [vmem:[#allocation8 + $0x208] sm:$0xff]  ;;  %v567_v33 = vld [vmem:[#allocation8 + $0x200] sm:$0xff]  ;;  %v586_v35 = vld [vmem:[#allocation8 + $0x298] sm:$0xff]  ;;  %441 = vst [vmem:[#allocation2 + $0x80] sm:$0xff] %v3421_v32 }
  0x3e   : > { %688 = vmatpush.msra.mxu3 %v591_v4  ;;  %v553_v36 = vld [vmem:[#allocation8 + $0x190] sm:$0xff]  ;;  %v552_v38 = vld [vmem:[#allocation8 + $0x188] sm:$0xff]  ;;  %v551_v40 = vld [vmem:[#allocation8 + $0x180] sm:$0xff]  ;;  %442 = vst [vmem:[#allocation2 + $0x88] sm:$0x3] %v3421_v32 }
  0x3f   : > { %607 = vmatpush.msrb.mxu1 %v558_v6  ;;  %732 = vmatpush.msrb.mxu0 %v483_v7  ;;  %v585_v37 = vld [vmem:[#allocation8 + $0x290] sm:$0xff]  ;;  %v509_v42 = vld [vmem:[#allocation8 + $0xf8] sm:$0xff]  ;;  %443 = vst [vmem:[#allocation2 + $0x90] sm:$0xff] %v3421_v32  ;;  %v506_v45 = vld [vmem:[#allocation8 + $0xe0] sm:$0xff] }
  0x40   : > { %330 = vrot.lane.b32.xlu0 %v3569_v22, %s3420_s23  ;;  %689 = vmatpush.msra.mxu3 %v590_v9  ;;  %v508_v43 = vld [vmem:[#allocation8 + $0xf0] sm:$0xff]  ;;  %444 = vst [vmem:[#allocation2 + $0x98] sm:$0x3] %v3421_v32  ;;  %v3614_v46 = vld [vmem:[#allocation6] ss:$0 sm:$0xff]  ;;  %v503_v53 = vld [vmem:[#allocation8 + $0xc8] sm:$0xff] }
  0x41   : > { %332 = vrot.lane.b32.xlu1 %v3571_v23, %s3420_s23  ;;  %608 = vmatpush.msrb.mxu1 %v557_v10  ;;  %v504_v48 = vld [vmem:[#allocation8 + $0xd0] sm:$0xff]  ;;  %v902_v54 = vld [vmem:[#allocation8 + $0x3f8] sm:$0xff]  ;;  %v502_v57 = vld [vmem:[#allocation8 + $0xc0] sm:$0xff] }
  0x42   : > { %733 = vmatpush.msrb.mxu0 %v482_v12  ;;  %690 = vmatpush.msra.mxu3 %v589_v18  ;;  %v901_v55 = vld [vmem:[#allocation8 + $0x3f0] sm:$0xff]  ;;  %v900_v59 = vld [vmem:[#allocation8 + $0x3e8] sm:$0xff]  ;;  %v501_v4 = vld [vmem:[#allocation8 + $0xb8] sm:$0xff] }
  0x43   : > { %609 = vmatpush.msrb.mxu1 %v556_v19  ;;  %v524_v61 = vld [vmem:[#allocation8 + $0x170] sm:$0xff]  ;;  %v886_v6 = vld [vmem:[#allocation8 + $0x378] sm:$0xff]  ;;  %v522_v10 = vld [vmem:[#allocation8 + $0x160] sm:$0xff] }
  0x44   : > { %v898_v7 = vld [vmem:[#allocation8 + $0x3d8] sm:$0xff]  ;;  %v500_v9 = vld [vmem:[#allocation8 + $0xb0] sm:$0xff]  ;;  %v884_v12 = vld [vmem:[#allocation8 + $0x368] sm:$0xff] }
  0x45   : > { %v896_v19 = vld [vmem:[#allocation8 + $0x3c8] sm:$0xff] }
  0x8c   : > { %v327_v25 = vpop.permute.xlu2 %326 }
  0x8d   : > { %v346_v28 = vmax.f32 %v306_v11, %v327_v25  ;;  %v571_v25 = vld [vmem:[#allocation8 + $0x220] sm:$0xff] }
  0x8f   : > { %3108 = vmatmul.msk.f32.vlgmr.msra.gmra.mxu1 %vm355_vm1, %v346_v28  ;;  %v588_v28 = vld [vmem:[#allocation8 + $0x2a8] sm:$0xff] }
  0x90   : > { %691 = vmatpush.msra.mxu3 %v588_v28  ;;  %v519_v28 = vld [vmem:[#allocation8 + $0x148] sm:$0xff] }
  0x92   : > { %692 = vmatpush.msra.mxu3 %v587_v31 }
  0x94   : > { %v329_v47 = vpop.permute.xlu2 %328  ;;  %693 = vmatpush.msra.mxu3 %v586_v35 }
  0x95   : > { %v347_v49 = vmax.f32 %v3564_v17, %v329_v47  ;;  %v481_v17 = vld [vmem:[#allocation8 + $0x18] sm:$0xff] }
  0x96   : > { %734 = vmatpush.msrb.mxu0 %v481_v17  ;;  %694 = vmatpush.msra.mxu3 %v585_v37  ;;  %v505_v47 = vld [vmem:[#allocation8 + $0xd8] sm:$0xff] }
  0x97   : > { %3109 = vmatmul.msk.f32.gmra.mxu1 %vm355_vm1, %v347_v49 }
  0xa2   : > { %v319_v39 = vpop.permute.xlu0 %318 }
  0xa3   : > { %v342_v41 = vmax.f32 %v3554_v2, %v319_v39  ;;  %v3577_v44 = vpop.permute.xlu1 %322  ;;  %v575_v2 = vld [vmem:[#allocation8 + $0x240] sm:$0xff]  ;;  %v584_v39 = vld [vmem:[#allocation8 + $0x288] sm:$0xff] }
  0xa4   : > { %647 = vmatpush.msra.mxu2 %v575_v2  ;;  %v344_v11 = vmax.f32 %v3556_v5, %v3577_v44  ;;  %v480_v5 = vld [vmem:[#allocation8 + $0x10] sm:$0xff]  ;;  %695 = vmatpush.msra.mxu3 %v584_v39  ;;  %v507_v44 = vld [vmem:[#allocation8 + $0xe8] sm:$0xff]  ;;  %v899_v2 = vld [vmem:[#allocation8 + $0x3e0] sm:$0xff] }
  0xa5   : > { %3104 = vmatmul.msk.f32.vlgmr.msra.gmra.mxu0 %vm355_vm1, %v342_v41  ;;  %v583_v41 = vld [vmem:[#allocation8 + $0x280] sm:$0xff]  ;;  %v517_v39 = vld [vmem:[#allocation8 + $0x138] sm:$0xff] }
  0xa6   : > { %648 = vmatpush.msra.mxu2 %v574_v8  ;;  %735 = vmatpush.msrb.mxu0 %v480_v5  ;;  %v885_v8 = vld [vmem:[#allocation8 + $0x370] sm:$0xff] }
  0xa7   : > { %696 = vmatpush.msra.mxu3 %v583_v41  ;;  %v879_v41 = vld [vmem:[#allocation8 + $0x340] sm:$0xff] }
  0xa8   : > { %736 = vmatpush.msrb.mxu0 %v479_v29  ;;  %v894_v29 = vld [vmem:[#allocation8 + $0x3b8] sm:$0xff] }
  0xa9   : > { %919 = vmatpush.msrb.mxu3 %v886_v6  ;;  %v874_v6 = vld [vmem:[#allocation8 + $0x318] sm:$0xff] }
  0xaa   : > { %v321_v58 = vpop.permute.xlu0 %320 }
  0xab   : > { %v343_v60 = vmax.f32 %v3560_v13, %v321_v58  ;;  %v325_v3 = vpop.permute.xlu1 %324  ;;  %v573_v13 = vld [vmem:[#allocation8 + $0x230] sm:$0xff]  ;;  %920 = vmatpush.msrb.mxu3 %v885_v8 }
  0xac   : > { %649 = vmatpush.msra.mxu2 %v573_v13  ;;  %v345_v21 = vmax.f32 %v3562_v16, %v325_v3  ;;  %v555_v16 = vld [vmem:[#allocation8 + $0x1a0] sm:$0xff]  ;;  %v523_v3 = vld [vmem:[#allocation8 + $0x168] sm:$0xff]  ;;  %v521_v13 = vld [vmem:[#allocation8 + $0x158] sm:$0xff] }
  0xad   : > { %3105 = vmatmul.msk.f32.gmra.mxu0 %vm355_vm1, %v343_v60  ;;  %610 = vmatpush.msrb.mxu1 %v555_v16  ;;  %v525_v60 = vld [vmem:[#allocation8 + $0x178] sm:$0xff]  ;;  %v518_v16 = vld [vmem:[#allocation8 + $0x140] sm:$0xff]  ;;  %v873_v8 = vld [vmem:[#allocation8 + $0x310] sm:$0xff] }
  0xae   : > { %650 = vmatpush.msra.mxu2 %v572_v24  ;;  %921 = vmatpush.msrb.mxu3 %v884_v12  ;;  %v895_v24 = vld [vmem:[#allocation8 + $0x3c0] sm:$0xff]  ;;  %v872_v12 = vld [vmem:[#allocation8 + $0x308] sm:$0xff] }
  0xaf   : > { %611 = vmatpush.msrb.mxu1 %v554_v34  ;;  %v893_v34 = vld [vmem:[#allocation8 + $0x3b0] sm:$0xff] }
  0xb0   : > { %651 = vmatpush.msra.mxu2 %v571_v25  ;;  %v499_v25 = vld [vmem:[#allocation8 + $0xa8] sm:$0xff] }
  0xb1   : > { %612 = vmatpush.msrb.mxu1 %v553_v36 }
  0xb2   : > { %v331_v14 = vpop.permute.xlu0 %330  ;;  %652 = vmatpush.msra.mxu2 %v570_v26  ;;  %v882_v26 = vld [vmem:[#allocation8 + $0x358] sm:$0xff] }
  0xb3   : > { %v348_v15 = vmax.f32 %v3569_v22, %v331_v14  ;;  %v333_v20 = vpop.permute.xlu1 %332  ;;  %613 = vmatpush.msrb.mxu1 %v552_v38  ;;  %v880_v38 = vld [vmem:[#allocation8 + $0x348] sm:$0xff] }
  0xb4   : > { %v349_v22 = vmax.f32 %v3571_v23, %v333_v20  ;;  %653 = vmatpush.msra.mxu2 %v569_v27  ;;  %v478_v23 = vld [vmem:[#allocation8] sm:$0xff] }
  0xb5   : > { %3106 = vmatmul.msk.f32.gmra.mxu0 %vm355_vm1, %v344_v11  ;;  %3110 = vmatmul.msk.f32.gmra.mxu1 %vm355_vm1, %v348_v15  ;;  %v897_v11 = vld [vmem:[#allocation8 + $0x3d0] sm:$0xff]  ;;  %v498_v27 = vld [vmem:[#allocation8 + $0xa0] sm:$0xff] }
  0xb6   : > { %654 = vmatpush.msra.mxu2 %v568_v30  ;;  %737 = vmatpush.msrb.mxu0 %v478_v23  ;;  %v881_v30 = vld [vmem:[#allocation8 + $0x350] sm:$0xff] }
  0xb7   : > { %614 = vmatpush.msrb.mxu1 %v551_v40  ;;  %v892_v40 = vld [vmem:[#allocation8 + $0x3a8] sm:$0xff] }
  0xb8   : > { %655 = vmatpush.msra.mxu2 %v567_v33  ;;  %960 = vmatpush.msra.mxu0 %v902_v54  ;;  %v514_v54 = vld [vmem:[#allocation8 + $0x120] sm:$0xff] }
  0xb9   : > { %763 = vmatpush.msra.mxu1 %v509_v42  ;;  %v497_v42 = vld [vmem:[#allocation8 + $0x98] sm:$0xff] }
  0xba   : > { %961 = vmatpush.msra.mxu0 %v901_v55  ;;  %804 = vmatpush.msrb.mxu2 %v525_v60  ;;  %v495_v55 = vld [vmem:[#allocation8 + $0x88] sm:$0xff]  ;;  %v494_v60 = vld [vmem:[#allocation8 + $0x80] sm:$0xff] }
  0xbb   : > { %764 = vmatpush.msra.mxu1 %v508_v43  ;;  %v516_v43 = vld [vmem:[#allocation8 + $0x130] sm:$0xff] }
  0xbc   : > { %962 = vmatpush.msra.mxu0 %v900_v59  ;;  %805 = vmatpush.msrb.mxu2 %v524_v61  ;;  %v513_v59 = vld [vmem:[#allocation8 + $0x118] sm:$0xff]  ;;  %v888_v61 = vld [vmem:[#allocation8 + $0x388] sm:$0xff] }
  0xbd   : > { %3107 = vmatmul.msk.f32.gmra.mxu0 %vm355_vm1, %v345_v21  ;;  %3111 = vmatmul.msk.f32.gmra.mxu1 %vm355_vm1, %v349_v22  ;;  %v883_v21 = vld [vmem:[#allocation8 + $0x360] sm:$0xff]  ;;  %v520_v22 = vld [vmem:[#allocation8 + $0x150] sm:$0xff] }
  0xbe   : > { %765 = vmatpush.msra.mxu1 %v507_v44  ;;  %963 = vmatpush.msra.mxu0 %v899_v2  ;;  %v496_v44 = vld [vmem:[#allocation8 + $0x90] sm:$0xff] }
  0xbf   : > { %806 = vmatpush.msrb.mxu2 %v523_v3  ;;  %922 = vmatpush.msrb.mxu3 %v883_v21  ;;  %v915_v21 = vld [vmem:[#allocation8 + $0x460] sm:$0xff] }
  0xc0   : > { %766 = vmatpush.msra.mxu1 %v506_v45  ;;  %964 = vmatpush.msra.mxu0 %v898_v7  ;;  %v891_v45 = vld [vmem:[#allocation8 + $0x3a0] sm:$0xff]  ;;  %v511_v7 = vld [vmem:[#allocation8 + $0x108] sm:$0xff] }
  0xc1   : > { %807 = vmatpush.msrb.mxu2 %v522_v10  ;;  %923 = vmatpush.msrb.mxu3 %v882_v26  ;;  %v510_v10 = vld [vmem:[#allocation8 + $0x100] sm:$0xff]  ;;  %v913_v26 = vld [vmem:[#allocation8 + $0x450] sm:$0xff] }
  0xc2   : > { %767 = vmatpush.msra.mxu1 %v505_v47  ;;  %965 = vmatpush.msra.mxu0 %v897_v11  ;;  %v515_v47 = vld [vmem:[#allocation8 + $0x128] sm:$0xff]  ;;  %v917_v11 = vld [vmem:[#allocation8 + $0x470] sm:$0xff] }
  0xc3   : > { %808 = vmatpush.msrb.mxu2 %v521_v13  ;;  %924 = vmatpush.msrb.mxu3 %v881_v30  ;;  %v912_v30 = vld [vmem:[#allocation8 + $0x448] sm:$0xff] }
  0xc4   : > { %768 = vmatpush.msra.mxu1 %v504_v48  ;;  %966 = vmatpush.msra.mxu0 %v896_v19  ;;  %v890_v48 = vld [vmem:[#allocation8 + $0x398] sm:$0xff]  ;;  %v916_v19 = vld [vmem:[#allocation8 + $0x468] sm:$0xff] }
  0xc5   : > { %738 = vmatmul.f32.vlgmr.msrb.gmra.mxu0 %v3421_v32  ;;  %809 = vmatpush.msrb.mxu2 %v520_v22 }
  0xc6   : > { %769 = vmatpush.msra.mxu1 %v503_v53  ;;  %967 = vmatpush.msra.mxu0 %v895_v24  ;;  %v877_v53 = vld [vmem:[#allocation8 + $0x330] sm:$0xff] }
  0xc7   : > { %810 = vmatpush.msrb.mxu2 %v519_v28  ;;  %925 = vmatpush.msrb.mxu3 %v880_v38  ;;  %v908_v38 = vld [vmem:[#allocation8 + $0x428] sm:$0xff] }
  0xc8   : > { %770 = vmatpush.msra.mxu1 %v502_v57  ;;  %968 = vmatpush.msra.mxu0 %v894_v29  ;;  %v876_v57 = vld [vmem:[#allocation8 + $0x328] sm:$0xff]  ;;  %v470_v29 = vld [vmem:[#allocation2 + $0x2] sm:$0xff] }
  0xc9   : > { %811 = vmatpush.msrb.mxu2 %v518_v16  ;;  %926 = vmatpush.msrb.mxu3 %v879_v41  ;;  %v911_v16 = vld [vmem:[#allocation8 + $0x440] sm:$0xff] }
  0xca   : > { %771 = vmatpush.msra.mxu1 %v501_v4  ;;  %969 = vmatpush.msra.mxu0 %v893_v34  ;;  %v887_v4 = vld [vmem:[#allocation8 + $0x380] sm:$0xff]  ;;  %v909_v34 = vld [vmem:[#allocation8 + $0x430] sm:$0xff] }
  0xcb   : > { %812 = vmatpush.msrb.mxu2 %v517_v39  ;;  %v907_v39 = vld [vmem:[#allocation8 + $0x420] sm:$0xff] }
  0xcc   : > { %772 = vmatpush.msra.mxu1 %v500_v9  ;;  %970 = vmatpush.msra.mxu0 %v892_v40  ;;  %v918_v9 = vld [vmem:[#allocation8 + $0x478] sm:$0xff]  ;;  %v903_v40 = vld [vmem:[#allocation8 + $0x400] sm:$0xff] }
  0xcd   : > { %813 = vmatpush.msrb.mxu2 %v516_v43 }
  0xce   : > { %773 = vmatpush.msra.mxu1 %v499_v25  ;;  %971 = vmatpush.msra.mxu0 %v891_v45  ;;  %v914_v25 = vld [vmem:[#allocation8 + $0x458] sm:$0xff]  ;;  %v861_v45 = vld [vmem:[#allocation2 + $0x91] sm:$0xff] }
  0xcf   : > { %814 = vmatpush.msrb.mxu2 %v515_v47 }
  0xd0   : > { %774 = vmatpush.msra.mxu1 %v498_v27  ;;  %972 = vmatpush.msra.mxu0 %v890_v48 }
  0xd1   : > { %815 = vmatpush.msrb.mxu2 %v514_v54 }
  0xd2   : > { %775 = vmatpush.msra.mxu1 %v497_v42 }
  0xd3   : > { %816 = vmatpush.msrb.mxu2 %v513_v59 }
  0xd4   : > { %776 = vmatpush.msra.mxu1 %v496_v44 }
  0xd6   : > { %777 = vmatpush.msra.mxu1 %v495_v55 }
  0xd8   : > { %778 = vmatpush.msra.mxu1 %v494_v60 }
 0x10c   : > { %v413_v49 = vpop.f32.mrf.mxu1 }
 0x10d   : > { %v3617_v50 = vadd.f32 %v3614_v46, %v413_v49 }
 0x10f   : > { %450 = vst [vmem:[#allocation2 + $0x51] sm:$0xff] %v3617_v50 }
 0x114   : > { %v416_v56 = vpop.f32.mrf.mxu1 }
 0x115   : > { %v3626_v58 = vadd.f32 %v3614_v46, %v416_v56  ;;  %v889_v56 = vld [vmem:[#allocation8 + $0x390] sm:$0xff] }
 0x116   : > { %973 = vmatpush.msra.mxu0 %v889_v56  ;;  %v3677_v2 = vld [vmem:[#allocation2 + $0x50] sm:$0xff]  ;;  %v1191_v56 = vld [vmem:[#allocation8 + $0x678] sm:$0xff] }
 0x117   : > { %451 = vst [vmem:[#allocation2 + $0x61] sm:$0xff] %v3626_v58  ;;  %v3679_v3 = vld [vmem:[#allocation2 + $0x52] sm:$0xff] }
 0x118   : > { %974 = vmatpush.msra.mxu0 %v888_v61 }
 0x11a   : > { %975 = vmatpush.msra.mxu0 %v887_v4 }
 0x11e   : > { %v3685_v13 = vld [vmem:[#allocation2 + $0x60] sm:$0xff] }
 0x122   : > { %v401_v51 = vpop.f32.mrf.mxu0 }
 0x123   : > { %v3621_v52 = vadd.f32 %v3614_v46, %v401_v51 }
 0x125   : > { %446 = vst [vmem:[#allocation2 + $0x11] sm:$0xff] %v3621_v52  ;;  %656 = vmatmul.f32.vlgmr.msra.gmra.mxu2 %v3621_v52 }
 0x12a   : > { %v404_v62 = vpop.f32.mrf.mxu0 }
 0x12b   : > { %v3630_v63 = vadd.f32 %v3614_v46, %v404_v62  ;;  %v875_v62 = vld [vmem:[#allocation8 + $0x320] sm:$0xff] }
 0x12c   : > { %v526_v0 = vld [vmem:[#allocation2 + $0x10] sm:$0xff] }
 0x12d   : > { %v3632_v1 = vld [vmem:[#allocation2 + $0x12] sm:$0xff]  ;;  %447 = vst [vmem:[#allocation2 + $0x21] sm:$0xff] %v3630_v63  ;;  %615 = vmatmul.f32.vlgmr.msrb.gmra.mxu1 %v526_v0  ;;  %741 = vmatmul.f32.gmra.mxu0 %v526_v0 }
 0x12e   : > { %697 = vmatmul.f32.vlgmr.msra.gmra.mxu3 %v3632_v1  ;;  %659 = vmatmul.f32.gmra.mxu2 %v3630_v63  ;;  %v512_v0 = vld [vmem:[#allocation8 + $0x110] sm:$0xff] }
 0x12f   : > { %817 = vmatpush.msrb.mxu2 %v512_v0  ;;  %1001 = vmatpush.msrb.mxu1 %v918_v9  ;;  %v1189_v0 = vld [vmem:[#allocation8 + $0x668] sm:$0xff]  ;;  %v1186_v9 = vld [vmem:[#allocation8 + $0x650] sm:$0xff] }
 0x131   : > { %818 = vmatpush.msrb.mxu2 %v511_v7  ;;  %1002 = vmatpush.msrb.mxu1 %v917_v11 }
 0x132   : > { %v407_v14 = vpop.f32.mrf.mxu0  ;;  %v419_v15 = vpop.f32.mrf.mxu1 }
 0x133   : > { %v3638_v17 = vadd.f32 %v3614_v46, %v407_v14  ;;  %v3641_v18 = vadd.f32 %v3614_v46, %v419_v15  ;;  %v3687_v14 = vld [vmem:[#allocation2 + $0x62] sm:$0xff]  ;;  %819 = vmatpush.msrb.mxu2 %v510_v10  ;;  %1003 = vmatpush.msrb.mxu1 %v916_v19 }
 0x134   : > { %v3643_v5 = vld [vmem:[#allocation2 + $0x20] sm:$0xff] }
 0x135   : > { %4617 = vst [vmem:[#allocation16_spill] sm:$0xff] %v3641_v18  ;;  %v3645_v20 = vld [vmem:[#allocation2 + $0x22] sm:$0xff]  ;;  %618 = vmatmul.f32.gmra.mxu1 %v3643_v5  ;;  %744 = vmatmul.f32.gmra.mxu0 %v3643_v5 }
 0x136   : > { %448 = vst [vmem:[#allocation2 + $0x31] sm:$0xff] %v3638_v17  ;;  %700 = vmatmul.f32.gmra.mxu3 %v3645_v20  ;;  %662 = vmatmul.f32.gmra.mxu2 %v3638_v17  ;;  %v871_v15 = vld [vmem:[#allocation8 + $0x300] sm:$0xff] }
 0x137   : > { %452 = vst [vmem:[#allocation2 + $0x71] sm:$0xff] %v3641_v18  ;;  %1004 = vmatpush.msrb.mxu1 %v915_v21  ;;  %1224 = vmatpush.msra.mxu2 %v1191_v56  ;;  %v1184_v21 = vld [vmem:[#allocation8 + $0x640] sm:$0xff]  ;;  %v1112_v56 = vld [vmem:[#allocation8 + $0x4c8] sm:$0xff] }
 0x139   : > { %1005 = vmatpush.msrb.mxu1 %v914_v25  ;;  %v1116_v25 = vld [vmem:[#allocation8 + $0x4e8] sm:$0xff] }
 0x13a   : > { %v410_v31 = vpop.f32.mrf.mxu0  ;;  %v422_v23 = vpop.f32.mrf.mxu1 }
 0x13b   : > { %v3654_v33 = vadd.f32 %v3614_v46, %v410_v31  ;;  %v3657_v35 = vadd.f32 %v3614_v46, %v422_v23  ;;  %v878_v46 = vld [vmem:[#allocation8 + $0x338] sm:$0xff]  ;;  %1006 = vmatpush.msrb.mxu1 %v913_v26  ;;  %v1205_v26 = vld [vmem:[#allocation8 + $0x6e8] sm:$0xff] }
 0x13c   : > { %927 = vmatpush.msrb.mxu3 %v878_v46  ;;  %v462_v31 = vld [vmem:[#allocation2 + $0x1] sm:$0xff] }
 0x13d   : > { %4618 = vst [vmem:[#allocation17_spill] sm:$0xff] %v3657_v35  ;;  %v3659_v36 = vld [vmem:[#allocation2 + $0x30] sm:$0xff]  ;;  %1007 = vmatpush.msrb.mxu1 %v912_v30  ;;  %v910_v23 = vld [vmem:[#allocation8 + $0x438] sm:$0xff]  ;;  %v1115_v30 = vld [vmem:[#allocation8 + $0x4e0] sm:$0xff] }
 0x13e   : > { %v3661_v37 = vld [vmem:[#allocation2 + $0x32] sm:$0xff]  ;;  %449 = vst [vmem:[#allocation2 + $0x41] sm:$0xff] %v3654_v33  ;;  %621 = vmatmul.f32.gmra.mxu1 %v3659_v36  ;;  %747 = vmatmul.f32.gmra.mxu0 %v3659_v36 }
 0x13f   : > { %703 = vmatmul.f32.gmra.mxu3 %v3661_v37  ;;  %665 = vmatmul.f32.gmra.mxu2 %v3654_v33  ;;  %453 = vst [vmem:[#allocation2 + $0x81] sm:$0xff] %v3657_v35  ;;  %v532_v22 = vld [vmem:[#allocation2 + $0x70] sm:$0xff] }
 0x140   : > { %928 = vmatpush.msrb.mxu3 %v877_v53  ;;  %v3693_v24 = vld [vmem:[#allocation2 + $0x72] sm:$0xff]  ;;  %1008 = vmatpush.msrb.mxu1 %v911_v16  ;;  %v1204_v16 = vld [vmem:[#allocation8 + $0x6e0] sm:$0xff] }
 0x142   : > { %929 = vmatpush.msrb.mxu3 %v876_v57  ;;  %1009 = vmatpush.msrb.mxu1 %v910_v23  ;;  %v3739_v46 = vpop.f32.mrf.mxu0  ;;  %v1190_v57 = vld [vmem:[#allocation8 + $0x670] sm:$0xff]  ;;  %v1223_v23 = vld [vmem:[#allocation8 + $0x778] sm:$0xff] }
 0x143   : > { %1225 = vmatpush.msra.mxu2 %v1190_v57  ;;  %1306 = vmatpush.msrb.mxu0 %v1223_v23  ;;  %v1201_v57 = vld [vmem:[#allocation8 + $0x6c8] sm:$0xff] }
 0x144   : > { %930 = vmatpush.msrb.mxu3 %v875_v62  ;;  %1010 = vmatpush.msrb.mxu1 %v909_v34  ;;  %v869_v62 = vld [vmem:[#allocation2 + $0x92] sm:$0xff]  ;;  %v1114_v34 = vld [vmem:[#allocation8 + $0x4d8] sm:$0xff] }
 0x145   : > { %v3669_v49 = vld [vmem:[#allocation2 + $0x40] sm:$0xff]  ;;  %1226 = vmatpush.msra.mxu2 %v1189_v0 }
 0x146   : > { %v3671_v51 = vld [vmem:[#allocation2 + $0x42] sm:$0xff]  ;;  %624 = vmatmul.f32.gmra.mxu1 %v3669_v49  ;;  %750 = vmatmul.f32.gmra.mxu0 %v3669_v49 }
 0x147   : > { %706 = vmatmul.f32.gmra.mxu3 %v3671_v51  ;;  %668 = vmatmul.f32.gmra.mxu2 %v3617_v50  ;;  %v533_v27 = vld [vmem:[#allocation2 + $0x80] sm:$0xff] }
 0x148   : > { %931 = vmatpush.msrb.mxu3 %v874_v6  ;;  %v3697_v28 = vld [vmem:[#allocation2 + $0x82] sm:$0xff]  ;;  %1011 = vmatpush.msrb.mxu1 %v908_v38  ;;  %v1222_v38 = vld [vmem:[#allocation8 + $0x770] sm:$0xff] }
 0x149   : > { %1307 = vmatpush.msrb.mxu0 %v1222_v38  ;;  %v1220_v0 = vld [vmem:[#allocation8 + $0x760] sm:$0xff] }
 0x14a   : > { %932 = vmatpush.msrb.mxu3 %v873_v8  ;;  %1012 = vmatpush.msrb.mxu1 %v907_v39  ;;  %v1187_v8 = vld [vmem:[#allocation8 + $0x658] sm:$0xff]  ;;  %v1113_v39 = vld [vmem:[#allocation8 + $0x4d0] sm:$0xff] }
 0x14c   : > { %933 = vmatpush.msrb.mxu3 %v872_v12 }
 0x14e   : > { %627 = vmatmul.f32.gmra.mxu1 %v3677_v2  ;;  %753 = vmatmul.f32.gmra.mxu0 %v3677_v2 }
 0x14f   : > { %709 = vmatmul.f32.gmra.mxu3 %v3679_v3  ;;  %671 = vmatmul.f32.gmra.mxu2 %v3626_v58 }
 0x150   : > { %934 = vmatpush.msrb.mxu3 %v871_v15  ;;  %v1117_v15 = vld [vmem:[#allocation8 + $0x4f0] sm:$0xff] }
 0x156   : > { %630 = vmatmul.f32.gmra.mxu1 %v3685_v13  ;;  %756 = vmatmul.f32.gmra.mxu0 %v3685_v13 }
 0x157   : > { %712 = vmatmul.f32.gmra.mxu3 %v3687_v14  ;;  %674 = vmatmul.f32.gmra.mxu2 %v3641_v18 }
 0x15e   : > { %633 = vmatmul.f32.gmra.mxu1 %v532_v22  ;;  %759 = vmatmul.f32.gmra.mxu0 %v532_v22 }
 0x15f   : > { %715 = vmatmul.f32.gmra.mxu3 %v3693_v24  ;;  %677 = vmatmul.f32.gmra.mxu2 %v3657_v35 }
 0x166   : > { %636 = vmatmul.f32.gmra.mxu1 %v533_v27  ;;  %976 = vmatmul.f32.vlgmr.msra.gmra.mxu0 %v3630_v63 }
 0x167   : > { %718 = vmatmul.f32.gmra.mxu3 %v3697_v28  ;;  %820 = vmatmul.f32.vlgmr.msrb.gmra.mxu2 %v470_v29 }
 0x16e   : > { %779 = vmatmul.f32.vlgmr.msra.gmra.mxu1 %v462_v31  ;;  %979 = vmatmul.f32.gmra.mxu0 %v3638_v17  ;;  %v1183_v31 = vld [vmem:[#allocation8 + $0x638] sm:$0xff] }
 0x16f   : > { %935 = vmatmul.f32.vlgmr.msrb.gmra.mxu3 %v3643_v5  ;;  %823 = vmatmul.f32.gmra.mxu2 %v3632_v1  ;;  %v906_v1 = vld [vmem:[#allocation8 + $0x418] sm:$0xff]  ;;  %v905_v5 = vld [vmem:[#allocation8 + $0x410] sm:$0xff] }
 0x170   : > { %1013 = vmatpush.msrb.mxu1 %v906_v1  ;;  %v1182_v1 = vld [vmem:[#allocation8 + $0x630] sm:$0xff] }
 0x172   : > { %1014 = vmatpush.msrb.mxu1 %v905_v5  ;;  %v1203_v5 = vld [vmem:[#allocation8 + $0x6d8] sm:$0xff] }
 0x176   : > { %782 = vmatmul.f32.gmra.mxu1 %v3621_v52  ;;  %982 = vmatmul.f32.gmra.mxu0 %v3654_v33 }
 0x177   : > { %938 = vmatmul.f32.gmra.mxu3 %v3659_v36  ;;  %826 = vmatmul.f32.gmra.mxu2 %v3645_v20  ;;  %v904_v36 = vld [vmem:[#allocation8 + $0x408] sm:$0xff] }
 0x178   : > { %1015 = vmatpush.msrb.mxu1 %v904_v36 }
 0x17a   : > { %1016 = vmatpush.msrb.mxu1 %v903_v40  ;;  %v1202_v40 = vld [vmem:[#allocation8 + $0x6d0] sm:$0xff] }
 0x17e   : > { %785 = vmatmul.f32.gmra.mxu1 %v3630_v63  ;;  %985 = vmatmul.f32.gmra.mxu0 %v3617_v50 }
 0x17f   : > { %941 = vmatmul.f32.gmra.mxu3 %v3669_v49  ;;  %829 = vmatmul.f32.gmra.mxu2 %v3661_v37 }
 0x186   : > { %788 = vmatmul.f32.gmra.mxu1 %v3638_v17  ;;  %988 = vmatmul.f32.gmra.mxu0 %v3626_v58 }
 0x187   : > { %944 = vmatmul.f32.gmra.mxu3 %v3677_v2  ;;  %832 = vmatmul.f32.gmra.mxu2 %v3671_v51  ;;  %v1188_v2 = vld [vmem:[#allocation8 + $0x660] sm:$0xff] }
 0x188   : > { %1227 = vmatpush.msra.mxu2 %v1188_v2  ;;  %v1111_v2 = vld [vmem:[#allocation8 + $0x4c0] sm:$0xff] }
 0x18a   : > { %1228 = vmatpush.msra.mxu2 %v1187_v8  ;;  %v1200_v8 = vld [vmem:[#allocation8 + $0x6c0] sm:$0xff] }
 0x18c   : > { %1229 = vmatpush.msra.mxu2 %v1186_v9 }
 0x18e   : > { %791 = vmatmul.f32.gmra.mxu1 %v3654_v33  ;;  %991 = vmatmul.f32.gmra.mxu0 %v3641_v18 }
 0x18f   : > { %947 = vmatmul.f32.gmra.mxu3 %v3685_v13  ;;  %835 = vmatmul.f32.gmra.mxu2 %v3679_v3  ;;  %v1185_v13 = vld [vmem:[#allocation8 + $0x648] sm:$0xff] }
 0x190   : > { %1230 = vmatpush.msra.mxu2 %v1185_v13  ;;  %v1181_v13 = vld [vmem:[#allocation8 + $0x628] sm:$0xff] }
 0x192   : > { %1231 = vmatpush.msra.mxu2 %v1184_v21 }
 0x194   : > { %1232 = vmatpush.msra.mxu2 %v1183_v31  ;;  %v1198_v31 = vld [vmem:[#allocation8 + $0x6b0] sm:$0xff] }
 0x196   : > { %794 = vmatmul.f32.gmra.mxu1 %v3617_v50  ;;  %994 = vmatmul.f32.gmra.mxu0 %v3657_v35  ;;  %v1132_v35 = vld [vmem:[#allocation8 + $0x568] sm:$0xff] }
 0x197   : > { %950 = vmatmul.f32.gmra.mxu3 %v532_v22  ;;  %838 = vmatmul.f32.gmra.mxu2 %v3687_v14  ;;  %v1207_v22 = vld [vmem:[#allocation8 + $0x6f8] sm:$0xff] }
 0x198   : > { %1265 = vmatpush.msra.mxu3 %v1207_v22  ;;  %1233 = vmatpush.msra.mxu2 %v1182_v1  ;;  %v1218_v22 = vld [vmem:[#allocation8 + $0x750] sm:$0xff]  ;;  %v1107_v1 = vld [vmem:[#allocation8 + $0x4a0] sm:$0xff] }
 0x19a   : > { %1234 = vmatpush.msra.mxu2 %v1181_v13  ;;  %v1194_v13 = vld [vmem:[#allocation8 + $0x690] sm:$0xff] }
 0x19e   : > { %797 = vmatmul.f32.gmra.mxu1 %v3626_v58  ;;  %997 = vmatmul.f32.gmra.mxu0 %v861_v45  ;;  %v1221_v45 = vld [vmem:[#allocation8 + $0x768] sm:$0xff] }
 0x19f   : > { %953 = vmatmul.f32.gmra.mxu3 %v533_v27  ;;  %841 = vmatmul.f32.gmra.mxu2 %v3693_v24 }
 0x1a0   : > { %1308 = vmatpush.msrb.mxu0 %v1221_v45  ;;  %v1106_v45 = vld [vmem:[#allocation8 + $0x498] sm:$0xff] }
 0x1a2   : > { %1309 = vmatpush.msrb.mxu0 %v1220_v0 }
 0x1a6   : > { %800 = vmatmul.f32.gmra.mxu1 %v3641_v18 }
 0x1a7   : > { %956 = vmatmul.f32.gmra.mxu3 %v3421_v32 }
 0x1aa   : > { %v3727_v41 = vpop.f32.mrf.mxu1 }
 0x1ae   : > { %1017 = vmatmul.f32.vlgmr.msrb.gmra.mxu1 %v3645_v20  ;;  %v3745_v20 = vpop.f32.mrf.mxu2 }
 0x1b1   : > { %v3741_v47 = vpop.f32.mrf.mxu3 }
 0x1b2   : > { %v3730_v42 = vpop.f32.mrf.mxu1 }
 0x1b6   : > { %1020 = vmatmul.f32.gmra.mxu1 %v3661_v37  ;;  %v3748_v37 = vpop.f32.mrf.mxu0  ;;  %v3755_v53 = vpop.f32.mrf.mxu2 }
 0x1b9   : > { %v3750_v49 = vpop.f32.mrf.mxu3 }
 0x1bb   : > { %v3733_v43 = vpop.f32.mrf.mxu1 }
 0x1be   : > { %1023 = vmatmul.f32.gmra.mxu1 %v3671_v51  ;;  %v3759_v55 = vpop.f32.mrf.mxu0  ;;  %v3764_v60 = vpop.f32.mrf.mxu2 }
 0x1c2   : > { %v3761_v59 = vpop.f32.mrf.mxu3 }
 0x1c3   : > { %v3736_v44 = vpop.f32.mrf.mxu1 }
 0x1c6   : > { %1026 = vmatmul.f32.gmra.mxu1 %v3679_v3  ;;  %v3768_v3 = vpop.f32.mrf.mxu0  ;;  %v3772_v6 = vpop.f32.mrf.mxu2 }
 0x1ca   : > { %v3770_v4 = vpop.f32.mrf.mxu3 }
 0x1cb   : > { %v3743_v48 = vpop.f32.mrf.mxu1 }
 0x1ce   : > { %1029 = vmatmul.f32.gmra.mxu1 %v3687_v14  ;;  %v3776_v10 = vpop.f32.mrf.mxu0  ;;  %v1118_v14 = vld [vmem:[#allocation8 + $0x4f8] sm:$0xff]  ;;  %v3782_v19 = vpop.f32.mrf.mxu2 }
 0x1cf   : > { %1347 = vmatpush.msra.mxu1 %v1118_v14  ;;  %v1219_v14 = vld [vmem:[#allocation8 + $0x758] sm:$0xff] }
 0x1d0   : > { %1310 = vmatpush.msrb.mxu0 %v1219_v14  ;;  %v1213_v14 = vld [vmem:[#allocation8 + $0x728] sm:$0xff] }
 0x1d1   : > { %1348 = vmatpush.msra.mxu1 %v1117_v15  ;;  %v1110_v15 = vld [vmem:[#allocation8 + $0x4b8] sm:$0xff] }
 0x1d2   : > { %v3778_v11 = vpop.f32.mrf.mxu3  ;;  %1311 = vmatpush.msrb.mxu0 %v1218_v22 }
 0x1d3   : > { %v3752_v51 = vpop.f32.mrf.mxu1  ;;  %1349 = vmatpush.msra.mxu1 %v1116_v25  ;;  %v1180_v25 = vld [vmem:[#allocation8 + $0x620] sm:$0xff] }
 0x1d4   : > { %1235 = vmatpush.msra.mxu2 %v1180_v25  ;;  %v1212_v25 = vld [vmem:[#allocation8 + $0x720] sm:$0xff] }
 0x1d5   : > { %1350 = vmatpush.msra.mxu1 %v1115_v30  ;;  %v1217_v30 = vld [vmem:[#allocation8 + $0x748] sm:$0xff] }
 0x1d6   : > { %1032 = vmatmul.f32.gmra.mxu1 %v3693_v24  ;;  %v1206_v24 = vld [vmem:[#allocation8 + $0x6f0] sm:$0xff]  ;;  %v3784_v27 = vpop.f32.mrf.mxu0  ;;  %v3790_v36 = vpop.f32.mrf.mxu2  ;;  %1312 = vmatpush.msrb.mxu0 %v1217_v30  ;;  %v1193_v30 = vld [vmem:[#allocation8 + $0x688] sm:$0xff] }
 0x1d7   : > { %1266 = vmatpush.msra.mxu3 %v1206_v24  ;;  %1351 = vmatpush.msra.mxu1 %v1114_v34  ;;  %v1109_v24 = vld [vmem:[#allocation8 + $0x4b0] sm:$0xff]  ;;  %v1197_v34 = vld [vmem:[#allocation8 + $0x6a8] sm:$0xff] }
 0x1d9   : > { %1267 = vmatpush.msra.mxu3 %v1205_v26  ;;  %1352 = vmatpush.msra.mxu1 %v1113_v39  ;;  %v1199_v26 = vld [vmem:[#allocation8 + $0x6b8] sm:$0xff]  ;;  %v1216_v39 = vld [vmem:[#allocation8 + $0x740] sm:$0xff] }
 0x1da   : > { %1313 = vmatpush.msrb.mxu0 %v1216_v39  ;;  %v1192_v39 = vld [vmem:[#allocation8 + $0x680] sm:$0xff] }
 0x1db   : > { %v3757_v54 = vpop.f32.mrf.mxu1  ;;  %1268 = vmatpush.msra.mxu3 %v1204_v16  ;;  %1353 = vmatpush.msra.mxu1 %v1112_v56  ;;  %v1108_v16 = vld [vmem:[#allocation8 + $0x4a8] sm:$0xff] }
 0x1dd   : > { %1269 = vmatpush.msra.mxu3 %v1203_v5  ;;  %1354 = vmatpush.msra.mxu1 %v1111_v2  ;;  %v1196_v5 = vld [vmem:[#allocation8 + $0x6a0] sm:$0xff]  ;;  %v1214_v2 = vld [vmem:[#allocation8 + $0x730] sm:$0xff] }
 0x1de   : > { %1035 = vmatmul.f32.gmra.mxu1 %v3697_v28  ;;  %v3786_v28 = vpop.f32.mrf.mxu3  ;;  %v3794_v9 = vpop.f32.mrf.mxu0 }
 0x1df   : > { %1270 = vmatpush.msra.mxu3 %v1202_v40  ;;  %1355 = vmatpush.msra.mxu1 %v1110_v15  ;;  %v3798_v23 = vpop.f32.mrf.mxu2  ;;  %v1215_v40 = vld [vmem:[#allocation8 + $0x738] sm:$0xff]  ;;  %v1104_v15 = vld [vmem:[#allocation8 + $0x488] sm:$0xff] }
 0x1e0   : > { %1314 = vmatpush.msrb.mxu0 %v1215_v40 }
 0x1e1   : > { %1271 = vmatpush.msra.mxu3 %v1201_v57  ;;  %1356 = vmatpush.msra.mxu1 %v1109_v24  ;;  %v1195_v57 = vld [vmem:[#allocation8 + $0x698] sm:$0xff] }
 0x1e2   : > { %1315 = vmatpush.msrb.mxu0 %v1214_v2 }
 0x1e3   : > { %v3766_v61 = vpop.f32.mrf.mxu1  ;;  %1272 = vmatpush.msra.mxu3 %v1200_v8  ;;  %1357 = vmatpush.msra.mxu1 %v1108_v16  ;;  %v1105_v8 = vld [vmem:[#allocation8 + $0x490] sm:$0xff]  ;;  %v1179_v16 = vld [vmem:[#allocation8 + $0x618] sm:$0xff] }
 0x1e4   : > { %1316 = vmatpush.msrb.mxu0 %v1213_v14  ;;  %1236 = vmatpush.msra.mxu2 %v1179_v16  ;;  %v658_v14 = vadd.f32 %v3745_v20, %v3727_v41  ;;  %v1134_v16 = vld [vmem:[#allocation8 + $0x578] sm:$0xff] }
 0x1e5   : > { %1273 = vmatpush.msra.mxu3 %v1199_v26  ;;  %1358 = vmatpush.msra.mxu1 %v1107_v1  ;;  %v1103_v26 = vld [vmem:[#allocation8 + $0x480] sm:$0xff]  ;;  %v1210_v1 = vld [vmem:[#allocation8 + $0x710] sm:$0xff] }
 0x1e6   : > { %1038 = vmatmul.f32.gmra.mxu1 %v869_v62  ;;  %v3796_v21 = vpop.f32.mrf.mxu3  ;;  %v3802_v56 = vpop.f32.mrf.mxu0  ;;  %1317 = vmatpush.msrb.mxu0 %v1212_v25 }
 0x1e7   : > { %1274 = vmatpush.msra.mxu3 %v1198_v31  ;;  %1359 = vmatpush.msra.mxu1 %v1106_v45  ;;  %v3806_v22 = vpop.f32.mrf.mxu2  ;;  %v1178_v31 = vld [vmem:[#allocation8 + $0x610] sm:$0xff]  ;;  %v1177_v45 = vld [vmem:[#allocation8 + $0x608] sm:$0xff] }
 0x1e8   : > { %1237 = vmatpush.msra.mxu2 %v1178_v31  ;;  %v1133_v31 = vld [vmem:[#allocation8 + $0x570] sm:$0xff] }
 0x1e9   : > { %1275 = vmatpush.msra.mxu3 %v1197_v34  ;;  %1360 = vmatpush.msra.mxu1 %v1105_v8  ;;  %v1211_v34 = vld [vmem:[#allocation8 + $0x718] sm:$0xff]  ;;  %v1176_v8 = vld [vmem:[#allocation8 + $0x600] sm:$0xff] }
 0x1ea   : > { %1318 = vmatpush.msrb.mxu0 %v1211_v34  ;;  %1238 = vmatpush.msra.mxu2 %v1177_v45 }
 0x1eb   : > { %v3774_v7 = vpop.f32.mrf.mxu1  ;;  %1276 = vmatpush.msra.mxu3 %v1196_v5  ;;  %1361 = vmatpush.msra.mxu1 %v1104_v15  ;;  %v699_v15 = vadd.f32 %v3741_v47, %v658_v14  ;;  %v3823_v14 = vld [vmem:[#allocation9] ss:$0 sm:$0xff] }
 0x1ec   : > { %1319 = vmatpush.msrb.mxu0 %v1210_v1  ;;  %1239 = vmatpush.msra.mxu2 %v1176_v8  ;;  %v661_v1 = vadd.f32 %v3755_v53, %v3730_v42  ;;  %v664_v42 = vadd.f32 %v3764_v60, %v3733_v43  ;;  %v1526_v43 = vld [vmem:[#allocation8 + $0x878] sm:$0xff] }
 0x1ed   : > { %1277 = vmatpush.msra.mxu3 %v1195_v57  ;;  %1362 = vmatpush.msra.mxu1 %v1103_v26  ;;  %v1209_v57 = vld [vmem:[#allocation8 + $0x708] sm:$0xff]  ;;  %v740_v34 = vadd.f32 %v3739_v46, %v699_v15  ;;  %v1150_v60 = vld [vmem:[#allocation8 + $0x5f8] sm:$0xff] }
 0x1ee   : > { %v3804_v0 = vpop.f32.mrf.mxu3  ;;  %1363 = vmatmul.f32.vlgmr.msra.gmra.mxu1 %v3421_v32  ;;  %v977_v5 = vpop.f32.mrf.mxu0  ;;  %1320 = vmatpush.msrb.mxu0 %v1209_v57  ;;  %v702_v41 = vadd.f32 %v3750_v49, %v661_v1  ;;  %v1129_v1 = vld [vmem:[#allocation8 + $0x550] sm:$0xff] }
 0x1ef   : > { %1278 = vmatpush.msra.mxu3 %v1194_v13  ;;  %v1208_v13 = vld [vmem:[#allocation8 + $0x700] sm:$0xff]  ;;  %v821_v32 = vpop.f32.mrf.mxu2  ;;  %1388 = vmatpush.msrb.mxu2 %v1134_v16  ;;  %v781_v45 = vadd.f32 %v3774_v7, %v740_v34 }
 0x1f0   : > { %1321 = vmatpush.msrb.mxu0 %v1208_v13  ;;  %v1131_v16 = vld [vmem:[#allocation8 + $0x560] sm:$0xff]  ;;  %v743_v46 = vadd.f32 %v3748_v37, %v702_v41  ;;  %v1130_v37 = vld [vmem:[#allocation8 + $0x558] sm:$0xff]  ;;  %1584 = vmatpush.msrb.mxu1 %v1526_v43 }
 0x1f1   : > { %1279 = vmatpush.msra.mxu3 %v1193_v30  ;;  %1389 = vmatpush.msrb.mxu2 %v1133_v31  ;;  %v822_v57 = vadd.f32 %v821_v32, %v781_v45 }
 0x1f3   : > { %v3780_v12 = vpop.f32.mrf.mxu1  ;;  %1280 = vmatpush.msra.mxu3 %v1192_v39  ;;  %1390 = vmatpush.msrb.mxu2 %v1132_v35 }
 0x1f4   : > { %v784_v49 = vadd.f32 %v3780_v12, %v743_v46 }
 0x1f5   : > { %1391 = vmatpush.msrb.mxu2 %v1131_v16  ;;  %1429 = vmatpush.msrb.mxu3 %v1150_v60 }
 0x1f6   : > { %v936_v40 = vpop.f32.mrf.mxu3  ;;  %v980_v25 = vpop.f32.mrf.mxu0 }
 0x1f7   : > { %v824_v39 = vpop.f32.mrf.mxu2  ;;  %v978_v20 = vadd.f32 %v977_v5, %v936_v40  ;;  %v705_v5 = vadd.f32 %v3761_v59, %v664_v42  ;;  %1392 = vmatpush.msrb.mxu2 %v1130_v37  ;;  %v1521_v37 = vld [vmem:[#allocation8 + $0x850] sm:$0xff] }
 0x1f8   : > { %v825_v34 = vadd.f32 %v824_v39, %v784_v49  ;;  %v667_v39 = vadd.f32 %v3772_v6, %v3736_v44  ;;  %v1523_v44 = vld [vmem:[#allocation8 + $0x860] sm:$0xff] }
 0x1f9   : > { %v746_v12 = vadd.f32 %v3759_v55, %v705_v5  ;;  %1393 = vmatpush.msrb.mxu2 %v1129_v1  ;;  %v1128_v5 = vld [vmem:[#allocation8 + $0x548] sm:$0xff]  ;;  %v670_v1 = vadd.f32 %v3782_v19, %v3743_v48 }
 0x1fa   : > { %v708_v55 = vadd.f32 %v3770_v4, %v667_v39  ;;  %v1147_v4 = vld [vmem:[#allocation8 + $0x5e0] sm:$0xff] }
 0x1fb   : > { %v3788_v29 = vpop.f32.mrf.mxu1  ;;  %1394 = vmatpush.msrb.mxu2 %v1128_v5  ;;  %v673_v5 = vadd.f32 %v3790_v36, %v3752_v51 }
 0x1fe   : > { %v939_v26 = vpop.f32.mrf.mxu3  ;;  %v983_v8 = vpop.f32.mrf.mxu0 }
 0x1ff   : > { %v827_v7 = vpop.f32.mrf.mxu2  ;;  %v981_v40 = vadd.f32 %v980_v25, %v939_v26  ;;  %v1525_v25 = vld [vmem:[#allocation8 + $0x870] sm:$0xff] }
 0x200   : > { %v1149_v26 = vld [vmem:[#allocation8 + $0x5f0] sm:$0xff]  ;;  %1585 = vmatpush.msrb.mxu1 %v1525_v25  ;;  %v1508_v25 = vld [vmem:[#allocation8 + $0x7e8] sm:$0xff] }
 0x201   : > { %1430 = vmatpush.msrb.mxu3 %v1149_v26  ;;  %v711_v26 = vadd.f32 %v3778_v11, %v670_v1  ;;  %v1126_v11 = vld [vmem:[#allocation8 + $0x538] sm:$0xff] }
 0x203   : > { %v3792_v62 = vpop.f32.mrf.mxu1 }
 0x206   : > { %v942_v18 = vpop.f32.mrf.mxu3  ;;  %v986_v45 = vpop.f32.mrf.mxu0 }
 0x207   : > { %v984_v16 = vadd.f32 %v983_v8, %v942_v18  ;;  %v1127_v18 = vld [vmem:[#allocation8 + $0x540] sm:$0xff]  ;;  %v1510_v8 = vld [vmem:[#allocation8 + $0x7f8] sm:$0xff] }
 0x208   : > { %1543 = vmatpush.msra.mxu0 %v1510_v8  ;;  %1395 = vmatpush.msrb.mxu2 %v1127_v18  ;;  %v1505_v8 = vld [vmem:[#allocation8 + $0x7d0] sm:$0xff] }
 0x20a   : > { %1396 = vmatpush.msrb.mxu2 %v1126_v11  ;;  %v676_v11 = vadd.f32 %v3798_v23, %v3757_v54 }
 0x20b   : > { %v3800_v38 = vpop.f32.mrf.mxu1 }
 0x20e   : > { %v945_v59 = vpop.f32.mrf.mxu3  ;;  %v989_v60 = vpop.f32.mrf.mxu0 }
 0x20f   : > { %v987_v39 = vadd.f32 %v986_v45, %v945_v59  ;;  %v1507_v45 = vld [vmem:[#allocation8 + $0x7e0] sm:$0xff]  ;;  %v1144_v59 = vld [vmem:[#allocation8 + $0x5c8] sm:$0xff] }
 0x213   : > { %v3808_v24 = vpop.f32.mrf.mxu1 }
 0x21b   : > { %v3811_v2 = vpop.f32.mrf.mxu1 }
 0x223   : > { %v3816_v30 = vpop.f32.mrf.mxu1 }
 0x22b   : > { %v1018_v47 = vpop.f32.mrf.mxu1 }
 0x22c   : > { %v1019_v13 = vadd.f32 %v1018_v47, %v978_v20  ;;  %v787_v20 = vadd.f32 %v3788_v29, %v746_v12 }
 0x22e   : > { %v1042_v15 = vadd.f32 %v1019_v13, %v822_v57  ;;  %v1524_v57 = vld [vmem:[#allocation8 + $0x868] sm:$0xff]  ;;  %v828_v6 = vadd.f32 %v827_v7, %v787_v20  ;;  %v1146_v7 = vld [vmem:[#allocation8 + $0x5d8] sm:$0xff] }
 0x22f   : > { %v1148_v13 = vld [vmem:[#allocation8 + $0x5e8] sm:$0xff]  ;;  %1586 = vmatpush.msrb.mxu1 %v1524_v57 }
 0x230   : > { %v1054_v53 = vadd.f32 %v3823_v14, %v1042_v15  ;;  %1431 = vmatpush.msrb.mxu3 %v1148_v13  ;;  %v830_v15 = vpop.f32.mrf.mxu2 }
 0x231   : > { %1587 = vmatpush.msrb.mxu1 %v1523_v44  ;;  %v1506_v44 = vld [vmem:[#allocation8 + $0x7d8] sm:$0xff] }
 0x232   : > { %v3831_v32 = vmax.f32 %v1054_v53, 0.0  ;;  %1432 = vmatpush.msrb.mxu3 %v1147_v4 }
 0x233   : > { %v1021_v31 = vpop.f32.mrf.mxu1 }
 0x234   : > { %1070 = vst [vmem:[#allocation2 + $0x11] sm:$0xff] %v3831_v32  ;;  %v1022_v35 = vadd.f32 %v1021_v31, %v981_v40  ;;  %1281 = vmatmul.f32.vlgmr.msra.gmra.mxu3 %v3831_v32  ;;  %v1522_v40 = vld [vmem:[#allocation8 + $0x858] sm:$0xff]  ;;  %v749_v31 = vadd.f32 %v3768_v3, %v708_v55  ;;  %v948_v3 = vpop.f32.mrf.mxu3 }
 0x235   : > { %1588 = vmatpush.msrb.mxu1 %v1522_v40  ;;  %1433 = vmatpush.msrb.mxu3 %v1146_v7  ;;  %v1142_v40 = vld [vmem:[#allocation8 + $0x5b8] sm:$0xff] }
 0x236   : > { %v1043_v41 = vadd.f32 %v1022_v35, %v825_v34  ;;  %v1509_v35 = vld [vmem:[#allocation8 + $0x7f0] sm:$0xff]  ;;  %v790_v43 = vadd.f32 %v3792_v62, %v749_v31  ;;  %v1520_v62 = vld [vmem:[#allocation8 + $0x848] sm:$0xff]  ;;  %v992_v31 = vpop.f32.mrf.mxu0 }
 0x237   : > { %1544 = vmatpush.msra.mxu0 %v1509_v35  ;;  %1589 = vmatpush.msrb.mxu1 %v1521_v37 }
 0x238   : > { %v1055_v47 = vadd.f32 %v3823_v14, %v1043_v41  ;;  %v1145_v41 = vld [vmem:[#allocation8 + $0x5d0] sm:$0xff]  ;;  %v831_v57 = vadd.f32 %v830_v15, %v790_v43  ;;  %v833_v55 = vpop.f32.mrf.mxu2 }
 0x239   : > { %1545 = vmatpush.msra.mxu0 %v1508_v25  ;;  %1434 = vmatpush.msrb.mxu3 %v1145_v41  ;;  %v1123_v41 = vld [vmem:[#allocation8 + $0x520] sm:$0xff] }
 0x23a   : > { %v3841_v46 = vmax.f32 %v1055_v47, 0.0  ;;  %1590 = vmatpush.msrb.mxu1 %v1520_v62 }
 0x23b   : > { %v1024_v42 = vpop.f32.mrf.mxu1  ;;  %v1151_v49 = vld [vmem:[#allocation2 + $0x10] sm:$0xff]  ;;  %1546 = vmatpush.msra.mxu0 %v1507_v45  ;;  %1435 = vmatpush.msrb.mxu3 %v1144_v59 }
 0x23c   : > { %v3843_v53 = vld [vmem:[#allocation2 + $0x12] sm:$0xff]  ;;  %1071 = vst [vmem:[#allocation2 + $0x21] sm:$0xff] %v3841_v46  ;;  %v1025_v29 = vadd.f32 %v1024_v42, %v984_v16  ;;  %1240 = vmatmul.f32.vlgmr.msra.gmra.mxu2 %v1151_v49  ;;  %1366 = vmatmul.f32.gmra.mxu1 %v1151_v49  ;;  %v1519_v42 = vld [vmem:[#allocation8 + $0x840] sm:$0xff]  ;;  %v752_v49 = vadd.f32 %v3776_v10, %v711_v26  ;;  %v951_v35 = vpop.f32.mrf.mxu3 }
 0x23d   : > { %1322 = vmatmul.f32.vlgmr.msrb.gmra.mxu0 %v3843_v53  ;;  %1284 = vmatmul.f32.gmra.mxu3 %v3841_v46  ;;  %v1125_v16 = vld [vmem:[#allocation8 + $0x530] sm:$0xff]  ;;  %v714_v10 = vadd.f32 %v3786_v28, %v673_v5  ;;  %v1124_v28 = vld [vmem:[#allocation8 + $0x528] sm:$0xff]  ;;  %v1138_v5 = vld [vmem:[#allocation8 + $0x598] sm:$0xff] }
 0x23e   : > { %v1044_v34 = vadd.f32 %v1025_v29, %v828_v6  ;;  %v1143_v6 = vld [vmem:[#allocation8 + $0x5c0] sm:$0xff]  ;;  %v1518_v29 = vld [vmem:[#allocation8 + $0x838] sm:$0xff]  ;;  %v793_v4 = vadd.f32 %v3800_v38, %v752_v49  ;;  %1397 = vmatpush.msrb.mxu2 %v1125_v16  ;;  %1591 = vmatpush.msrb.mxu1 %v1519_v42  ;;  %v1517_v38 = vld [vmem:[#allocation8 + $0x830] sm:$0xff]  ;;  %v717_v16 = vadd.f32 %v3796_v21, %v676_v11 }
 0x23f   : > { %1547 = vmatpush.msra.mxu0 %v1506_v44  ;;  %1436 = vmatpush.msrb.mxu3 %v1143_v6  ;;  %v755_v25 = vadd.f32 %v3784_v27, %v714_v10  ;;  %v1502_v27 = vld [vmem:[#allocation8 + $0x7b8] sm:$0xff]  ;;  %v993_v42 = vadd.f32 %v992_v31, %v951_v35  ;;  %v1121_v21 = vld [vmem:[#allocation8 + $0x510] sm:$0xff] }
 0x240   : > { %v1056_v12 = vadd.f32 %v3823_v14, %v1044_v34  ;;  %v990_v34 = vadd.f32 %v989_v60, %v948_v3  ;;  %1592 = vmatpush.msrb.mxu1 %v1518_v29  ;;  %v834_v1 = vadd.f32 %v833_v55, %v793_v4  ;;  %v1504_v60 = vld [vmem:[#allocation8 + $0x7c8] sm:$0xff]  ;;  %1398 = vmatpush.msrb.mxu2 %v1124_v28  ;;  %v836_v62 = vpop.f32.mrf.mxu2  ;;  %v1139_v55 = vld [vmem:[#allocation8 + $0x5a0] sm:$0xff]  ;;  %v995_v4 = vpop.f32.mrf.mxu0  ;;  %v1137_v35 = vld [vmem:[#allocation8 + $0x590] sm:$0xff] }
 0x241   : > { %1548 = vmatpush.msra.mxu0 %v1505_v8  ;;  %1437 = vmatpush.msrb.mxu3 %v1142_v40  ;;  %v1516_v3 = vld [vmem:[#allocation8 + $0x828] sm:$0xff]  ;;  %v796_v45 = vadd.f32 %v3808_v24, %v755_v25  ;;  %v1501_v24 = vld [vmem:[#allocation8 + $0x7b0] sm:$0xff]  ;;  %v758_v10 = vadd.f32 %v3794_v9, %v717_v16 }
 0x242   : > { %v3854_v20 = vmax.f32 %v1056_v12, 0.0  ;;  %v1141_v12 = vld [vmem:[#allocation8 + $0x5b0] sm:$0xff]  ;;  %1593 = vmatpush.msrb.mxu1 %v1517_v38  ;;  %1399 = vmatpush.msrb.mxu2 %v1123_v41  ;;  %v1500_v40 = vld [vmem:[#allocation8 + $0x7a8] sm:$0xff]  ;;  %v1499_v38 = vld [vmem:[#allocation8 + $0x7a0] sm:$0xff] }
 0x243   : > { %v1027_v47 = vpop.f32.mrf.mxu1  ;;  %v3856_v48 = vld [vmem:[#allocation2 + $0x20] sm:$0xff]  ;;  %1549 = vmatpush.msra.mxu0 %v1504_v60  ;;  %1438 = vmatpush.msrb.mxu3 %v1141_v12  ;;  %v837_v6 = vadd.f32 %v836_v62, %v796_v45  ;;  %v1513_v8 = vld [vmem:[#allocation8 + $0x810] sm:$0xff]  ;;  %v1136_v9 = vld [vmem:[#allocation8 + $0x588] sm:$0xff] }
 0x244   : > { %v3858_v19 = vld [vmem:[#allocation2 + $0x22] sm:$0xff]  ;;  %1072 = vst [vmem:[#allocation2 + $0x31] sm:$0xff] %v3854_v20  ;;  %v1028_v13 = vadd.f32 %v1027_v47, %v987_v39  ;;  %1243 = vmatmul.f32.gmra.mxu2 %v3856_v48  ;;  %1369 = vmatmul.f32.gmra.mxu1 %v3856_v48  ;;  %v1140_v47 = vld [vmem:[#allocation8 + $0x5a8] sm:$0xff]  ;;  %v1497_v11 = vld [vmem:[#allocation8 + $0x790] sm:$0xff] }
 0x245   : > { %1325 = vmatmul.f32.gmra.mxu0 %v3858_v19  ;;  %1287 = vmatmul.f32.gmra.mxu3 %v3854_v20  ;;  %v1503_v39 = vld [vmem:[#allocation8 + $0x7c0] sm:$0xff]  ;;  %v1542_v45 = vld [vmem:[#allocation8 + $0x8f8] sm:$0xff]  ;;  %v1496_v16 = vld [vmem:[#allocation8 + $0x788] sm:$0xff] }
 0x246   : > { %v1045_v15 = vadd.f32 %v1028_v13, %v831_v57  ;;  %v1515_v57 = vld [vmem:[#allocation8 + $0x820] sm:$0xff]  ;;  %v1122_v13 = vld [vmem:[#allocation8 + $0x518] sm:$0xff]  ;;  %1594 = vmatpush.msrb.mxu1 %v1516_v3  ;;  %1550 = vmatpush.msra.mxu0 %v1503_v39 }
 0x247   : > { %1439 = vmatpush.msrb.mxu3 %v1140_v47  ;;  %1400 = vmatpush.msrb.mxu2 %v1122_v13  ;;  %v1119_v60 = vld [vmem:[#allocation8 + $0x500] sm:$0xff]  ;;  %v1498_v39 = vld [vmem:[#allocation8 + $0x798] sm:$0xff] }
 0x248   : > { %v1057_v18 = vadd.f32 %v3823_v14, %v1045_v15  ;;  %1595 = vmatpush.msrb.mxu1 %v1515_v57  ;;  %v1514_v15 = vld [vmem:[#allocation8 + $0x818] sm:$0xff]  ;;  %1551 = vmatpush.msra.mxu0 %v1502_v27  ;;  %v839_v12 = vpop.f32.mrf.mxu2  ;;  %v998_v13 = vpop.f32.mrf.mxu0 }
 0x249   : > { %1440 = vmatpush.msrb.mxu3 %v1139_v55  ;;  %1401 = vmatpush.msrb.mxu2 %v1121_v21  ;;  %v1541_v55 = vld [vmem:[#allocation8 + $0x8f0] sm:$0xff] }
 0x24a   : > { %v3871_v7 = vmax.f32 %v1057_v18, 0.0  ;;  %v954_v18 = vpop.f32.mrf.mxu3  ;;  %1596 = vmatpush.msrb.mxu1 %v1514_v15  ;;  %1552 = vmatpush.msra.mxu0 %v1501_v24 }
 0x24b   : > { %v1030_v37 = vpop.f32.mrf.mxu1  ;;  %v3873_v51 = vld [vmem:[#allocation2 + $0x30] sm:$0xff]  ;;  %1441 = vmatpush.msrb.mxu3 %v1138_v5  ;;  %v996_v3 = vadd.f32 %v995_v4, %v954_v18  ;;  %v1495_v5 = vld [vmem:[#allocation8 + $0x780] sm:$0xff] }
 0x24c   : > { %v3875_v36 = vld [vmem:[#allocation2 + $0x32] sm:$0xff]  ;;  %1073 = vst [vmem:[#allocation2 + $0x41] sm:$0xff] %v3871_v7  ;;  %v1031_v43 = vadd.f32 %v1030_v37, %v990_v34  ;;  %1246 = vmatmul.f32.gmra.mxu2 %v3873_v51  ;;  %1372 = vmatmul.f32.gmra.mxu1 %v3873_v51 }
 0x24d   : > { %1328 = vmatmul.f32.gmra.mxu0 %v3875_v36  ;;  %1290 = vmatmul.f32.gmra.mxu3 %v3871_v7  ;;  %v1120_v34 = vld [vmem:[#allocation8 + $0x508] sm:$0xff] }
 0x24e   : > { %v1046_v26 = vadd.f32 %v1031_v43, %v834_v1  ;;  %v1512_v37 = vld [vmem:[#allocation8 + $0x808] sm:$0xff]  ;;  %v679_v1 = vadd.f32 %v3806_v22, %v3766_v61  ;;  %v799_v43 = vadd.f32 %v3811_v2, %v758_v10  ;;  %1597 = vmatpush.msrb.mxu1 %v1513_v8  ;;  %1553 = vmatpush.msra.mxu0 %v1500_v40  ;;  %v1539_v8 = vld [vmem:[#allocation8 + $0x8e0] sm:$0xff] }
 0x24f   : > { %1402 = vmatpush.msrb.mxu2 %v1120_v34  ;;  %1442 = vmatpush.msrb.mxu3 %v1137_v35 }
 0x250   : > { %v1058_v59 = vadd.f32 %v3823_v14, %v1046_v26  ;;  %v720_v41 = vadd.f32 %v3804_v0, %v679_v1  ;;  %1598 = vmatpush.msrb.mxu1 %v1512_v37  ;;  %1554 = vmatpush.msra.mxu0 %v1499_v38  ;;  %v1511_v26 = vld [vmem:[#allocation8 + $0x800] sm:$0xff]  ;;  %v840_v47 = vadd.f32 %v839_v12, %v799_v43  ;;  %v1538_v37 = vld [vmem:[#allocation8 + $0x8d8] sm:$0xff]  ;;  %v1537_v38 = vld [vmem:[#allocation8 + $0x8d0] sm:$0xff] }
 0x251   : > { %1403 = vmatpush.msrb.mxu2 %v1119_v60  ;;  %1443 = vmatpush.msrb.mxu3 %v1136_v9  ;;  %v1135_v0 = vld [vmem:[#allocation8 + $0x580] sm:$0xff]  ;;  %v1534_v12 = vld [vmem:[#allocation8 + $0x8b8] sm:$0xff] }
 0x252   : > { %v3888_v49 = vmax.f32 %v1058_v59, 0.0  ;;  %v957_v57 = vpop.f32.mrf.mxu3  ;;  %v761_v59 = vadd.f32 %v3802_v56, %v720_v41  ;;  %1599 = vmatpush.msrb.mxu1 %v1511_v26  ;;  %1555 = vmatpush.msra.mxu0 %v1498_v39  ;;  %v1094_v1 = vld [vmem:[#allocation2 + $0x2] sm:$0xff]  ;;  %v1533_v41 = vld [vmem:[#allocation8 + $0x8b0] sm:$0xff] }
 0x253   : > { %v1033_v44 = vpop.f32.mrf.mxu1  ;;  %v3890_v54 = vld [vmem:[#allocation2 + $0x40] sm:$0xff]  ;;  %1444 = vmatpush.msrb.mxu3 %v1135_v0  ;;  %1625 = vmatpush.msra.mxu2 %v1542_v45  ;;  %v1823_v45 = vld [vmem:[#allocation8 + $0xaf0] sm:$0xff] }
 0x254   : > { %v3892_v23 = vld [vmem:[#allocation2 + $0x42] sm:$0xff]  ;;  %1074 = vst [vmem:[#allocation2 + $0x51] sm:$0xff] %v3888_v49  ;;  %v1034_v29 = vadd.f32 %v1033_v44, %v993_v42  ;;  %1249 = vmatmul.f32.gmra.mxu2 %v3890_v54  ;;  %1375 = vmatmul.f32.gmra.mxu1 %v3890_v54  ;;  %v802_v42 = vadd.f32 %v3816_v30, %v761_v59  ;;  %v1540_v30 = vld [vmem:[#allocation8 + $0x8e8] sm:$0xff] }
 0x255   : > { %1331 = vmatmul.f32.gmra.mxu0 %v3892_v23  ;;  %1293 = vmatmul.f32.gmra.mxu3 %v3888_v49  ;;  %v999_v44 = vadd.f32 %v998_v13, %v957_v57  ;;  %v1535_v60 = vld [vmem:[#allocation8 + $0x8c0] sm:$0xff]  ;;  %v1493_v13 = vld [vmem:[#allocation2 + $0x92] sm:$0xff] }
 0x256   : > { %v1047_v31 = vadd.f32 %v1034_v29, %v837_v6  ;;  %1556 = vmatpush.msra.mxu0 %v1497_v11  ;;  %1626 = vmatpush.msra.mxu2 %v1541_v55  ;;  %v842_v6 = vpop.f32.mrf.mxu2  ;;  %v1086_v9 = vld [vmem:[#allocation2 + $0x1] sm:$0xff] }
 0x257   : > { %v843_v4 = vadd.f32 %v842_v6, %v802_v42  ;;  %v1531_v26 = vld [vmem:[#allocation8 + $0x8a0] sm:$0xff]  ;;  %v1824_v11 = vld [vmem:[#allocation8 + $0xaf8] sm:$0xff] }
 0x258   : > { %v1059_v28 = vadd.f32 %v3823_v14, %v1047_v31  ;;  %1557 = vmatpush.msra.mxu0 %v1496_v16  ;;  %1627 = vmatpush.msra.mxu2 %v1540_v30  ;;  %v1822_v16 = vld [vmem:[#allocation8 + $0xae8] sm:$0xff]  ;;  %v1821_v42 = vld [vmem:[#allocation8 + $0xae0] sm:$0xff]  ;;  %v1820_v6 = vld [vmem:[#allocation8 + $0xad8] sm:$0xff] }
 0x259   : > { %1857 = vmatpush.msra.mxu3 %v1824_v11  ;;  %v1751_v30 = vld [vmem:[#allocation8 + $0x978] sm:$0xff]  ;;  %v1834_v11 = vld [vmem:[#allocation8 + $0xb48] sm:$0xff] }
 0x25a   : > { %v3905_v25 = vmax.f32 %v1059_v28, 0.0  ;;  %1558 = vmatpush.msra.mxu0 %v1495_v5  ;;  %1628 = vmatpush.msra.mxu2 %v1539_v8  ;;  %v1750_v8 = vld [vmem:[#allocation8 + $0x970] sm:$0xff] }
 0x25b   : > { %v1036_v61 = vpop.f32.mrf.mxu1  ;;  %v3907_v22 = vld [vmem:[#allocation2 + $0x50] sm:$0xff]  ;;  %1858 = vmatpush.msra.mxu3 %v1823_v45 }
 0x25c   : > { %v3909_v2 = vld [vmem:[#allocation2 + $0x52] sm:$0xff]  ;;  %1075 = vst [vmem:[#allocation2 + $0x61] sm:$0xff] %v3905_v25  ;;  %v1037_v62 = vadd.f32 %v1036_v61, %v996_v3  ;;  %1252 = vmatmul.f32.gmra.mxu2 %v3907_v22  ;;  %1378 = vmatmul.f32.gmra.mxu1 %v3907_v22 }
 0x25d   : > { %1334 = vmatmul.f32.gmra.mxu0 %v3909_v2  ;;  %1296 = vmatmul.f32.gmra.mxu3 %v3905_v25  ;;  %v1532_v3 = vld [vmem:[#allocation8 + $0x8a8] sm:$0xff] }
 0x25e   : > { %v1048_v27 = vadd.f32 %v1037_v62, %v840_v47  ;;  %1629 = vmatpush.msra.mxu2 %v1538_v37  ;;  %1859 = vmatpush.msra.mxu3 %v1822_v16  ;;  %v1853_v16 = vld [vmem:[#allocation8 + $0xbe0] sm:$0xff] }
 0x260   : > { %v1060_v15 = vadd.f32 %v3823_v14, %v1048_v27  ;;  %1630 = vmatpush.msra.mxu2 %v1537_v38  ;;  %1860 = vmatpush.msra.mxu3 %v1821_v42  ;;  %v1749_v38 = vld [vmem:[#allocation8 + $0x968] sm:$0xff]  ;;  %v1744_v42 = vld [vmem:[#allocation8 + $0x940] sm:$0xff] }
 0x262   : > { %v3919_v24 = vmax.f32 %v1060_v15, 0.0  ;;  %1861 = vmatpush.msra.mxu3 %v1820_v6  ;;  %v1833_v6 = vld [vmem:[#allocation8 + $0xb40] sm:$0xff] }
 0x263   : > { %v1039_v29 = vpop.f32.mrf.mxu1  ;;  %v3921_v56 = vld [vmem:[#allocation2 + $0x60] sm:$0xff] }
 0x264   : > { %v3923_v21 = vld [vmem:[#allocation2 + $0x62] sm:$0xff]  ;;  %1076 = vst [vmem:[#allocation2 + $0x71] sm:$0xff] %v3919_v24  ;;  %v1040_v18 = vadd.f32 %v1039_v29, %v999_v44  ;;  %1255 = vmatmul.f32.gmra.mxu2 %v3921_v56  ;;  %1381 = vmatmul.f32.gmra.mxu1 %v3921_v56  ;;  %v1819_v29 = vld [vmem:[#allocation8 + $0xad0] sm:$0xff] }
 0x265   : > { %1337 = vmatmul.f32.gmra.mxu0 %v3923_v21  ;;  %1299 = vmatmul.f32.gmra.mxu3 %v3919_v24 }
 0x266   : > { %v1049_v40 = vadd.f32 %v1040_v18, %v843_v4  ;;  %1862 = vmatpush.msra.mxu3 %v1819_v29  ;;  %v1818_v18 = vld [vmem:[#allocation8 + $0xac8] sm:$0xff] }
 0x267   : > { %v1814_v29 = vld [vmem:[#allocation8 + $0xaa8] sm:$0xff] }
 0x268   : > { %v1061_v10 = vadd.f32 %v3823_v14, %v1049_v40  ;;  %v1536_v14 = vld [vmem:[#allocation8 + $0x8c8] sm:$0xff]  ;;  %1863 = vmatpush.msra.mxu3 %v1818_v18  ;;  %v1817_v40 = vld [vmem:[#allocation8 + $0xac0] sm:$0xff]  ;;  %v1852_v18 = vld [vmem:[#allocation8 + $0xbd8] sm:$0xff] }
 0x269   : > { %1631 = vmatpush.msra.mxu2 %v1536_v14  ;;  %v1816_v14 = vld [vmem:[#allocation8 + $0xab8] sm:$0xff] }
 0x26a   : > { %v1069_v31 = vmax.f32 %v1061_v10, 0.0  ;;  %v1840_v10 = vld [vmem:[#allocation8 + $0xb78] sm:$0xff]  ;;  %1864 = vmatpush.msra.mxu3 %v1817_v40  ;;  %v1742_v40 = vld [vmem:[#allocation8 + $0x930] sm:$0xff] }
 0x26b   : > { %v1157_v34 = vld [vmem:[#allocation2 + $0x70] sm:$0xff]  ;;  %1632 = vmatpush.msra.mxu2 %v1535_v60  ;;  %v3977_v61 = vpop.f32.mrf.mxu1  ;;  %1898 = vmatpush.msrb.mxu0 %v1840_v10  ;;  %v1856_v60 = vld [vmem:[#allocation8 + $0xbf8] sm:$0xff]  ;;  %v1813_v10 = vld [vmem:[#allocation8 + $0xaa0] sm:$0xff] }
 0x26c   : > { %v3931_v35 = vld [vmem:[#allocation2 + $0x72] sm:$0xff]  ;;  %1077 = vst [vmem:[#allocation2 + $0x81] sm:$0xff] %v1069_v31  ;;  %1258 = vmatmul.f32.gmra.mxu2 %v1157_v34  ;;  %1384 = vmatmul.f32.gmra.mxu1 %v1157_v34 }
 0x26d   : > { %1340 = vmatmul.f32.gmra.mxu0 %v3931_v35  ;;  %1302 = vmatmul.f32.gmra.mxu3 %v1069_v31 }
 0x26e   : > { %1633 = vmatpush.msra.mxu2 %v1534_v12  ;;  %1865 = vmatpush.msra.mxu3 %v1816_v14  ;;  %v1741_v14 = vld [vmem:[#allocation8 + $0x928] sm:$0xff] }
 0x26f   : > { %1939 = vmatpush.msra.mxu1 %v1856_v60  ;;  %v1830_v60 = vld [vmem:[#allocation8 + $0xb28] sm:$0xff] }
 0x270   : > { %1634 = vmatpush.msra.mxu2 %v1533_v41  ;;  %v1855_v41 = vld [vmem:[#allocation8 + $0xbf0] sm:$0xff] }
 0x271   : > { %1940 = vmatpush.msra.mxu1 %v1855_v41  ;;  %v1740_v41 = vld [vmem:[#allocation8 + $0x920] sm:$0xff] }
 0x272   : > { %1635 = vmatpush.msra.mxu2 %v1532_v3  ;;  %v1746_v3 = vld [vmem:[#allocation8 + $0x950] sm:$0xff] }
 0x273   : > { %v1158_v43 = vld [vmem:[#allocation2 + $0x80] sm:$0xff] }
 0x274   : > { %v3934_v28 = vld [vmem:[#allocation2 + $0x82] sm:$0xff]  ;;  %1261 = vmatmul.f32.gmra.mxu2 %v1158_v43  ;;  %1600 = vmatmul.f32.vlgmr.msrb.gmra.mxu1 %v3841_v46 }
 0x275   : > { %1343 = vmatmul.f32.gmra.mxu0 %v3934_v28  ;;  %1445 = vmatmul.f32.vlgmr.msrb.gmra.mxu3 %v1094_v1  ;;  %v1838_v1 = vld [vmem:[#allocation8 + $0xb68] sm:$0xff] }
 0x276   : > { %1636 = vmatpush.msra.mxu2 %v1531_v26  ;;  %v1815_v26 = vld [vmem:[#allocation8 + $0xab0] sm:$0xff] }
 0x277   : > { %1866 = vmatpush.msra.mxu3 %v1815_v26  ;;  %v1829_v26 = vld [vmem:[#allocation8 + $0xb20] sm:$0xff] }
 0x279   : > { %1867 = vmatpush.msra.mxu3 %v1814_v29 }
 0x27b   : > { %1868 = vmatpush.msra.mxu3 %v1813_v10  ;;  %v1826_v10 = vld [vmem:[#allocation8 + $0xb08] sm:$0xff] }
 0x27c   : > { %1404 = vmatmul.f32.vlgmr.msrb.gmra.mxu2 %v1086_v9  ;;  %1603 = vmatmul.f32.gmra.mxu1 %v3854_v20  ;;  %v1747_v9 = vld [vmem:[#allocation8 + $0x958] sm:$0xff] }
 0x27d   : > { %1559 = vmatmul.f32.vlgmr.msra.gmra.mxu0 %v3856_v48  ;;  %1448 = vmatmul.f32.gmra.mxu3 %v3843_v53  ;;  %v1530_v53 = vld [vmem:[#allocation8 + $0x898] sm:$0xff]  ;;  %v1528_v48 = vld [vmem:[#allocation8 + $0x888] sm:$0xff] }
 0x27e   : > { %1637 = vmatpush.msra.mxu2 %v1530_v53  ;;  %v1836_v53 = vld [vmem:[#allocation8 + $0xb58] sm:$0xff] }
 0x284   : > { %1407 = vmatmul.f32.gmra.mxu2 %v3831_v32  ;;  %1606 = vmatmul.f32.gmra.mxu1 %v3871_v7  ;;  %v1529_v32 = vld [vmem:[#allocation8 + $0x890] sm:$0xff] }
 0x285   : > { %1562 = vmatmul.f32.gmra.mxu0 %v3873_v51  ;;  %1451 = vmatmul.f32.gmra.mxu3 %v3858_v19 }
 0x286   : > { %1638 = vmatpush.msra.mxu2 %v1529_v32  ;;  %v1835_v32 = vld [vmem:[#allocation8 + $0xb50] sm:$0xff] }
 0x288   : > { %1639 = vmatpush.msra.mxu2 %v1528_v48 }
 0x28c   : > { %1410 = vmatmul.f32.gmra.mxu2 %v3841_v46  ;;  %1609 = vmatmul.f32.gmra.mxu1 %v3888_v49  ;;  %v1527_v46 = vld [vmem:[#allocation8 + $0x880] sm:$0xff] }
 0x28d   : > { %1565 = vmatmul.f32.gmra.mxu0 %v3890_v54  ;;  %1454 = vmatmul.f32.gmra.mxu3 %v3875_v36 }
 0x28e   : > { %1640 = vmatpush.msra.mxu2 %v1527_v46  ;;  %v1854_v46 = vld [vmem:[#allocation8 + $0xbe8] sm:$0xff] }
 0x28f   : > { %1941 = vmatpush.msra.mxu1 %v1854_v46  ;;  %v1739_v46 = vld [vmem:[#allocation8 + $0x918] sm:$0xff] }
 0x290   : > { %1980 = vmatpush.msrb.mxu2 %v1751_v30  ;;  %v1743_v30 = vld [vmem:[#allocation8 + $0x938] sm:$0xff] }
 0x291   : > { %1942 = vmatpush.msra.mxu1 %v1853_v16  ;;  %v1738_v16 = vld [vmem:[#allocation8 + $0x910] sm:$0xff] }
 0x292   : > { %1981 = vmatpush.msrb.mxu2 %v1750_v8  ;;  %v1851_v8 = vld [vmem:[#allocation8 + $0xbd0] sm:$0xff] }
 0x293   : > { %1943 = vmatpush.msra.mxu1 %v1852_v18  ;;  %v1846_v18 = vld [vmem:[#allocation8 + $0xba8] sm:$0xff] }
 0x294   : > { %1413 = vmatmul.f32.gmra.mxu2 %v3854_v20  ;;  %1612 = vmatmul.f32.gmra.mxu1 %v3905_v25  ;;  %v3962_v20 = vld [vmem:[#allocation2] sm:$0xff] }
 0x295   : > { %1568 = vmatmul.f32.gmra.mxu0 %v3907_v22  ;;  %1457 = vmatmul.f32.gmra.mxu3 %v3892_v23 }
 0x296   : > { %1982 = vmatpush.msrb.mxu2 %v1749_v38  ;;  %1944 = vmatpush.msra.mxu1 %v1851_v8  ;;  %v1845_v8 = vld [vmem:[#allocation8 + $0xba0] sm:$0xff] }
 0x29c   : > { %1416 = vmatmul.f32.gmra.mxu2 %v3871_v7  ;;  %1615 = vmatmul.f32.gmra.mxu1 %v3919_v24 }
 0x29d   : > { %1571 = vmatmul.f32.gmra.mxu0 %v3921_v56  ;;  %1460 = vmatmul.f32.gmra.mxu3 %v3909_v2 }
 0x2a4   : > { %1419 = vmatmul.f32.gmra.mxu2 %v3888_v49  ;;  %1618 = vmatmul.f32.gmra.mxu1 %v1069_v31  ;;  %v1839_v31 = vld [vmem:[#allocation8 + $0xb70] sm:$0xff] }
 0x2a5   : > { %1574 = vmatmul.f32.gmra.mxu0 %v1157_v34  ;;  %1463 = vmatmul.f32.gmra.mxu3 %v3923_v21 }
 0x2a6   : > { %1899 = vmatpush.msrb.mxu0 %v1839_v31  ;;  %v1832_v31 = vld [vmem:[#allocation8 + $0xb38] sm:$0xff] }
 0x2a8   : > { %1900 = vmatpush.msrb.mxu0 %v1838_v1  ;;  %v1831_v1 = vld [vmem:[#allocation8 + $0xb30] sm:$0xff] }
 0x2ac   : > { %1422 = vmatmul.f32.gmra.mxu2 %v3905_v25  ;;  %v1485_v25 = vld [vmem:[#allocation2 + $0x91] sm:$0xff] }
 0x2ad   : > { %1577 = vmatmul.f32.gmra.mxu0 %v1158_v43  ;;  %1466 = vmatmul.f32.gmra.mxu3 %v3931_v35  ;;  %v1748_v43 = vld [vmem:[#allocation8 + $0x960] sm:$0xff] }
 0x2ae   : > { %1621 = vmatmul.f32.gmra.mxu1 %v1485_v25  ;;  %1983 = vmatpush.msrb.mxu2 %v1748_v43  ;;  %v1745_v25 = vld [vmem:[#allocation8 + $0x948] sm:$0xff] }
 0x2b0   : > { %1984 = vmatpush.msrb.mxu2 %v1747_v9  ;;  %v1849_v9 = vld [vmem:[#allocation8 + $0xbc0] sm:$0xff] }
 0x2b2   : > { %1985 = vmatpush.msrb.mxu2 %v1746_v3 }
 0x2b4   : > { %1425 = vmatmul.f32.gmra.mxu2 %v3919_v24 }
 0x2b5   : > { %1580 = vmatmul.f32.gmra.mxu0 %v3962_v20  ;;  %1986 = vmatpush.msrb.mxu2 %v1745_v25  ;;  %v1828_v25 = vld [vmem:[#allocation8 + $0xb18] sm:$0xff] }
 0x2b7   : > { %1987 = vmatpush.msrb.mxu2 %v1744_v42  ;;  %v1827_v42 = vld [vmem:[#allocation8 + $0xb10] sm:$0xff] }
 0x2b9   : > { %1988 = vmatpush.msrb.mxu2 %v1743_v30  ;;  %v1737_v30 = vld [vmem:[#allocation8 + $0x908] sm:$0xff] }
 0x2bb   : > { %1989 = vmatpush.msrb.mxu2 %v1742_v40  ;;  %v1736_v40 = vld [vmem:[#allocation8 + $0x900] sm:$0xff] }
 0x2bc   : > { %1641 = vmatmul.f32.vlgmr.msra.gmra.mxu2 %v3858_v19  ;;  %v3980_v19 = vpop.f32.mrf.mxu0 }
 0x2bd   : > { %1990 = vmatpush.msrb.mxu2 %v1741_v14  ;;  %v1825_v14 = vld [vmem:[#allocation8 + $0xb00] sm:$0xff] }
 0x2bf   : > { %v3966_v7 = vpop.f32.mrf.mxu2  ;;  %1991 = vmatpush.msrb.mxu2 %v1740_v41  ;;  %v1843_v41 = vld [vmem:[#allocation8 + $0xb90] sm:$0xff] }
 0x2c1   : > { %1992 = vmatpush.msrb.mxu2 %v1739_v46  ;;  %v1842_v46 = vld [vmem:[#allocation8 + $0xb88] sm:$0xff] }
 0x2c3   : > { %1993 = vmatpush.msrb.mxu2 %v1738_v16  ;;  %v1841_v16 = vld [vmem:[#allocation8 + $0xb80] sm:$0xff] }
 0x2c4   : > { %1644 = vmatmul.f32.gmra.mxu2 %v3875_v36  ;;  %v3984_v36 = vpop.f32.mrf.mxu3  ;;  %v3989_v39 = vpop.f32.mrf.mxu0 }
 0x2c5   : > { %1994 = vmatpush.msrb.mxu2 %v1737_v30 }
 0x2c7   : > { %v3969_v51 = vpop.f32.mrf.mxu2  ;;  %1995 = vmatpush.msrb.mxu2 %v1736_v40 }
 0x2cc   : > { %1647 = vmatmul.f32.gmra.mxu2 %v3892_v23  ;;  %v3987_v23 = vpop.f32.mrf.mxu1  ;;  %v3993_v47 = vpop.f32.mrf.mxu3 }
 0x2cd   : > { %v4000_v57 = vpop.f32.mrf.mxu0  ;;  %v1286_v40 = vadd.f32 %v3993_v47, %v3969_v51 }
 0x2cf   : > { %v3972_v49 = vpop.f32.mrf.mxu2 }
 0x2d4   : > { %1650 = vmatmul.f32.gmra.mxu2 %v3909_v2  ;;  %v3998_v0 = vpop.f32.mrf.mxu1  ;;  %v4002_v59 = vpop.f32.mrf.mxu3 }
 0x2d5   : > { %v4008_v15 = vpop.f32.mrf.mxu0  ;;  %v1289_v51 = vadd.f32 %v4002_v59, %v3972_v49 }
 0x2d7   : > { %v3975_v54 = vpop.f32.mrf.mxu2 }
 0x2dc   : > { %1653 = vmatmul.f32.gmra.mxu2 %v3923_v21  ;;  %v4006_v55 = vpop.f32.mrf.mxu1  ;;  %v4010_v44 = vpop.f32.mrf.mxu3 }
 0x2dd   : > { %v4016_v21 = vpop.f32.mrf.mxu0  ;;  %v1292_v59 = vadd.f32 %v4010_v44, %v3975_v54  ;;  %v2158_v54 = vld [vmem:[#allocation8 + $0xcf0] sm:$0xff] }
 0x2df   : > { %v3982_v22 = vpop.f32.mrf.mxu2  ;;  %v1333_v44 = vadd.f32 %v4008_v15, %v1292_v59  ;;  %v2142_v59 = vld [vmem:[#allocation8 + $0xc70] sm:$0xff] }
 0x2e4   : > { %1656 = vmatmul.f32.gmra.mxu2 %v3931_v35  ;;  %v4014_v56 = vpop.f32.mrf.mxu1  ;;  %v4020_v4 = vpop.f32.mrf.mxu3 }
 0x2e5   : > { %v4024_v35 = vpop.f32.mrf.mxu0  ;;  %v1295_v15 = vadd.f32 %v4020_v4, %v3982_v22 }
 0x2e7   : > { %v3991_v2 = vpop.f32.mrf.mxu2 }
 0x2ec   : > { %1659 = vmatmul.f32.gmra.mxu2 %v3934_v28  ;;  %v4022_v34 = vpop.f32.mrf.mxu1  ;;  %v1837_v28 = vld [vmem:[#allocation8 + $0xb60] sm:$0xff]  ;;  %v4028_v12 = vpop.f32.mrf.mxu3 }
 0x2ed   : > { %1901 = vmatpush.msrb.mxu0 %v1837_v28  ;;  %v4034_v45 = vpop.f32.mrf.mxu0  ;;  %v1850_v28 = vld [vmem:[#allocation8 + $0xbc8] sm:$0xff] }
 0x2ee   : > { %1945 = vmatpush.msra.mxu1 %v1850_v28  ;;  %v1844_v28 = vld [vmem:[#allocation8 + $0xb98] sm:$0xff] }
 0x2ef   : > { %v3996_v62 = vpop.f32.mrf.mxu2  ;;  %1902 = vmatpush.msrb.mxu0 %v1836_v53 }
 0x2f0   : > { %1946 = vmatpush.msra.mxu1 %v1849_v9 }
 0x2f1   : > { %1903 = vmatpush.msrb.mxu0 %v1835_v32  ;;  %v1848_v32 = vld [vmem:[#allocation8 + $0xbb8] sm:$0xff] }
 0x2f2   : > { %1947 = vmatpush.msra.mxu1 %v1848_v32  ;;  %v1810_v32 = vld [vmem:[#allocation8 + $0xa88] sm:$0xff] }
 0x2f3   : > { %1904 = vmatpush.msrb.mxu0 %v1834_v11  ;;  %v1847_v11 = vld [vmem:[#allocation8 + $0xbb0] sm:$0xff] }
 0x2f4   : > { %1662 = vmatmul.f32.gmra.mxu2 %v1493_v13  ;;  %v4032_v13 = vpop.f32.mrf.mxu1  ;;  %v4036_v38 = vpop.f32.mrf.mxu3  ;;  %1948 = vmatpush.msra.mxu1 %v1847_v11  ;;  %v1809_v11 = vld [vmem:[#allocation8 + $0xa80] sm:$0xff] }
 0x2f5   : > { %1905 = vmatpush.msrb.mxu0 %v1833_v6  ;;  %v4042_v53 = vpop.f32.mrf.mxu0 }
 0x2f6   : > { %1949 = vmatpush.msra.mxu1 %v1846_v18 }
 0x2f7   : > { %v4004_v27 = vpop.f32.mrf.mxu2  ;;  %1906 = vmatpush.msrb.mxu0 %v1832_v31  ;;  %v1812_v31 = vld [vmem:[#allocation8 + $0xa98] sm:$0xff] }
 0x2f8   : > { %1950 = vmatpush.msra.mxu1 %v1845_v8  ;;  %1869 = vmatpush.msra.mxu3 %v1812_v31  ;;  %v1767_v31 = vld [vmem:[#allocation8 + $0x9f8] sm:$0xff] }
 0x2f9   : > { %1907 = vmatpush.msrb.mxu0 %v1831_v1  ;;  %v1811_v1 = vld [vmem:[#allocation8 + $0xa90] sm:$0xff] }
 0x2fa   : > { %1951 = vmatpush.msra.mxu1 %v1844_v28  ;;  %1870 = vmatpush.msra.mxu3 %v1811_v1  ;;  %v1766_v1 = vld [vmem:[#allocation8 + $0x9f0] sm:$0xff] }
 0x2fb   : > { %1908 = vmatpush.msrb.mxu0 %v1830_v60 }
 0x2fc   : > { %v4040_v3 = vpop.f32.mrf.mxu1  ;;  %v4044_v6 = vpop.f32.mrf.mxu3  ;;  %1996 = vmatmul.f32.vlgmr.msrb.gmra.mxu2 %v3962_v20  ;;  %1952 = vmatpush.msra.mxu1 %v1843_v41  ;;  %v1283_v20 = vadd.f32 %v3984_v36, %v3966_v7  ;;  %v1327_v7 = vadd.f32 %v3989_v39, %v1286_v40 }
 0x2fd   : > { %1909 = vmatpush.msrb.mxu0 %v1829_v26  ;;  %v1560_v9 = vpop.f32.mrf.mxu0  ;;  %1871 = vmatpush.msra.mxu3 %v1810_v32 }
 0x2fe   : > { %1953 = vmatpush.msra.mxu1 %v1842_v46 }
 0x2ff   : > { %v4012_v24 = vpop.f32.mrf.mxu2  ;;  %1910 = vmatpush.msrb.mxu0 %v1828_v25  ;;  %1872 = vmatpush.msra.mxu3 %v1809_v11  ;;  %v4061_v11 = vld [vmem:[#allocation9 + $0x1] ss:$0 sm:$0xff] }
 0x300   : > { %1954 = vmatpush.msra.mxu1 %v1841_v16 }
 0x301   : > { %1911 = vmatpush.msrb.mxu0 %v1827_v42  ;;  %v1324_v42 = vadd.f32 %v3980_v19, %v1283_v20  ;;  %2021 = vmatpush.msrb.mxu3 %v1767_v31  ;;  %v1765_v20 = vld [vmem:[#allocation8 + $0x9e8] sm:$0xff] }
 0x303   : > { %1912 = vmatpush.msrb.mxu0 %v1826_v10  ;;  %v1365_v10 = vadd.f32 %v3977_v61, %v1324_v42  ;;  %2022 = vmatpush.msrb.mxu3 %v1766_v1  ;;  %v1368_v61 = vadd.f32 %v3987_v23, %v1327_v7  ;;  %v1764_v42 = vld [vmem:[#allocation8 + $0x9e0] sm:$0xff] }
 0x304   : > { %v1601_v60 = vpop.f32.mrf.mxu1  ;;  %v1446_v25 = vpop.f32.mrf.mxu3 }
 0x305   : > { %1913 = vmatpush.msrb.mxu0 %v1825_v14  ;;  %v1563_v30 = vpop.f32.mrf.mxu0  ;;  %v1406_v14 = vadd.f32 %v4012_v24, %v1365_v10  ;;  %v1602_v36 = vadd.f32 %v1601_v60, %v1560_v9  ;;  %2023 = vmatpush.msrb.mxu3 %v1765_v20  ;;  %v1330_v9 = vadd.f32 %v4000_v57, %v1289_v51  ;;  %v1763_v57 = vld [vmem:[#allocation8 + $0x9d8] sm:$0xff] }
 0x307   : > { %v4018_v5 = vpop.f32.mrf.mxu2  ;;  %v1447_v41 = vadd.f32 %v1446_v25, %v1406_v14  ;;  %2024 = vmatpush.msrb.mxu3 %v1764_v42 }
 0x308   : > { %v1409_v24 = vadd.f32 %v4018_v5, %v1368_v61  ;;  %v1371_v5 = vadd.f32 %v3998_v0, %v1330_v9  ;;  %v1782_v0 = vld [vmem:[#allocation8 + $0xa70] sm:$0xff]  ;;  %v2157_v61 = vld [vmem:[#allocation8 + $0xce8] sm:$0xff]  ;;  %v2156_v9 = vld [vmem:[#allocation8 + $0xce0] sm:$0xff] }
 0x309   : > { %2025 = vmatpush.msrb.mxu3 %v1763_v57 }
 0x30c   : > { %v1604_v18 = vpop.f32.mrf.mxu1  ;;  %v1449_v28 = vpop.f32.mrf.mxu3 }
 0x30d   : > { %v1566_v16 = vpop.f32.mrf.mxu0  ;;  %v1605_v25 = vadd.f32 %v1604_v18, %v1563_v30  ;;  %v1450_v31 = vadd.f32 %v1449_v28, %v1409_v24  ;;  %v1762_v18 = vld [vmem:[#allocation8 + $0x9d0] sm:$0xff]  ;;  %v1783_v28 = vld [vmem:[#allocation8 + $0xa78] sm:$0xff] }
 0x30e   : > { %2062 = vmatpush.msra.mxu0 %v1783_v28  ;;  %2026 = vmatpush.msrb.mxu3 %v1762_v18 }
 0x30f   : > { %v4026_v37 = vpop.f32.mrf.mxu2 }
 0x310   : > { %v1412_v7 = vadd.f32 %v4026_v37, %v1371_v5  ;;  %2063 = vmatpush.msra.mxu0 %v1782_v0  ;;  %v2154_v5 = vld [vmem:[#allocation8 + $0xcd0] sm:$0xff] }
 0x314   : > { %v1607_v32 = vpop.f32.mrf.mxu1  ;;  %v1452_v60 = vpop.f32.mrf.mxu3 }
 0x315   : > { %v1569_v30 = vpop.f32.mrf.mxu0  ;;  %v1453_v20 = vadd.f32 %v1452_v60, %v1412_v7  ;;  %v1780_v60 = vld [vmem:[#allocation8 + $0xa60] sm:$0xff] }
 0x317   : > { %v4030_v48 = vpop.f32.mrf.mxu2 }
 0x31c   : > { %v1610_v1 = vpop.f32.mrf.mxu1 }
 0x31d   : > { %v1572_v4 = vpop.f32.mrf.mxu0  ;;  %v1611_v57 = vadd.f32 %v1610_v1, %v1569_v30 }
 0x31f   : > { %v4038_v43 = vpop.f32.mrf.mxu2 }
 0x327   : > { %v4046_v29 = vpop.f32.mrf.mxu2 }
 0x32f   : > { %v4049_v26 = vpop.f32.mrf.mxu2 }
 0x337   : > { %v4054_v8 = vpop.f32.mrf.mxu2 }
 0x33f   : > { %v1642_v19 = vpop.f32.mrf.mxu2 }
 0x340   : > { %v1643_v46 = vadd.f32 %v1642_v19, %v1602_v36  ;;  %v1608_v19 = vadd.f32 %v1607_v32, %v1566_v16  ;;  %v1761_v16 = vld [vmem:[#allocation8 + $0x9c8] sm:$0xff] }
 0x341   : > { %2027 = vmatpush.msrb.mxu3 %v1761_v16  ;;  %v1775_v16 = vld [vmem:[#allocation8 + $0xa38] sm:$0xff] }
 0x342   : > { %v1666_v47 = vadd.f32 %v1643_v46, %v1447_v41  ;;  %v1455_v46 = vpop.f32.mrf.mxu3 }
 0x344   : > { %v1679_v39 = vadd.f32 %v4061_v11, %v1666_v47  ;;  %v1781_v47 = vld [vmem:[#allocation8 + $0xa68] sm:$0xff] }
 0x345   : > { %2064 = vmatpush.msra.mxu0 %v1781_v47  ;;  %v2152_v47 = vld [vmem:[#allocation8 + $0xcc0] sm:$0xff] }
 0x346   : > { %v1687_v40 = vadd.f32 %v1679_v39, %v3621_v52  ;;  %v2159_v52 = vld [vmem:[#allocation8 + $0xcf8] sm:$0xff] }
 0x347   : > { %v1645_v10 = vpop.f32.mrf.mxu2  ;;  %2217 = vmatpush.msra.mxu2 %v2159_v52  ;;  %2065 = vmatpush.msra.mxu0 %v1780_v60  ;;  %v1778_v52 = vld [vmem:[#allocation8 + $0xa50] sm:$0xff] }
 0x348   : > { %v4070_v49 = vmax.f32 %v1687_v40, 0.0  ;;  %v1646_v23 = vadd.f32 %v1645_v10, %v1605_v25  ;;  %v1760_v25 = vld [vmem:[#allocation8 + $0x9c0] sm:$0xff]  ;;  %v2143_v40 = vld [vmem:[#allocation8 + $0xc78] sm:$0xff] }
 0x349   : > { %2218 = vmatpush.msra.mxu2 %v2158_v54  ;;  %v2155_v10 = vld [vmem:[#allocation8 + $0xcd8] sm:$0xff]  ;;  %2176 = vmatpush.msrb.mxu1 %v2143_v40 }
 0x34a   : > { %1703 = vst [vmem:[#allocation2 + $0x11] sm:$0xff] %v4070_v49  ;;  %v1667_v14 = vadd.f32 %v1646_v23, %v1450_v31  ;;  %1914 = vmatmul.f32.vlgmr.msrb.gmra.mxu0 %v4070_v49  ;;  %v1613_v31 = vpop.f32.mrf.mxu1  ;;  %2028 = vmatpush.msrb.mxu3 %v1760_v25  ;;  %v1458_v0 = vpop.f32.mrf.mxu3 }
 0x34b   : > { %2219 = vmatpush.msra.mxu2 %v2157_v61  ;;  %2177 = vmatpush.msrb.mxu1 %v2142_v59  ;;  %v1758_v61 = vld [vmem:[#allocation8 + $0x9b0] sm:$0xff]  ;;  %v2137_v59 = vld [vmem:[#allocation8 + $0xc48] sm:$0xff] }
 0x34c   : > { %v1680_v36 = vadd.f32 %v4061_v11, %v1667_v14  ;;  %v1336_v14 = vadd.f32 %v4016_v21, %v1295_v15  ;;  %v2153_v21 = vld [vmem:[#allocation8 + $0xcc8] sm:$0xff] }
 0x34d   : > { %2220 = vmatpush.msra.mxu2 %v2156_v9  ;;  %v1614_v9 = vadd.f32 %v1613_v31, %v1572_v4  ;;  %v2150_v31 = vld [vmem:[#allocation8 + $0xcb0] sm:$0xff]  ;;  %v1757_v4 = vld [vmem:[#allocation8 + $0x9a8] sm:$0xff] }
 0x34e   : > { %v1688_v41 = vadd.f32 %v1680_v36, %v3630_v63  ;;  %v1374_v63 = vadd.f32 %v4006_v55, %v1333_v44  ;;  %v1779_v55 = vld [vmem:[#allocation8 + $0xa58] sm:$0xff]  ;;  %v1377_v1 = vadd.f32 %v4014_v56, %v1336_v14 }
 0x34f   : > { %v1648_v51 = vpop.f32.mrf.mxu2  ;;  %2221 = vmatpush.msra.mxu2 %v2155_v10  ;;  %2066 = vmatpush.msra.mxu0 %v1779_v55 }
 0x350   : > { %v4081_v37 = vmax.f32 %v1688_v41, 0.0  ;;  %v1649_v42 = vadd.f32 %v1648_v51, %v1608_v19  ;;  %v1415_v23 = vadd.f32 %v4030_v48, %v1374_v63  ;;  %v2141_v48 = vld [vmem:[#allocation8 + $0xc68] sm:$0xff]  ;;  %v1759_v41 = vld [vmem:[#allocation8 + $0x9b8] sm:$0xff] }
 0x351   : > { %v1784_v24 = vld [vmem:[#allocation2 + $0x10] sm:$0xff]  ;;  %2222 = vmatpush.msra.mxu2 %v2154_v5  ;;  %2178 = vmatpush.msrb.mxu1 %v2141_v48  ;;  %v1755_v48 = vld [vmem:[#allocation8 + $0x998] sm:$0xff] }
 0x352   : > { %v4083_v39 = vld [vmem:[#allocation2 + $0x12] sm:$0xff]  ;;  %1704 = vst [vmem:[#allocation2 + $0x21] sm:$0xff] %v4081_v37  ;;  %v1668_v32 = vadd.f32 %v1649_v42, %v1453_v20  ;;  %1873 = vmatmul.f32.vlgmr.msra.gmra.mxu3 %v1784_v24  ;;  %1999 = vmatmul.f32.gmra.mxu2 %v1784_v24  ;;  %v1456_v7 = vadd.f32 %v1455_v46, %v1415_v23  ;;  %v2140_v46 = vld [vmem:[#allocation8 + $0xc60] sm:$0xff]  ;;  %v2151_v42 = vld [vmem:[#allocation8 + $0xcb8] sm:$0xff]  ;;  %v1616_v15 = vpop.f32.mrf.mxu1  ;;  %v1461_v14 = vpop.f32.mrf.mxu3 }
 0x353   : > { %1955 = vmatmul.f32.vlgmr.msra.gmra.mxu1 %v4083_v39  ;;  %1917 = vmatmul.f32.gmra.mxu0 %v4081_v37  ;;  %v1777_v51 = vld [vmem:[#allocation8 + $0xa48] sm:$0xff]  ;;  %v1776_v20 = vld [vmem:[#allocation8 + $0xa40] sm:$0xff]  ;;  %v1774_v5 = vld [vmem:[#allocation8 + $0xa30] sm:$0xff] }
 0x354   : > { %v1681_v22 = vadd.f32 %v4061_v11, %v1668_v32  ;;  %2067 = vmatpush.msra.mxu0 %v1778_v52  ;;  %2029 = vmatpush.msrb.mxu3 %v1759_v41  ;;  %v2138_v32 = vld [vmem:[#allocation8 + $0xc50] sm:$0xff]  ;;  %v1773_v52 = vld [vmem:[#allocation8 + $0xa28] sm:$0xff] }
 0x355   : > { %2223 = vmatpush.msra.mxu2 %v2153_v21  ;;  %2179 = vmatpush.msrb.mxu1 %v2140_v46  ;;  %v2135_v21 = vld [vmem:[#allocation8 + $0xc38] sm:$0xff] }
 0x356   : > { %v1689_v18 = vadd.f32 %v1681_v22, %v3638_v17  ;;  %v1298_v17 = vadd.f32 %v4028_v12, %v3991_v2  ;;  %v1418_v2 = vadd.f32 %v4038_v43, %v1377_v1  ;;  %v2139_v12 = vld [vmem:[#allocation8 + $0xc58] sm:$0xff]  ;;  %2068 = vmatpush.msra.mxu0 %v1777_v51  ;;  %2030 = vmatpush.msrb.mxu3 %v1758_v61  ;;  %v1575_v43 = vpop.f32.mrf.mxu0 }
 0x357   : > { %v1651_v28 = vpop.f32.mrf.mxu2  ;;  %2224 = vmatpush.msra.mxu2 %v2152_v47  ;;  %2180 = vmatpush.msrb.mxu1 %v2139_v12  ;;  %v2147_v46 = vld [vmem:[#allocation8 + $0xc98] sm:$0xff] }
 0x358   : > { %v4095_v36 = vmax.f32 %v1689_v18, 0.0  ;;  %v1652_v54 = vadd.f32 %v1651_v28, %v1611_v57  ;;  %v1339_v24 = vadd.f32 %v4024_v35, %v1298_v17  ;;  %2069 = vmatpush.msra.mxu0 %v1776_v20  ;;  %v1459_v25 = vadd.f32 %v1458_v0, %v1418_v2  ;;  %v1756_v57 = vld [vmem:[#allocation8 + $0x9a0] sm:$0xff]  ;;  %v2149_v18 = vld [vmem:[#allocation8 + $0xca8] sm:$0xff]  ;;  %2031 = vmatpush.msrb.mxu3 %v1757_v4  ;;  %v1754_v20 = vld [vmem:[#allocation8 + $0x990] sm:$0xff] }
 0x359   : > { %v4097_v44 = vld [vmem:[#allocation2 + $0x20] sm:$0xff]  ;;  %2225 = vmatpush.msra.mxu2 %v2151_v42  ;;  %2181 = vmatpush.msrb.mxu1 %v2138_v32  ;;  %v1304_v2 = vadd.f32 %v4044_v6, %v4004_v27  ;;  %v1770_v6 = vld [vmem:[#allocation8 + $0xa10] sm:$0xff]  ;;  %v2145_v32 = vld [vmem:[#allocation8 + $0xc88] sm:$0xff] }
 0x35a   : > { %v4099_v19 = vld [vmem:[#allocation2 + $0x22] sm:$0xff]  ;;  %1705 = vst [vmem:[#allocation2 + $0x31] sm:$0xff] %v4095_v36  ;;  %v1669_v30 = vadd.f32 %v1652_v54, %v1456_v7  ;;  %1876 = vmatmul.f32.gmra.mxu3 %v4097_v44  ;;  %2002 = vmatmul.f32.gmra.mxu2 %v4097_v44  ;;  %v1380_v22 = vadd.f32 %v4022_v34, %v1339_v24  ;;  %v1619_v51 = vpop.f32.mrf.mxu1  ;;  %v2146_v24 = vld [vmem:[#allocation8 + $0xc90] sm:$0xff] }
 0x35b   : > { %1958 = vmatmul.f32.gmra.mxu1 %v4099_v19  ;;  %1920 = vmatmul.f32.gmra.mxu0 %v4095_v36  ;;  %v2148_v28 = vld [vmem:[#allocation8 + $0xca0] sm:$0xff]  ;;  %v1617_v54 = vadd.f32 %v1616_v15, %v1575_v43  ;;  %v1771_v42 = vld [vmem:[#allocation8 + $0xa18] sm:$0xff]  ;;  %v1345_v43 = vadd.f32 %v4042_v53, %v1304_v2 }
 0x35c   : > { %v1682_v56 = vadd.f32 %v4061_v11, %v1669_v30  ;;  %2070 = vmatpush.msra.mxu0 %v1775_v16  ;;  %2226 = vmatpush.msra.mxu2 %v2150_v31  ;;  %v1772_v17 = vld [vmem:[#allocation8 + $0xa20] sm:$0xff] }
 0x35d   : > { %2182 = vmatpush.msrb.mxu1 %v2137_v59  ;;  %2032 = vmatpush.msrb.mxu3 %v1756_v57  ;;  %v2132_v16 = vld [vmem:[#allocation8 + $0xc20] sm:$0xff]  ;;  %v1386_v57 = vadd.f32 %v4040_v3, %v1345_v43  ;;  %v2174_v3 = vld [vmem:[#allocation8 + $0xd70] sm:$0xff]  ;;  %v2167_v43 = vld [vmem:[#allocation8 + $0xd38] sm:$0xff] }
 0x35e   : > { %v1690_v63 = vadd.f32 %v1682_v56, %v3654_v33  ;;  %v1301_v33 = vadd.f32 %v4036_v38, %v3996_v62  ;;  %v1421_v62 = vadd.f32 %v4046_v29, %v1380_v22  ;;  %v2136_v38 = vld [vmem:[#allocation8 + $0xc40] sm:$0xff]  ;;  %2071 = vmatpush.msra.mxu0 %v1774_v5  ;;  %2227 = vmatpush.msra.mxu2 %v2149_v18  ;;  %v1578_v61 = vpop.f32.mrf.mxu0 }
 0x35f   : > { %v1654_v60 = vpop.f32.mrf.mxu2  ;;  %2183 = vmatpush.msrb.mxu1 %v2136_v38  ;;  %2033 = vmatpush.msrb.mxu3 %v1755_v48  ;;  %v2144_v4 = vld [vmem:[#allocation8 + $0xc80] sm:$0xff]  ;;  %v2175_v38 = vld [vmem:[#allocation8 + $0xd78] sm:$0xff] }
 0x360   : > { %v4113_v40 = vmax.f32 %v1690_v63, 0.0  ;;  %v1655_v10 = vadd.f32 %v1654_v60, %v1614_v9  ;;  %v1342_v7 = vadd.f32 %v4034_v45, %v1301_v33  ;;  %2072 = vmatpush.msra.mxu0 %v1773_v52  ;;  %v1462_v1 = vadd.f32 %v1461_v14, %v1421_v62  ;;  %2228 = vmatpush.msra.mxu2 %v2148_v28  ;;  %v2133_v9 = vld [vmem:[#allocation8 + $0xc28] sm:$0xff]  ;;  %v1464_v63 = vpop.f32.mrf.mxu3  ;;  %v2131_v14 = vld [vmem:[#allocation8 + $0xc18] sm:$0xff]  ;;  %v1768_v62 = vld [vmem:[#allocation8 + $0xa00] sm:$0xff] }
 0x361   : > { %v4115_v23 = vld [vmem:[#allocation2 + $0x30] sm:$0xff]  ;;  %2184 = vmatpush.msrb.mxu1 %v2135_v21  ;;  %2034 = vmatpush.msrb.mxu3 %v1754_v20  ;;  %v1620_v60 = vadd.f32 %v1619_v51, %v1578_v61  ;;  %v1427_v52 = vadd.f32 %v4054_v8, %v1386_v57  ;;  %v2128_v51 = vld [vmem:[#allocation8 + $0xc00] sm:$0xff] }
 0x362   : > { %v4117_v35 = vld [vmem:[#allocation2 + $0x32] sm:$0xff]  ;;  %1706 = vst [vmem:[#allocation2 + $0x41] sm:$0xff] %v4113_v40  ;;  %v1670_v55 = vadd.f32 %v1655_v10, %v1459_v25  ;;  %1879 = vmatmul.f32.gmra.mxu3 %v4115_v23  ;;  %2005 = vmatmul.f32.gmra.mxu2 %v4115_v23  ;;  %v1383_v56 = vadd.f32 %v4032_v13, %v1342_v7  ;;  %v1752_v10 = vld [vmem:[#allocation8 + $0x980] sm:$0xff] }
 0x363   : > { %1961 = vmatmul.f32.gmra.mxu1 %v4117_v35  ;;  %1923 = vmatmul.f32.gmra.mxu0 %v4113_v40  ;;  %v1753_v13 = vld [vmem:[#allocation8 + $0x988] sm:$0xff]  ;;  %v2172_v2 = vld [vmem:[#allocation8 + $0xd60] sm:$0xff] }
 0x364   : > { %v1683_v34 = vadd.f32 %v4061_v11, %v1670_v55  ;;  %2073 = vmatpush.msra.mxu0 %v1772_v17  ;;  %v1424_v15 = vadd.f32 %v4049_v26, %v1383_v56  ;;  %2229 = vmatpush.msra.mxu2 %v2147_v46  ;;  %v1769_v26 = vld [vmem:[#allocation8 + $0xa08] sm:$0xff] }
 0x365   : > { %2035 = vmatpush.msrb.mxu3 %v1753_v13  ;;  %v2129_v7 = vld [vmem:[#allocation8 + $0xc08] sm:$0xff] }
 0x366   : > { %v1691_v0 = vadd.f32 %v1683_v34, %v3617_v50  ;;  %v2134_v50 = vld [vmem:[#allocation8 + $0xc30] sm:$0xff]  ;;  %2074 = vmatpush.msra.mxu0 %v1771_v42  ;;  %2230 = vmatpush.msra.mxu2 %v2146_v24  ;;  %v1465_v33 = vadd.f32 %v1464_v63, %v1424_v15  ;;  %v1581_v5 = vpop.f32.mrf.mxu0  ;;  %v2171_v15 = vld [vmem:[#allocation8 + $0xd58] sm:$0xff]  ;;  %v2169_v63 = vld [vmem:[#allocation8 + $0xd48] sm:$0xff] }
 0x367   : > { %v1657_v29 = vpop.f32.mrf.mxu2  ;;  %2185 = vmatpush.msrb.mxu1 %v2134_v50  ;;  %2036 = vmatpush.msrb.mxu3 %v1752_v10  ;;  %v2130_v34 = vld [vmem:[#allocation8 + $0xc10] sm:$0xff]  ;;  %v2173_v50 = vld [vmem:[#allocation8 + $0xd68] sm:$0xff]  ;;  %v2164_v10 = vld [vmem:[#allocation8 + $0xd20] sm:$0xff] }
 0x368   : > { %v4131_v30 = vmax.f32 %v1691_v0, 0.0  ;;  %v1658_v41 = vadd.f32 %v1657_v29, %v1617_v54  ;;  %2075 = vmatpush.msra.mxu0 %v1770_v6  ;;  %2231 = vmatpush.msra.mxu2 %v2145_v32  ;;  %v4619_v54 = vld [vmem:[#allocation16_spill] sm:$0xff]  ;;  %v1467_v21 = vpop.f32.mrf.mxu3 }
 0x369   : > { %v4133_v45 = vld [vmem:[#allocation2 + $0x40] sm:$0xff]  ;;  %2186 = vmatpush.msrb.mxu1 %v2133_v9  ;;  %2258 = vmatpush.msra.mxu3 %v2175_v38  ;;  %v1468_v29 = vadd.f32 %v1467_v21, %v1427_v52  ;;  %v2126_v38 = vld [vmem:[#allocation2 + $0x92] sm:$0xff] }
 0x36a   : > { %v4135_v47 = vld [vmem:[#allocation2 + $0x42] sm:$0xff]  ;;  %1707 = vst [vmem:[#allocation2 + $0x51] sm:$0xff] %v4131_v30  ;;  %v1671_v12 = vadd.f32 %v1658_v41, %v1462_v1  ;;  %1882 = vmatmul.f32.gmra.mxu3 %v4133_v45  ;;  %2008 = vmatmul.f32.gmra.mxu2 %v4133_v45 }
 0x36b   : > { %1964 = vmatmul.f32.gmra.mxu1 %v4135_v47  ;;  %1926 = vmatmul.f32.gmra.mxu0 %v4131_v30  ;;  %v2168_v32 = vld [vmem:[#allocation8 + $0xd40] sm:$0xff]  ;;  %v2449_v52 = vld [vmem:[#allocation8 + $0xf78] sm:$0xff] }
 0x36c   : > { %v1684_v27 = vadd.f32 %v4061_v11, %v1671_v12  ;;  %2187 = vmatpush.msrb.mxu1 %v2132_v16  ;;  %2076 = vmatpush.msra.mxu0 %v1769_v26  ;;  %v4621_v12 = vld [vmem:[#allocation17_spill] sm:$0xff]  ;;  %v1719_v16 = vld [vmem:[#allocation2 + $0x1] sm:$0xff] }
 0x36d   : > { %2232 = vmatpush.msra.mxu2 %v2144_v4  ;;  %2259 = vmatpush.msra.mxu3 %v2174_v3  ;;  %v2160_v26 = vld [vmem:[#allocation8 + $0xd00] sm:$0xff]  ;;  %v2118_v4 = vld [vmem:[#allocation2 + $0x91] sm:$0xff] }
 0x36e   : > { %v1692_v25 = vadd.f32 %v1684_v27, %v3626_v58  ;;  %v1622_v58 = vpop.f32.mrf.mxu1  ;;  %2188 = vmatpush.msrb.mxu1 %v2131_v14  ;;  %2077 = vmatpush.msra.mxu0 %v1768_v62  ;;  %v1727_v27 = vld [vmem:[#allocation2 + $0x2] sm:$0xff] }
 0x36f   : > { %v1660_v31 = vpop.f32.mrf.mxu2  ;;  %v1623_v48 = vadd.f32 %v1622_v58, %v1581_v5  ;;  %2260 = vmatpush.msra.mxu3 %v2173_v50 }
 0x370   : > { %v4149_v22 = vmax.f32 %v1692_v25, 0.0  ;;  %v1661_v55 = vadd.f32 %v1660_v31, %v1620_v60  ;;  %2189 = vmatpush.msrb.mxu1 %v2130_v34  ;;  %v2166_v60 = vld [vmem:[#allocation8 + $0xd30] sm:$0xff]  ;;  %v2165_v25 = vld [vmem:[#allocation8 + $0xd28] sm:$0xff]  ;;  %2482 = vmatpush.msrb.mxu0 %v2449_v52 }
 0x371   : > { %v4151_v59 = vld [vmem:[#allocation2 + $0x50] sm:$0xff]  ;;  %2261 = vmatpush.msra.mxu3 %v2172_v2  ;;  %v2376_v2 = vld [vmem:[#allocation8 + $0xdf8] sm:$0xff] }
 0x372   : > { %v4153_v53 = vld [vmem:[#allocation2 + $0x52] sm:$0xff]  ;;  %1708 = vst [vmem:[#allocation2 + $0x61] sm:$0xff] %v4149_v22  ;;  %v1672_v18 = vadd.f32 %v1661_v55, %v1465_v33  ;;  %1885 = vmatmul.f32.gmra.mxu3 %v4151_v59  ;;  %2011 = vmatmul.f32.gmra.mxu2 %v4151_v59 }
 0x373   : > { %1967 = vmatmul.f32.gmra.mxu1 %v4153_v53  ;;  %1929 = vmatmul.f32.gmra.mxu0 %v4149_v22  ;;  %v2459_v52 = vld [vmem:[#allocation8 + $0xfc8] sm:$0xff] }
 0x374   : > { %v1685_v28 = vadd.f32 %v4061_v11, %v1672_v18  ;;  %2190 = vmatpush.msrb.mxu1 %v2129_v7  ;;  %2262 = vmatpush.msra.mxu3 %v2171_v15  ;;  %v2464_v15 = vld [vmem:[#allocation8 + $0xff0] sm:$0xff] }
 0x376   : > { %v1693_v0 = vadd.f32 %v1685_v28, %v4619_v54  ;;  %2191 = vmatpush.msrb.mxu1 %v2128_v51  ;;  %v2448_v28 = vld [vmem:[#allocation8 + $0xf70] sm:$0xff]  ;;  %v2447_v54 = vld [vmem:[#allocation8 + $0xf68] sm:$0xff] }
 0x377   : > { %v1663_v17 = vpop.f32.mrf.mxu2  ;;  %2483 = vmatpush.msrb.mxu0 %v2448_v28 }
 0x378   : > { %v4164_v1 = vmax.f32 %v1693_v0, 0.0  ;;  %v1664_v41 = vadd.f32 %v1663_v17, %v1623_v48  ;;  %v2446_v0 = vld [vmem:[#allocation8 + $0xf60] sm:$0xff] }
 0x379   : > { %v4166_v8 = vld [vmem:[#allocation2 + $0x60] sm:$0xff]  ;;  %2484 = vmatpush.msrb.mxu0 %v2447_v54 }
 0x37a   : > { %4620 = vst [vmem:[#allocation16_spill] sm:$0xff] %v4164_v1  ;;  %v4168_v46 = vld [vmem:[#allocation2 + $0x62] sm:$0xff]  ;;  %v1673_v61 = vadd.f32 %v1664_v41, %v1468_v29  ;;  %1888 = vmatmul.f32.gmra.mxu3 %v4166_v8  ;;  %2014 = vmatmul.f32.gmra.mxu2 %v4166_v8 }
 0x37b   : > { %1709 = vst [vmem:[#allocation2 + $0x71] sm:$0xff] %v4164_v1  ;;  %1970 = vmatmul.f32.gmra.mxu1 %v4168_v46  ;;  %1932 = vmatmul.f32.gmra.mxu0 %v4164_v1  ;;  %v2445_v41 = vld [vmem:[#allocation8 + $0xf58] sm:$0xff]  ;;  %v2478_v54 = vld [vmem:[#allocation8 + $0x1060] sm:$0xff] }
 0x37c   : > { %v1686_v56 = vadd.f32 %v4061_v11, %v1673_v61  ;;  %v2170_v11 = vld [vmem:[#allocation8 + $0xd50] sm:$0xff]  ;;  %2485 = vmatpush.msrb.mxu0 %v2446_v0  ;;  %v2369_v0 = vld [vmem:[#allocation8 + $0xdc0] sm:$0xff] }
 0x37d   : > { %2263 = vmatpush.msra.mxu3 %v2170_v11  ;;  %v2463_v11 = vld [vmem:[#allocation8 + $0xfe8] sm:$0xff] }
 0x37e   : > { %v1694_v20 = vadd.f32 %v1686_v56, %v4621_v12  ;;  %2486 = vmatpush.msrb.mxu0 %v2445_v41  ;;  %v2465_v56 = vld [vmem:[#allocation8 + $0xff8] sm:$0xff]  ;;  %v2443_v12 = vld [vmem:[#allocation8 + $0xf48] sm:$0xff]  ;;  %v2458_v41 = vld [vmem:[#allocation8 + $0xfc0] sm:$0xff] }
 0x37f   : > { %2264 = vmatpush.msra.mxu3 %v2169_v63  ;;  %v4228_v5 = vpop.f32.mrf.mxu2  ;;  %2523 = vmatpush.msra.mxu1 %v2465_v56  ;;  %v2373_v63 = vld [vmem:[#allocation8 + $0xde0] sm:$0xff]  ;;  %v2477_v56 = vld [vmem:[#allocation8 + $0x1058] sm:$0xff] }
 0x380   : > { %v4177_v42 = vmax.f32 %v1694_v20, 0.0  ;;  %v2375_v20 = vld [vmem:[#allocation8 + $0xdf0] sm:$0xff] }
 0x381   : > { %2265 = vmatpush.msra.mxu3 %v2168_v32  ;;  %2524 = vmatpush.msra.mxu1 %v2464_v15  ;;  %v2462_v32 = vld [vmem:[#allocation8 + $0xfe0] sm:$0xff]  ;;  %v2367_v15 = vld [vmem:[#allocation8 + $0xdb0] sm:$0xff] }
 0x382   : > { %4622 = vst [vmem:[#allocation17_spill] sm:$0xff] %v4177_v42  ;;  %v1790_v24 = vld [vmem:[#allocation2 + $0x70] sm:$0xff] }
 0x383   : > { %v4179_v9 = vld [vmem:[#allocation2 + $0x72] sm:$0xff]  ;;  %1710 = vst [vmem:[#allocation2 + $0x81] sm:$0xff] %v4177_v42  ;;  %1891 = vmatmul.f32.gmra.mxu3 %v1790_v24  ;;  %2017 = vmatmul.f32.gmra.mxu2 %v1790_v24 }
 0x384   : > { %1973 = vmatmul.f32.gmra.mxu1 %v4179_v9  ;;  %1935 = vmatmul.f32.gmra.mxu0 %v4177_v42 }
 0x385   : > { %2266 = vmatpush.msra.mxu3 %v2167_v43  ;;  %2525 = vmatpush.msra.mxu1 %v2463_v11  ;;  %v2372_v43 = vld [vmem:[#allocation8 + $0xdd8] sm:$0xff]  ;;  %v2438_v11 = vld [vmem:[#allocation8 + $0xf20] sm:$0xff] }
 0x387   : > { %2267 = vmatpush.msra.mxu3 %v2166_v60  ;;  %2526 = vmatpush.msra.mxu1 %v2462_v32  ;;  %v2461_v60 = vld [vmem:[#allocation8 + $0xfd8] sm:$0xff]  ;;  %v2366_v32 = vld [vmem:[#allocation8 + $0xda8] sm:$0xff] }
 0x389   : > { %2268 = vmatpush.msra.mxu3 %v2165_v25  ;;  %v2441_v25 = vld [vmem:[#allocation8 + $0xf38] sm:$0xff]  ;;  %2527 = vmatpush.msra.mxu1 %v2461_v60  ;;  %v2455_v60 = vld [vmem:[#allocation8 + $0xfa8] sm:$0xff] }
 0x38a   : > { %v1791_v13 = vld [vmem:[#allocation2 + $0x80] sm:$0xff] }
 0x38b   : > { %v4184_v6 = vld [vmem:[#allocation2 + $0x82] sm:$0xff]  ;;  %1894 = vmatmul.f32.gmra.mxu3 %v1791_v13  ;;  %2233 = vmatmul.f32.vlgmr.msra.gmra.mxu2 %v4081_v37 }
 0x38c   : > { %1976 = vmatmul.f32.gmra.mxu1 %v4184_v6  ;;  %2078 = vmatmul.f32.vlgmr.msra.gmra.mxu0 %v1727_v27 }
 0x38d   : > { %2269 = vmatpush.msra.mxu3 %v2164_v10  ;;  %v2480_v10 = vld [vmem:[#allocation8 + $0x1070] sm:$0xff] }
 0x393   : > { %2037 = vmatmul.f32.vlgmr.msrb.gmra.mxu3 %v1719_v16  ;;  %2236 = vmatmul.f32.gmra.mxu2 %v4095_v36  ;;  %v2481_v16 = vld [vmem:[#allocation8 + $0x1078] sm:$0xff] }
 0x394   : > { %2192 = vmatmul.f32.vlgmr.msrb.gmra.mxu1 %v4097_v44  ;;  %2081 = vmatmul.f32.gmra.mxu0 %v4083_v39  ;;  %v2163_v39 = vld [vmem:[#allocation8 + $0xd18] sm:$0xff]  ;;  %v2162_v44 = vld [vmem:[#allocation8 + $0xd10] sm:$0xff] }
 0x395   : > { %2270 = vmatpush.msra.mxu3 %v2163_v39  ;;  %2564 = vmatpush.msrb.mxu2 %v2481_v16  ;;  %v2371_v39 = vld [vmem:[#allocation8 + $0xdd0] sm:$0xff] }
 0x396   : > { %v2456_v16 = vld [vmem:[#allocation8 + $0xfb0] sm:$0xff] }
 0x397   : > { %2271 = vmatpush.msra.mxu3 %v2162_v44  ;;  %2565 = vmatpush.msrb.mxu2 %v2480_v10  ;;  %v2474_v10 = vld [vmem:[#allocation8 + $0x1040] sm:$0xff] }
 0x39b   : > { %2040 = vmatmul.f32.gmra.mxu3 %v4070_v49  ;;  %2239 = vmatmul.f32.gmra.mxu2 %v4113_v40 }
 0x39c   : > { %2195 = vmatmul.f32.gmra.mxu1 %v4115_v23  ;;  %2084 = vmatmul.f32.gmra.mxu0 %v4099_v19  ;;  %v2161_v23 = vld [vmem:[#allocation8 + $0xd08] sm:$0xff] }
 0x39d   : > { %2272 = vmatpush.msra.mxu3 %v2161_v23  ;;  %v2440_v23 = vld [vmem:[#allocation8 + $0xf30] sm:$0xff] }
 0x39f   : > { %2273 = vmatpush.msra.mxu3 %v2160_v26  ;;  %v2479_v26 = vld [vmem:[#allocation8 + $0x1068] sm:$0xff] }
 0x3a0   : > { %2566 = vmatpush.msrb.mxu2 %v2479_v26  ;;  %v2473_v26 = vld [vmem:[#allocation8 + $0x1038] sm:$0xff] }
 0x3a1   : > { %2605 = vmatpush.msrb.mxu3 %v2376_v2 }
 0x3a2   : > { %2567 = vmatpush.msrb.mxu2 %v2478_v54 }
 0x3a3   : > { %2043 = vmatmul.f32.gmra.mxu3 %v4081_v37  ;;  %2242 = vmatmul.f32.gmra.mxu2 %v4131_v30 }
 0x3a4   : > { %2198 = vmatmul.f32.gmra.mxu1 %v4133_v45  ;;  %2087 = vmatmul.f32.gmra.mxu0 %v4117_v35  ;;  %v4213_v45 = vld [vmem:[#allocation2] sm:$0xff] }
 0x3a5   : > { %2606 = vmatpush.msrb.mxu3 %v2375_v20  ;;  %v2457_v20 = vld [vmem:[#allocation8 + $0xfb8] sm:$0xff]  ;;  %2568 = vmatpush.msrb.mxu2 %v2477_v56  ;;  %v2452_v56 = vld [vmem:[#allocation8 + $0xf90] sm:$0xff] }
 0x3ab   : > { %2046 = vmatmul.f32.gmra.mxu3 %v4095_v36  ;;  %2245 = vmatmul.f32.gmra.mxu2 %v4149_v22 }
 0x3ac   : > { %2201 = vmatmul.f32.gmra.mxu1 %v4151_v59  ;;  %2090 = vmatmul.f32.gmra.mxu0 %v4135_v47 }
 0x3b3   : > { %2049 = vmatmul.f32.gmra.mxu3 %v4113_v40  ;;  %2248 = vmatmul.f32.gmra.mxu2 %v4164_v1 }
 0x3b4   : > { %2204 = vmatmul.f32.gmra.mxu1 %v4166_v8  ;;  %2093 = vmatmul.f32.gmra.mxu0 %v4153_v53  ;;  %v2444_v8 = vld [vmem:[#allocation8 + $0xf50] sm:$0xff] }
 0x3b5   : > { %2487 = vmatpush.msrb.mxu0 %v2444_v8 }
 0x3b7   : > { %2488 = vmatpush.msrb.mxu0 %v2443_v12  ;;  %v2368_v12 = vld [vmem:[#allocation8 + $0xdb8] sm:$0xff] }
 0x3bb   : > { %2052 = vmatmul.f32.gmra.mxu3 %v4131_v30  ;;  %2251 = vmatmul.f32.gmra.mxu2 %v4177_v42  ;;  %v2390_v42 = vld [vmem:[#allocation8 + $0xe68] sm:$0xff] }
 0x3bc   : > { %2207 = vmatmul.f32.gmra.mxu1 %v1790_v24  ;;  %2096 = vmatmul.f32.gmra.mxu0 %v4168_v46  ;;  %v2442_v24 = vld [vmem:[#allocation8 + $0xf40] sm:$0xff] }
 0x3bd   : > { %2489 = vmatpush.msrb.mxu0 %v2442_v24  ;;  %v2439_v24 = vld [vmem:[#allocation8 + $0xf28] sm:$0xff] }
 0x3bf   : > { %2490 = vmatpush.msrb.mxu0 %v2441_v25 }
 0x3c1   : > { %2491 = vmatpush.msrb.mxu0 %v2440_v23  ;;  %v2454_v23 = vld [vmem:[#allocation8 + $0xfa0] sm:$0xff] }
 0x3c3   : > { %2055 = vmatmul.f32.gmra.mxu3 %v4149_v22  ;;  %2254 = vmatmul.f32.gmra.mxu2 %v2118_v4  ;;  %v2370_v4 = vld [vmem:[#allocation8 + $0xdc8] sm:$0xff] }
 0x3c4   : > { %2210 = vmatmul.f32.gmra.mxu1 %v1791_v13  ;;  %2099 = vmatmul.f32.gmra.mxu0 %v4179_v9 }
 0x3c5   : > { %2492 = vmatpush.msrb.mxu0 %v2439_v24  ;;  %v2451_v24 = vld [vmem:[#allocation8 + $0xf88] sm:$0xff] }
 0x3c7   : > { %2493 = vmatpush.msrb.mxu0 %v2438_v11  ;;  %v2470_v11 = vld [vmem:[#allocation8 + $0x1020] sm:$0xff] }
 0x3cb   : > { %2058 = vmatmul.f32.gmra.mxu3 %v4164_v1 }
 0x3cc   : > { %2213 = vmatmul.f32.gmra.mxu1 %v4213_v45 }
 0x3d3   : > { %2274 = vmatmul.f32.vlgmr.msra.gmra.mxu3 %v4099_v19  ;;  %v4231_v19 = vpop.f32.mrf.mxu1 }
 0x3d5   : > { %v4217_v31 = vpop.f32.mrf.mxu3 }
 0x3db   : > { %2277 = vmatmul.f32.gmra.mxu3 %v4117_v35  ;;  %v4235_v35 = vpop.f32.mrf.mxu0  ;;  %v4240_v14 = vpop.f32.mrf.mxu1 }
 0x3dd   : > { %v4220_v33 = vpop.f32.mrf.mxu3 }
 0x3e3   : > { %2280 = vmatmul.f32.gmra.mxu3 %v4135_v47  ;;  %v4238_v47 = vpop.f32.mrf.mxu2  ;;  %v4251_v34 = vpop.f32.mrf.mxu1 }
 0x3e5   : > { %v4223_v55 = vpop.f32.mrf.mxu3 }
 0x3eb   : > { %2283 = vmatmul.f32.gmra.mxu3 %v4153_v53  ;;  %v4244_v53 = vpop.f32.mrf.mxu0  ;;  %v4249_v62 = vpop.f32.mrf.mxu2 }
 0x3ec   : > { %v4259_v21 = vpop.f32.mrf.mxu1 }
 0x3ed   : > { %v4226_v59 = vpop.f32.mrf.mxu3 }
 0x3f3   : > { %2286 = vmatmul.f32.gmra.mxu3 %v4168_v46  ;;  %v4253_v48 = vpop.f32.mrf.mxu0  ;;  %v4257_v7 = vpop.f32.mrf.mxu2 }
 0x3f4   : > { %v4267_v51 = vpop.f32.mrf.mxu1 }
 0x3f5   : > { %v4233_v58 = vpop.f32.mrf.mxu3 }
 0x3fb   : > { %2289 = vmatmul.f32.gmra.mxu3 %v4179_v9  ;;  %v4261_v17 = vpop.f32.mrf.mxu0  ;;  %v4265_v46 = vpop.f32.mrf.mxu2  ;;  %v2374_v9 = vld [vmem:[#allocation8 + $0xde8] sm:$0xff] }
 0x3fc   : > { %2607 = vmatpush.msrb.mxu3 %v2374_v9  ;;  %v4275_v13 = vpop.f32.mrf.mxu1  ;;  %v2476_v9 = vld [vmem:[#allocation8 + $0x1050] sm:$0xff] }
 0x3fd   : > { %v4242_v57 = vpop.f32.mrf.mxu3  ;;  %2569 = vmatpush.msrb.mxu2 %v2476_v9 }
 0x3fe   : > { %2608 = vmatpush.msrb.mxu3 %v2373_v63  ;;  %v2475_v63 = vld [vmem:[#allocation8 + $0x1048] sm:$0xff] }
 0x3ff   : > { %2570 = vmatpush.msrb.mxu2 %v2475_v63  ;;  %v2361_v63 = vld [vmem:[#allocation8 + $0xd80] sm:$0xff] }
 0x400   : > { %2609 = vmatpush.msrb.mxu3 %v2372_v43 }
 0x401   : > { %2571 = vmatpush.msrb.mxu2 %v2474_v10  ;;  %v2469_v10 = vld [vmem:[#allocation8 + $0x1018] sm:$0xff] }
 0x402   : > { %2610 = vmatpush.msrb.mxu3 %v2371_v39  ;;  %v2365_v39 = vld [vmem:[#allocation8 + $0xda0] sm:$0xff] }
 0x403   : > { %2292 = vmatmul.f32.gmra.mxu3 %v4184_v6  ;;  %v4271_v50 = vpop.f32.mrf.mxu0  ;;  %v4273_v27 = vpop.f32.mrf.mxu2  ;;  %2572 = vmatpush.msrb.mxu2 %v2473_v26 }
 0x404   : > { %2611 = vmatpush.msrb.mxu3 %v2370_v4  ;;  %v4285_v2 = vpop.f32.mrf.mxu1  ;;  %v2364_v4 = vld [vmem:[#allocation8 + $0xd98] sm:$0xff] }
 0x406   : > { %v4247_v18 = vpop.f32.mrf.mxu3  ;;  %2612 = vmatpush.msrb.mxu3 %v2369_v0  ;;  %v2472_v0 = vld [vmem:[#allocation8 + $0x1030] sm:$0xff] }
 0x407   : > { %2573 = vmatpush.msrb.mxu2 %v2472_v0 }
 0x408   : > { %2613 = vmatpush.msrb.mxu3 %v2368_v12  ;;  %v2471_v12 = vld [vmem:[#allocation8 + $0x1028] sm:$0xff] }
 0x409   : > { %2574 = vmatpush.msrb.mxu2 %v2471_v12 }
 0x40a   : > { %2614 = vmatpush.msrb.mxu3 %v2367_v15 }
 0x40b   : > { %2295 = vmatmul.f32.gmra.mxu3 %v2126_v38  ;;  %v4279_v44 = vpop.f32.mrf.mxu0  ;;  %v2460_v38 = vld [vmem:[#allocation8 + $0xfd0] sm:$0xff]  ;;  %v4283_v8 = vpop.f32.mrf.mxu2  ;;  %2575 = vmatpush.msrb.mxu2 %v2470_v11 }
 0x40c   : > { %2528 = vmatpush.msra.mxu1 %v2460_v38  ;;  %2615 = vmatpush.msrb.mxu3 %v2366_v32  ;;  %v2453_v38 = vld [vmem:[#allocation8 + $0xf98] sm:$0xff]  ;;  %v4293_v54 = vpop.f32.mrf.mxu1  ;;  %v2450_v32 = vld [vmem:[#allocation8 + $0xf80] sm:$0xff] }
 0x40d   : > { %2576 = vmatpush.msrb.mxu2 %v2469_v10 }
 0x40e   : > { %v4255_v3 = vpop.f32.mrf.mxu3  ;;  %2529 = vmatpush.msra.mxu1 %v2459_v52  ;;  %2616 = vmatpush.msrb.mxu3 %v2365_v39  ;;  %v2468_v39 = vld [vmem:[#allocation8 + $0x1010] sm:$0xff] }
 0x40f   : > { %2577 = vmatpush.msrb.mxu2 %v2468_v39 }
 0x410   : > { %2530 = vmatpush.msra.mxu1 %v2458_v41  ;;  %2617 = vmatpush.msrb.mxu3 %v2364_v4  ;;  %v2363_v41 = vld [vmem:[#allocation8 + $0xd90] sm:$0xff]  ;;  %v2435_v4 = vld [vmem:[#allocation8 + $0xf08] sm:$0xff] }
 0x412   : > { %2531 = vmatpush.msra.mxu1 %v2457_v20  ;;  %2618 = vmatpush.msrb.mxu3 %v2363_v41  ;;  %v2362_v20 = vld [vmem:[#allocation8 + $0xd88] sm:$0xff]  ;;  %v2434_v41 = vld [vmem:[#allocation8 + $0xf00] sm:$0xff] }
 0x413   : > { %v4287_v43 = vpop.f32.mrf.mxu0  ;;  %v4291_v52 = vpop.f32.mrf.mxu2 }
 0x414   : > { %2532 = vmatpush.msra.mxu1 %v2456_v16  ;;  %2619 = vmatpush.msrb.mxu3 %v2362_v20  ;;  %v2437_v16 = vld [vmem:[#allocation8 + $0xf18] sm:$0xff]  ;;  %v2193_v26 = vpop.f32.mrf.mxu1 }
 0x415   : > { %2494 = vmatpush.msrb.mxu0 %v2437_v16  ;;  %v2391_v16 = vld [vmem:[#allocation8 + $0xe70] sm:$0xff] }
 0x416   : > { %v4263_v29 = vpop.f32.mrf.mxu3  ;;  %2533 = vmatpush.msra.mxu1 %v2455_v60  ;;  %v2436_v60 = vld [vmem:[#allocation8 + $0xf10] sm:$0xff]  ;;  %2620 = vmatpush.msrb.mxu3 %v2361_v63 }
 0x417   : > { %2621 = vmatmul.f32.vlgmr.msrb.gmra.mxu3 %v4213_v45  ;;  %2495 = vmatpush.msrb.mxu0 %v2436_v60  ;;  %v1916_v45 = vadd.f32 %v4235_v35, %v4217_v31  ;;  %v1919_v60 = vadd.f32 %v4244_v53, %v4220_v33  ;;  %v1922_v33 = vadd.f32 %v4253_v48, %v4223_v55  ;;  %v2388_v55 = vld [vmem:[#allocation8 + $0xe58] sm:$0xff] }
 0x418   : > { %2534 = vmatpush.msra.mxu1 %v2454_v23  ;;  %v2784_v48 = vld [vmem:[#allocation8 + $0x1178] sm:$0xff] }
 0x419   : > { %2496 = vmatpush.msrb.mxu0 %v2435_v4  ;;  %v1957_v20 = vadd.f32 %v4231_v19, %v1916_v45  ;;  %v1960_v31 = vadd.f32 %v4240_v14, %v1919_v60  ;;  %v4312_v45 = vld [vmem:[#allocation9 + $0x2] ss:$0 sm:$0xff]  ;;  %2842 = vmatpush.msra.mxu3 %v2784_v48 }
 0x41a   : > { %2535 = vmatpush.msra.mxu1 %v2453_v38  ;;  %v2467_v38 = vld [vmem:[#allocation8 + $0x1008] sm:$0xff] }
 0x41b   : > { %v4295_v9 = vpop.f32.mrf.mxu0  ;;  %v2234_v23 = vpop.f32.mrf.mxu2  ;;  %2578 = vmatpush.msrb.mxu2 %v2467_v38  ;;  %2497 = vmatpush.msrb.mxu0 %v2434_v41  ;;  %v1998_v10 = vadd.f32 %v4228_v5, %v1957_v20  ;;  %v2001_v5 = vadd.f32 %v4238_v47, %v1960_v31  ;;  %v2387_v47 = vld [vmem:[#allocation8 + $0xe50] sm:$0xff] }
 0x41c   : > { %2536 = vmatpush.msra.mxu1 %v2452_v56  ;;  %v2466_v56 = vld [vmem:[#allocation8 + $0x1000] sm:$0xff]  ;;  %v2196_v11 = vpop.f32.mrf.mxu1  ;;  %v2235_v35 = vadd.f32 %v2234_v23, %v2193_v26  ;;  %v1963_v26 = vadd.f32 %v4251_v34, %v1922_v33  ;;  %v2407_v31 = vld [vmem:[#allocation8 + $0xef0] sm:$0xff] }
 0x41d   : > { %2579 = vmatpush.msrb.mxu2 %v2466_v56  ;;  %v2039_v4 = vadd.f32 %v4263_v29, %v1998_v10  ;;  %v1925_v10 = vadd.f32 %v4261_v17, %v4226_v59 }
 0x41e   : > { %v4269_v61 = vpop.f32.mrf.mxu3  ;;  %2537 = vmatpush.msra.mxu1 %v2451_v24  ;;  %v2004_v34 = vadd.f32 %v4249_v62, %v1963_v26  ;;  %v2386_v26 = vld [vmem:[#allocation8 + $0xe48] sm:$0xff] }
 0x41f   : > { %v2042_v14 = vadd.f32 %v4269_v61, %v2001_v5  ;;  %v2408_v61 = vld [vmem:[#allocation8 + $0xef8] sm:$0xff]  ;;  %v1966_v59 = vadd.f32 %v4259_v21, %v1925_v10  ;;  %v2405_v21 = vld [vmem:[#allocation8 + $0xee0] sm:$0xff] }
 0x420   : > { %2538 = vmatpush.msra.mxu1 %v2450_v32  ;;  %v2392_v32 = vld [vmem:[#allocation8 + $0xe78] sm:$0xff] }
 0x421   : > { %2646 = vmatpush.msra.mxu0 %v2392_v32  ;;  %v2389_v32 = vld [vmem:[#allocation8 + $0xe60] sm:$0xff] }
 0x422   : > { %2687 = vmatpush.msrb.mxu1 %v2408_v61 }
 0x423   : > { %v2079_v12 = vpop.f32.mrf.mxu0  ;;  %v2237_v24 = vpop.f32.mrf.mxu2  ;;  %2647 = vmatpush.msra.mxu0 %v2391_v16 }
 0x424   : > { %v2080_v38 = vadd.f32 %v2079_v12, %v2039_v4  ;;  %v2199_v1 = vpop.f32.mrf.mxu1  ;;  %v2238_v12 = vadd.f32 %v2237_v24, %v2196_v11  ;;  %v2783_v4 = vld [vmem:[#allocation8 + $0x1170] sm:$0xff]  ;;  %2688 = vmatpush.msrb.mxu1 %v2407_v31 }
 0x425   : > { %2648 = vmatpush.msra.mxu0 %v2390_v42  ;;  %2843 = vmatpush.msra.mxu3 %v2783_v4 }
 0x426   : > { %v4277_v6 = vpop.f32.mrf.mxu3 }
 0x427   : > { %2649 = vmatpush.msra.mxu0 %v2389_v32 }
 0x429   : > { %2650 = vmatpush.msra.mxu0 %v2388_v55  ;;  %v2767_v55 = vld [vmem:[#allocation8 + $0x10f0] sm:$0xff] }
 0x42b   : > { %v2082_v39 = vpop.f32.mrf.mxu0  ;;  %v2240_v41 = vpop.f32.mrf.mxu2  ;;  %2651 = vmatpush.msra.mxu0 %v2387_v47  ;;  %v2779_v47 = vld [vmem:[#allocation8 + $0x1150] sm:$0xff] }
 0x42c   : > { %v2083_v60 = vadd.f32 %v2082_v39, %v2042_v14  ;;  %v2202_v39 = vpop.f32.mrf.mxu1  ;;  %v2241_v17 = vadd.f32 %v2240_v41, %v2199_v1  ;;  %v2781_v14 = vld [vmem:[#allocation8 + $0x1160] sm:$0xff]  ;;  %v2768_v41 = vld [vmem:[#allocation8 + $0x10f8] sm:$0xff] }
 0x42d   : > { %v2385_v1 = vld [vmem:[#allocation8 + $0xe40] sm:$0xff]  ;;  %2652 = vmatpush.msra.mxu0 %v2386_v26  ;;  %2801 = vmatpush.msra.mxu2 %v2768_v41  ;;  %v2776_v26 = vld [vmem:[#allocation8 + $0x1138] sm:$0xff]  ;;  %v2763_v41 = vld [vmem:[#allocation8 + $0x10d0] sm:$0xff] }
 0x42e   : > { %v4281_v28 = vpop.f32.mrf.mxu3 }
 0x42f   : > { %2653 = vmatpush.msra.mxu0 %v2385_v1  ;;  %2802 = vmatpush.msra.mxu2 %v2767_v55  ;;  %v2775_v55 = vld [vmem:[#allocation8 + $0x1130] sm:$0xff] }
 0x433   : > { %v2085_v23 = vpop.f32.mrf.mxu0  ;;  %v2243_v24 = vpop.f32.mrf.mxu2 }
 0x436   : > { %v4289_v25 = vpop.f32.mrf.mxu3 }
 0x43b   : > { %v2088_v32 = vpop.f32.mrf.mxu0  ;;  %v2246_v61 = vpop.f32.mrf.mxu2 }
 0x43e   : > { %v4297_v15 = vpop.f32.mrf.mxu3 }
 0x446   : > { %v4300_v0 = vpop.f32.mrf.mxu3 }
 0x44e   : > { %v4305_v63 = vpop.f32.mrf.mxu3 }
 0x456   : > { %v2275_v19 = vpop.f32.mrf.mxu3 }
 0x457   : > { %v2276_v56 = vadd.f32 %v2275_v19, %v2235_v35  ;;  %v2045_v35 = vadd.f32 %v4277_v6, %v2004_v34  ;;  %v2403_v34 = vld [vmem:[#allocation8 + $0xed0] sm:$0xff] }
 0x459   : > { %v2299_v53 = vadd.f32 %v2276_v56, %v2080_v38  ;;  %v2782_v38 = vld [vmem:[#allocation8 + $0x1168] sm:$0xff]  ;;  %v2086_v6 = vadd.f32 %v2085_v23, %v2045_v35 }
 0x45a   : > { %v2406_v56 = vld [vmem:[#allocation8 + $0xee8] sm:$0xff]  ;;  %2844 = vmatpush.msra.mxu3 %v2782_v38 }
 0x45b   : > { %v2312_v29 = vadd.f32 %v4312_v45, %v2299_v53  ;;  %2689 = vmatpush.msrb.mxu1 %v2406_v56 }
 0x45c   : > { %2845 = vmatpush.msra.mxu3 %v2781_v14 }
 0x45d   : > { %v4320_v20 = vmax.f32 %v2312_v29, 0.0  ;;  %2690 = vmatpush.msrb.mxu1 %v2405_v21 }
 0x45e   : > { %v2278_v16 = vpop.f32.mrf.mxu3 }
 0x45f   : > { %2328 = vst [vmem:[#allocation2 + $0x11] sm:$0xff] %v4320_v20  ;;  %v2279_v42 = vadd.f32 %v2278_v16, %v2238_v12  ;;  %2539 = vmatmul.f32.vlgmr.msra.gmra.mxu1 %v4320_v20  ;;  %v2780_v12 = vld [vmem:[#allocation8 + $0x1158] sm:$0xff]  ;;  %v1928_v16 = vadd.f32 %v4271_v50, %v4233_v58  ;;  %v2766_v58 = vld [vmem:[#allocation8 + $0x10e8] sm:$0xff]  ;;  %v2244_v50 = vadd.f32 %v2243_v24, %v2202_v39  ;;  %v2765_v24 = vld [vmem:[#allocation8 + $0x10e0] sm:$0xff] }
 0x460   : > { %2846 = vmatpush.msra.mxu3 %v2780_v12  ;;  %2803 = vmatpush.msra.mxu2 %v2766_v58  ;;  %v2402_v39 = vld [vmem:[#allocation8 + $0xec8] sm:$0xff]  ;;  %v2400_v12 = vld [vmem:[#allocation8 + $0xeb8] sm:$0xff]  ;;  %v1934_v58 = vadd.f32 %v4287_v43, %v4247_v18  ;;  %v2397_v18 = vld [vmem:[#allocation8 + $0xea0] sm:$0xff] }
 0x461   : > { %v2300_v11 = vadd.f32 %v2279_v42, %v2083_v60  ;;  %v2007_v60 = vadd.f32 %v4257_v7, %v1966_v59  ;;  %v2404_v42 = vld [vmem:[#allocation8 + $0xed8] sm:$0xff]  ;;  %v1969_v7 = vadd.f32 %v4267_v51, %v1928_v16  ;;  %v2091_v59 = vpop.f32.mrf.mxu0 }
 0x462   : > { %2691 = vmatpush.msrb.mxu1 %v2404_v42  ;;  %2847 = vmatpush.msra.mxu3 %v2779_v47  ;;  %v2384_v51 = vld [vmem:[#allocation8 + $0xe38] sm:$0xff] }
 0x463   : > { %v2313_v19 = vadd.f32 %v4312_v45, %v2300_v11  ;;  %v2048_v48 = vadd.f32 %v4281_v28, %v2007_v60  ;;  %v2205_v11 = vpop.f32.mrf.mxu1  ;;  %2654 = vmatpush.msra.mxu0 %v2384_v51  ;;  %2804 = vmatpush.msra.mxu2 %v2765_v24  ;;  %v2380_v51 = vld [vmem:[#allocation8 + $0xe18] sm:$0xff] }
 0x464   : > { %2692 = vmatpush.msrb.mxu1 %v2403_v34  ;;  %v2381_v34 = vld [vmem:[#allocation8 + $0xe20] sm:$0xff] }
 0x465   : > { %v4330_v62 = vmax.f32 %v2313_v19, 0.0  ;;  %v2778_v19 = vld [vmem:[#allocation8 + $0x1148] sm:$0xff]  ;;  %v2089_v38 = vadd.f32 %v2088_v32, %v2048_v48  ;;  %v1931_v32 = vadd.f32 %v4279_v44, %v4242_v57  ;;  %v2249_v44 = vpop.f32.mrf.mxu2 }
 0x466   : > { %v2281_v33 = vpop.f32.mrf.mxu3  ;;  %v2409_v5 = vld [vmem:[#allocation2 + $0x10] sm:$0xff]  ;;  %2848 = vmatpush.msra.mxu3 %v2778_v19  ;;  %2693 = vmatpush.msrb.mxu1 %v2402_v39 }
 0x467   : > { %v4332_v53 = vld [vmem:[#allocation2 + $0x12] sm:$0xff]  ;;  %2329 = vst [vmem:[#allocation2 + $0x21] sm:$0xff] %v4330_v62  ;;  %v2282_v29 = vadd.f32 %v2281_v33, %v2241_v17  ;;  %2498 = vmatmul.f32.vlgmr.msrb.gmra.mxu0 %v2409_v5  ;;  %2624 = vmatmul.f32.gmra.mxu3 %v2409_v5  ;;  %v2777_v33 = vld [vmem:[#allocation8 + $0x1140] sm:$0xff]  ;;  %v2010_v5 = vadd.f32 %v4265_v46, %v1969_v7 }
 0x468   : > { %2580 = vmatmul.f32.vlgmr.msrb.gmra.mxu2 %v4332_v53  ;;  %2542 = vmatmul.f32.gmra.mxu1 %v4330_v62  ;;  %v2383_v17 = vld [vmem:[#allocation8 + $0xe30] sm:$0xff]  ;;  %v1972_v57 = vadd.f32 %v4275_v13, %v1931_v32  ;;  %v2247_v46 = vadd.f32 %v2246_v61, %v2205_v11  ;;  %v2382_v13 = vld [vmem:[#allocation8 + $0xe28] sm:$0xff] }
 0x469   : > { %v2301_v23 = vadd.f32 %v2282_v29, %v2086_v6  ;;  %v2764_v6 = vld [vmem:[#allocation8 + $0x10d8] sm:$0xff]  ;;  %v2401_v29 = vld [vmem:[#allocation8 + $0xec0] sm:$0xff]  ;;  %v2051_v21 = vadd.f32 %v4289_v25, %v2010_v5  ;;  %2655 = vmatpush.msra.mxu0 %v2383_v17  ;;  %2849 = vmatpush.msra.mxu3 %v2777_v33  ;;  %v2762_v61 = vld [vmem:[#allocation8 + $0x10c8] sm:$0xff] }
 0x46a   : > { %2805 = vmatpush.msra.mxu2 %v2764_v6  ;;  %2694 = vmatpush.msrb.mxu1 %v2401_v29  ;;  %v2774_v11 = vld [vmem:[#allocation8 + $0x1128] sm:$0xff]  ;;  %v2013_v7 = vadd.f32 %v4273_v27, %v1972_v57  ;;  %v1975_v27 = vadd.f32 %v4285_v2, %v1934_v58  ;;  %v2772_v33 = vld [vmem:[#allocation8 + $0x1118] sm:$0xff]  ;;  %v2379_v2 = vld [vmem:[#allocation8 + $0xe10] sm:$0xff]  ;;  %v1937_v57 = vadd.f32 %v4295_v9, %v4255_v3 }
 0x46b   : > { %v2314_v10 = vadd.f32 %v4312_v45, %v2301_v23  ;;  %2850 = vmatpush.msra.mxu3 %v2776_v26  ;;  %v2208_v60 = vpop.f32.mrf.mxu1  ;;  %v2092_v47 = vadd.f32 %v2091_v59, %v2051_v21  ;;  %2656 = vmatpush.msra.mxu0 %v2382_v13  ;;  %v2398_v19 = vld [vmem:[#allocation8 + $0xea8] sm:$0xff]  ;;  %v2760_v59 = vld [vmem:[#allocation8 + $0x10b8] sm:$0xff] }
 0x46c   : > { %2806 = vmatpush.msra.mxu2 %v2763_v41  ;;  %2695 = vmatpush.msrb.mxu1 %v2400_v12  ;;  %v2054_v24 = vadd.f32 %v4297_v15, %v2013_v7  ;;  %v2250_v43 = vadd.f32 %v2249_v44, %v2208_v60  ;;  %v2396_v26 = vld [vmem:[#allocation8 + $0xe98] sm:$0xff]  ;;  %v2771_v41 = vld [vmem:[#allocation8 + $0x1110] sm:$0xff]  ;;  %v2758_v12 = vld [vmem:[#allocation8 + $0x10a8] sm:$0xff] }
 0x46d   : > { %v4343_v4 = vmax.f32 %v2314_v10, 0.0  ;;  %v2399_v10 = vld [vmem:[#allocation8 + $0xeb0] sm:$0xff]  ;;  %2851 = vmatpush.msra.mxu3 %v2775_v55  ;;  %2657 = vmatpush.msra.mxu0 %v2381_v34  ;;  %v2252_v21 = vpop.f32.mrf.mxu2  ;;  %v2378_v60 = vld [vmem:[#allocation8 + $0xe08] sm:$0xff] }
 0x46e   : > { %v2284_v31 = vpop.f32.mrf.mxu3  ;;  %v4345_v35 = vld [vmem:[#allocation2 + $0x20] sm:$0xff]  ;;  %2807 = vmatpush.msra.mxu2 %v2762_v61  ;;  %2696 = vmatpush.msrb.mxu1 %v2399_v10  ;;  %v2770_v55 = vld [vmem:[#allocation8 + $0x1108] sm:$0xff] }
 0x46f   : > { %v4347_v28 = vld [vmem:[#allocation2 + $0x22] sm:$0xff]  ;;  %2330 = vst [vmem:[#allocation2 + $0x31] sm:$0xff] %v4343_v4  ;;  %v2285_v56 = vadd.f32 %v2284_v31, %v2244_v50  ;;  %2501 = vmatmul.f32.gmra.mxu0 %v4345_v35  ;;  %2627 = vmatmul.f32.gmra.mxu3 %v4345_v35  ;;  %v2394_v10 = vld [vmem:[#allocation8 + $0xe88] sm:$0xff] }
 0x470   : > { %2583 = vmatmul.f32.gmra.mxu2 %v4347_v28  ;;  %2545 = vmatmul.f32.gmra.mxu1 %v4343_v4  ;;  %v2761_v31 = vld [vmem:[#allocation8 + $0x10c0] sm:$0xff] }
 0x471   : > { %v2302_v14 = vadd.f32 %v2285_v56, %v2089_v38  ;;  %v2094_v38 = vpop.f32.mrf.mxu0  ;;  %v2773_v56 = vld [vmem:[#allocation8 + $0x1120] sm:$0xff]  ;;  %2852 = vmatpush.msra.mxu3 %v2774_v11  ;;  %2808 = vmatpush.msra.mxu2 %v2761_v31 }
 0x472   : > { %2697 = vmatpush.msrb.mxu1 %v2398_v19  ;;  %2658 = vmatpush.msra.mxu0 %v2380_v51  ;;  %v2095_v6 = vadd.f32 %v2094_v38, %v2054_v24  ;;  %v2377_v61 = vld [vmem:[#allocation8 + $0xe00] sm:$0xff]  ;;  %v2755_v51 = vld [vmem:[#allocation8 + $0x1090] sm:$0xff]  ;;  %v2800_v24 = vld [vmem:[#allocation8 + $0x11f8] sm:$0xff] }
 0x473   : > { %v2315_v1 = vadd.f32 %v4312_v45, %v2302_v14  ;;  %2853 = vmatpush.msra.mxu3 %v2773_v56  ;;  %2809 = vmatpush.msra.mxu2 %v2760_v59  ;;  %v2759_v14 = vld [vmem:[#allocation8 + $0x10b0] sm:$0xff]  ;;  %v2769_v11 = vld [vmem:[#allocation8 + $0x1100] sm:$0xff] }
 0x474   : > { %2698 = vmatpush.msrb.mxu1 %v2397_v18  ;;  %2659 = vmatpush.msra.mxu0 %v2379_v2  ;;  %v2799_v18 = vld [vmem:[#allocation8 + $0x11f0] sm:$0xff] }
 0x475   : > { %v4360_v16 = vmax.f32 %v2315_v1, 0.0  ;;  %v2211_v1 = vpop.f32.mrf.mxu1  ;;  %2854 = vmatpush.msra.mxu3 %v2772_v33  ;;  %2810 = vmatpush.msra.mxu2 %v2759_v14  ;;  %v2255_v56 = vpop.f32.mrf.mxu2 }
 0x476   : > { %v2287_v23 = vpop.f32.mrf.mxu3  ;;  %v4362_v42 = vld [vmem:[#allocation2 + $0x30] sm:$0xff]  ;;  %2699 = vmatpush.msrb.mxu1 %v2396_v26  ;;  %2660 = vmatpush.msra.mxu0 %v2378_v60  ;;  %v2253_v9 = vadd.f32 %v2252_v21, %v2211_v1  ;;  %v2753_v26 = vld [vmem:[#allocation8 + $0x1080] sm:$0xff] }
 0x477   : > { %v4364_v25 = vld [vmem:[#allocation2 + $0x32] sm:$0xff]  ;;  %2331 = vst [vmem:[#allocation2 + $0x41] sm:$0xff] %v4360_v16  ;;  %v2288_v48 = vadd.f32 %v2287_v23, %v2247_v46  ;;  %2504 = vmatmul.f32.gmra.mxu0 %v4362_v42  ;;  %2630 = vmatmul.f32.gmra.mxu3 %v4362_v42  ;;  %v2016_v46 = vadd.f32 %v4283_v8, %v1975_v27 }
 0x478   : > { %2586 = vmatmul.f32.gmra.mxu2 %v4364_v25  ;;  %2548 = vmatmul.f32.gmra.mxu1 %v4360_v16  ;;  %v2395_v23 = vld [vmem:[#allocation8 + $0xe90] sm:$0xff]  ;;  %v1978_v8 = vadd.f32 %v4293_v54, %v1937_v57  ;;  %v2393_v54 = vld [vmem:[#allocation8 + $0xe80] sm:$0xff]  ;;  %v2754_v27 = vld [vmem:[#allocation8 + $0x1088] sm:$0xff] }
 0x479   : > { %v2303_v50 = vadd.f32 %v2288_v48, %v2092_v47  ;;  %v2757_v47 = vld [vmem:[#allocation8 + $0x10a0] sm:$0xff]  ;;  %v2057_v48 = vadd.f32 %v4300_v0, %v2016_v46  ;;  %2855 = vmatpush.msra.mxu3 %v2771_v41  ;;  %2811 = vmatpush.msra.mxu2 %v2758_v12  ;;  %v2097_v3 = vpop.f32.mrf.mxu0 }
 0x47a   : > { %2700 = vmatpush.msrb.mxu1 %v2395_v23  ;;  %2661 = vmatpush.msra.mxu0 %v2377_v61  ;;  %v2797_v41 = vld [vmem:[#allocation8 + $0x11e0] sm:$0xff]  ;;  %v2796_v23 = vld [vmem:[#allocation8 + $0x11d8] sm:$0xff] }
 0x47b   : > { %v2316_v39 = vadd.f32 %v4312_v45, %v2303_v50  ;;  %2856 = vmatpush.msra.mxu3 %v2770_v55  ;;  %2812 = vmatpush.msra.mxu2 %v2757_v47  ;;  %v2756_v50 = vld [vmem:[#allocation8 + $0x1098] sm:$0xff]  ;;  %v2098_v31 = vadd.f32 %v2097_v3, %v2057_v48  ;;  %v2795_v55 = vld [vmem:[#allocation8 + $0x11d0] sm:$0xff]  ;;  %v2793_v61 = vld [vmem:[#allocation8 + $0x11c0] sm:$0xff] }
 0x47c   : > { %2701 = vmatpush.msrb.mxu1 %v2394_v10  ;;  %2883 = vmatpush.msrb.mxu0 %v2800_v24  ;;  %v2352_v47 = vld [vmem:[#allocation2 + $0x2] sm:$0xff]  ;;  %v2751_v24 = vld [vmem:[#allocation2 + $0x92] sm:$0xff] }
 0x47d   : > { %v4377_v17 = vmax.f32 %v2316_v39, 0.0  ;;  %v2214_v38 = vpop.f32.mrf.mxu1  ;;  %v2019_v39 = vadd.f32 %v4291_v52, %v1978_v8  ;;  %2857 = vmatpush.msra.mxu3 %v2769_v11  ;;  %2813 = vmatpush.msra.mxu2 %v2756_v50  ;;  %v2344_v10 = vld [vmem:[#allocation2 + $0x1] sm:$0xff]  ;;  %v2791_v8 = vld [vmem:[#allocation8 + $0x11b0] sm:$0xff] }
 0x47e   : > { %v2290_v32 = vpop.f32.mrf.mxu3  ;;  %v4379_v5 = vld [vmem:[#allocation2 + $0x40] sm:$0xff]  ;;  %2702 = vmatpush.msrb.mxu1 %v2393_v54  ;;  %2884 = vmatpush.msrb.mxu0 %v2799_v18 }
 0x47f   : > { %v4381_v15 = vld [vmem:[#allocation2 + $0x42] sm:$0xff]  ;;  %2332 = vst [vmem:[#allocation2 + $0x51] sm:$0xff] %v4377_v17  ;;  %v2291_v29 = vadd.f32 %v2290_v32, %v2250_v43  ;;  %2507 = vmatmul.f32.gmra.mxu0 %v4379_v5  ;;  %2633 = vmatmul.f32.gmra.mxu3 %v4379_v5  ;;  %v2060_v43 = vadd.f32 %v4305_v63, %v2019_v39  ;;  %v2798_v63 = vld [vmem:[#allocation8 + $0x11e8] sm:$0xff] }
 0x480   : > { %2589 = vmatmul.f32.gmra.mxu2 %v4381_v15  ;;  %2551 = vmatmul.f32.gmra.mxu1 %v4377_v17  ;;  %v2256_v32 = vadd.f32 %v2255_v56, %v2214_v38  ;;  %v2792_v3 = vld [vmem:[#allocation8 + $0x11b8] sm:$0xff]  ;;  %v2789_v11 = vld [vmem:[#allocation8 + $0x11a0] sm:$0xff] }
 0x481   : > { %v2304_v44 = vadd.f32 %v2291_v29, %v2095_v6  ;;  %2814 = vmatpush.msra.mxu2 %v2755_v51  ;;  %v2100_v6 = vpop.f32.mrf.mxu0  ;;  %2885 = vmatpush.msrb.mxu0 %v2798_v63 }
 0x482   : > { %v2101_v21 = vadd.f32 %v2100_v6, %v2060_v43 }
 0x483   : > { %v2317_v13 = vadd.f32 %v4312_v45, %v2304_v44  ;;  %2815 = vmatpush.msra.mxu2 %v2754_v27  ;;  %2886 = vmatpush.msrb.mxu0 %v2797_v41 }
 0x485   : > { %v4394_v34 = vmax.f32 %v2317_v13, 0.0  ;;  %2816 = vmatpush.msra.mxu2 %v2753_v26  ;;  %2887 = vmatpush.msrb.mxu0 %v2796_v23 }
 0x486   : > { %v2293_v58 = vpop.f32.mrf.mxu3  ;;  %v4396_v7 = vld [vmem:[#allocation2 + $0x50] sm:$0xff] }
 0x487   : > { %v4398_v0 = vld [vmem:[#allocation2 + $0x52] sm:$0xff]  ;;  %2333 = vst [vmem:[#allocation2 + $0x61] sm:$0xff] %v4394_v34  ;;  %v2294_v19 = vadd.f32 %v2293_v58, %v2253_v9  ;;  %2510 = vmatmul.f32.gmra.mxu0 %v4396_v7  ;;  %2636 = vmatmul.f32.gmra.mxu3 %v4396_v7 }
 0x488   : > { %2592 = vmatmul.f32.gmra.mxu2 %v4398_v0  ;;  %2554 = vmatmul.f32.gmra.mxu1 %v4394_v34  ;;  %v2790_v9 = vld [vmem:[#allocation8 + $0x11a8] sm:$0xff] }
 0x489   : > { %v2305_v59 = vadd.f32 %v2294_v19, %v2098_v31  ;;  %2888 = vmatpush.msrb.mxu0 %v2795_v55 }
 0x48b   : > { %v2318_v33 = vadd.f32 %v4312_v45, %v2305_v59 }
 0x48d   : > { %v4408_v14 = vmax.f32 %v2318_v33, 0.0 }
 0x48e   : > { %v2296_v29 = vpop.f32.mrf.mxu3  ;;  %v4410_v52 = vld [vmem:[#allocation2 + $0x60] sm:$0xff] }
 0x48f   : > { %v4412_v2 = vld [vmem:[#allocation2 + $0x62] sm:$0xff]  ;;  %2334 = vst [vmem:[#allocation2 + $0x71] sm:$0xff] %v4408_v14  ;;  %v2297_v1 = vadd.f32 %v2296_v29, %v2256_v32  ;;  %2513 = vmatmul.f32.gmra.mxu0 %v4410_v52  ;;  %2639 = vmatmul.f32.gmra.mxu3 %v4410_v52 }
 0x490   : > { %2595 = vmatmul.f32.gmra.mxu2 %v4412_v2  ;;  %2557 = vmatmul.f32.gmra.mxu1 %v4408_v14 }
 0x491   : > { %v2306_v12 = vadd.f32 %v2297_v1, %v2101_v21 }
 0x493   : > { %v2319_v57 = vadd.f32 %v4312_v45, %v2306_v12  ;;  %v2794_v45 = vld [vmem:[#allocation8 + $0x11c8] sm:$0xff] }
 0x494   : > { %2889 = vmatpush.msrb.mxu0 %v2794_v45 }
 0x495   : > { %v2327_v46 = vmax.f32 %v2319_v57, 0.0 }
 0x496   : > { %v2415_v44 = vld [vmem:[#allocation2 + $0x70] sm:$0xff]  ;;  %2890 = vmatpush.msrb.mxu0 %v2793_v61 }
 0x497   : > { %v4420_v60 = vld [vmem:[#allocation2 + $0x72] sm:$0xff]  ;;  %2335 = vst [vmem:[#allocation2 + $0x81] sm:$0xff] %v2327_v46  ;;  %2516 = vmatmul.f32.gmra.mxu0 %v2415_v44  ;;  %2642 = vmatmul.f32.gmra.mxu3 %v2415_v44 }
 0x498   : > { %2598 = vmatmul.f32.gmra.mxu2 %v4420_v60  ;;  %2560 = vmatmul.f32.gmra.mxu1 %v2327_v46 }
 0x499   : > { %2891 = vmatpush.msrb.mxu0 %v2792_v3 }
 0x49a   : > { %v2622_v58 = vpop.f32.mrf.mxu3 }
 0x49b   : > { %2892 = vmatpush.msrb.mxu0 %v2791_v8 }
 0x49d   : > { %2893 = vmatpush.msrb.mxu0 %v2790_v9 }
 0x49e   : > { %v2416_v48 = vld [vmem:[#allocation2 + $0x80] sm:$0xff] }
 0x49f   : > { %v4423_v13 = vld [vmem:[#allocation2 + $0x82] sm:$0xff]  ;;  %2519 = vmatmul.f32.gmra.mxu0 %v2416_v48  ;;  %2858 = vmatmul.f32.vlgmr.msra.gmra.mxu3 %v4330_v62 }
 0x4a0   : > { %2601 = vmatmul.f32.gmra.mxu2 %v4423_v13  ;;  %2703 = vmatmul.f32.vlgmr.msrb.gmra.mxu1 %v2352_v47 }
 0x4a1   : > { %2894 = vmatpush.msrb.mxu0 %v2789_v11 }
 0x4a7   : > { %2662 = vmatmul.f32.vlgmr.msra.gmra.mxu0 %v2344_v10  ;;  %2861 = vmatmul.f32.gmra.mxu3 %v4343_v4 }
 0x4a8   : > { %2817 = vmatmul.f32.vlgmr.msra.gmra.mxu2 %v4345_v35  ;;  %2706 = vmatmul.f32.gmra.mxu1 %v4332_v53  ;;  %v2788_v53 = vld [vmem:[#allocation8 + $0x1198] sm:$0xff]  ;;  %v2786_v35 = vld [vmem:[#allocation8 + $0x1188] sm:$0xff] }
 0x4a9   : > { %2895 = vmatpush.msrb.mxu0 %v2788_v53 }
 0x4af   : > { %2665 = vmatmul.f32.gmra.mxu0 %v4320_v20  ;;  %2864 = vmatmul.f32.gmra.mxu3 %v4360_v16  ;;  %v2787_v20 = vld [vmem:[#allocation8 + $0x1190] sm:$0xff] }
 0x4b0   : > { %2820 = vmatmul.f32.gmra.mxu2 %v4362_v42  ;;  %2709 = vmatmul.f32.gmra.mxu1 %v4347_v28 }
 0x4b1   : > { %2896 = vmatpush.msrb.mxu0 %v2787_v20 }
 0x4b3   : > { %2897 = vmatpush.msrb.mxu0 %v2786_v35 }
 0x4b7   : > { %2668 = vmatmul.f32.gmra.mxu0 %v4330_v62  ;;  %2867 = vmatmul.f32.gmra.mxu3 %v4377_v17  ;;  %v2785_v62 = vld [vmem:[#allocation8 + $0x1180] sm:$0xff] }
 0x4b8   : > { %2823 = vmatmul.f32.gmra.mxu2 %v4379_v5  ;;  %2712 = vmatmul.f32.gmra.mxu1 %v4364_v25  ;;  %v2743_v5 = vld [vmem:[#allocation2 + $0x91] sm:$0xff] }
 0x4b9   : > { %2898 = vmatpush.msrb.mxu0 %v2785_v62 }
 0x4bf   : > { %2671 = vmatmul.f32.gmra.mxu0 %v4343_v4  ;;  %2870 = vmatmul.f32.gmra.mxu3 %v4394_v34  ;;  %v3215_v4 = vld [vmem:[#allocation2] sm:$0xff] }
 0x4c0   : > { %2826 = vmatmul.f32.gmra.mxu2 %v4396_v7  ;;  %2715 = vmatmul.f32.gmra.mxu1 %v4381_v15 }
 0x4c7   : > { %2674 = vmatmul.f32.gmra.mxu0 %v4360_v16  ;;  %2873 = vmatmul.f32.gmra.mxu3 %v4408_v14 }
 0x4c8   : > { %2829 = vmatmul.f32.gmra.mxu2 %v4410_v52  ;;  %2718 = vmatmul.f32.gmra.mxu1 %v4398_v0 }
 0x4cf   : > { %2677 = vmatmul.f32.gmra.mxu0 %v4377_v17  ;;  %2876 = vmatmul.f32.gmra.mxu3 %v2327_v46 }
 0x4d0   : > { %2832 = vmatmul.f32.gmra.mxu2 %v2415_v44  ;;  %2721 = vmatmul.f32.gmra.mxu1 %v4412_v2 }
 0x4d7   : > { %2680 = vmatmul.f32.gmra.mxu0 %v4394_v34  ;;  %2879 = vmatmul.f32.gmra.mxu3 %v2743_v5 }
 0x4d8   : > { %2835 = vmatmul.f32.gmra.mxu2 %v2416_v48  ;;  %2724 = vmatmul.f32.gmra.mxu1 %v4420_v60 }
 0x4dc   : > { %v2540_v31 = vpop.f32.mrf.mxu1 }
 0x4df   : > { %2683 = vmatmul.f32.gmra.mxu0 %v4408_v14 }
 0x4e0   : > { %2838 = vmatmul.f32.gmra.mxu2 %v3215_v4 }
 0x4e4   : > { %v2499_v16 = vpop.f32.mrf.mxu0 }
 0x4e5   : > { %v2543_v54 = vpop.f32.mrf.mxu1  ;;  %v2541_v48 = vadd.f32 %v2540_v31, %v2499_v16 }
 0x4e7   : > { %2899 = vmatmul.f32.vlgmr.msrb.gmra.mxu0 %v4347_v28 }
 0x4ea   : > { %v2625_v28 = vpop.f32.mrf.mxu3 }
 0x4eb   : > { %v2581_v7 = vpop.f32.mrf.mxu2 }
 0x4ec   : > { %v2502_v42 = vpop.f32.mrf.mxu0 }
 0x4ed   : > { %v2544_v9 = vadd.f32 %v2543_v54, %v2502_v42 }
 0x4ef   : > { %2902 = vmatmul.f32.gmra.mxu0 %v4364_v25 }
 0x4f3   : > { %v2584_v19 = vpop.f32.mrf.mxu2 }
 0x4f4   : > { %v4453_v17 = vpop.f32.mrf.mxu0  ;;  %v2585_v53 = vadd.f32 %v2584_v19, %v2544_v9 }
 0x4f7   : > { %2905 = vmatmul.f32.gmra.mxu0 %v4381_v15  ;;  %v4467_v15 = vpop.f32.mrf.mxu3 }
 0x4fb   : > { %v2587_v56 = vpop.f32.mrf.mxu2 }
 0x4fc   : > { %v4456_v34 = vpop.f32.mrf.mxu0 }
 0x4ff   : > { %2908 = vmatmul.f32.gmra.mxu0 %v4398_v0  ;;  %v2546_v0 = vpop.f32.mrf.mxu1  ;;  %v4472_v39 = vpop.f32.mrf.mxu3 }
 0x503   : > { %v4474_v59 = vpop.f32.mrf.mxu2 }
 0x504   : > { %v4459_v50 = vpop.f32.mrf.mxu0 }
 0x507   : > { %2911 = vmatmul.f32.gmra.mxu0 %v4412_v2  ;;  %v2549_v18 = vpop.f32.mrf.mxu1  ;;  %v4476_v43 = vpop.f32.mrf.mxu3 }
 0x50b   : > { %v4478_v33 = vpop.f32.mrf.mxu2 }
 0x50c   : > { %v4462_v25 = vpop.f32.mrf.mxu0 }
 0x50f   : > { %2914 = vmatmul.f32.gmra.mxu0 %v4420_v60  ;;  %v4480_v14 = vpop.f32.mrf.mxu1  ;;  %v4482_v6 = vpop.f32.mrf.mxu3 }
 0x513   : > { %v4484_v29 = vpop.f32.mrf.mxu2 }
 0x514   : > { %v4465_v38 = vpop.f32.mrf.mxu0 }
 0x517   : > { %2917 = vmatmul.f32.gmra.mxu0 %v4423_v13  ;;  %v4486_v2 = vpop.f32.mrf.mxu1  ;;  %v4490_v21 = vpop.f32.mrf.mxu3  ;;  %v2582_v13 = vadd.f32 %v2581_v7, %v2541_v48  ;;  %v2626_v7 = vadd.f32 %v2625_v28, %v2585_v53  ;;  %v2547_v48 = vadd.f32 %v2546_v0, %v4453_v17 }
 0x519   : > { %v2623_v3 = vadd.f32 %v2622_v58, %v2582_v13  ;;  %v2588_v19 = vadd.f32 %v2587_v56, %v2547_v48 }
 0x51b   : > { %v4492_v1 = vpop.f32.mrf.mxu2 }
 0x51c   : > { %v4470_v51 = vpop.f32.mrf.mxu0 }
 0x51f   : > { %2920 = vmatmul.f32.gmra.mxu0 %v2751_v24  ;;  %v4494_v63 = vpop.f32.mrf.mxu1  ;;  %v4498_v12 = vpop.f32.mrf.mxu3  ;;  %v4510_v24 = vld [vmem:[#allocation9 + $0x3] ss:$0 sm:$0xff] }
 0x523   : > { %v4500_v57 = vpop.f32.mrf.mxu2 }
 0x524   : > { %v2663_v27 = vpop.f32.mrf.mxu0 }
 0x525   : > { %v2664_v11 = vadd.f32 %v2663_v27, %v2623_v3  ;;  %v2629_v3 = vadd.f32 %v4467_v15, %v2588_v19 }
 0x527   : > { %v4502_v46 = vpop.f32.mrf.mxu1  ;;  %v2859_v60 = vpop.f32.mrf.mxu3 }
 0x52b   : > { %v2818_v23 = vpop.f32.mrf.mxu2 }
 0x52c   : > { %v2666_v32 = vpop.f32.mrf.mxu0  ;;  %v2860_v20 = vadd.f32 %v2859_v60, %v2818_v23 }
 0x52f   : > { %v2704_v47 = vpop.f32.mrf.mxu1  ;;  %v2862_v45 = vpop.f32.mrf.mxu3 }
 0x530   : > { %v2705_v62 = vadd.f32 %v2704_v47, %v2664_v11 }
 0x533   : > { %v2821_v61 = vpop.f32.mrf.mxu2 }
 0x534   : > { %v2669_v52 = vpop.f32.mrf.mxu0  ;;  %v2863_v54 = vadd.f32 %v2862_v45, %v2821_v61 }
 0x535   : > { %v2670_v56 = vadd.f32 %v2669_v52, %v2629_v3 }
 0x537   : > { %v2707_v8 = vpop.f32.mrf.mxu1  ;;  %v2865_v4 = vpop.f32.mrf.mxu3 }
 0x53b   : > { %v2824_v16 = vpop.f32.mrf.mxu2 }
 0x53c   : > { %v4488_v26 = vpop.f32.mrf.mxu0  ;;  %v2866_v61 = vadd.f32 %v2865_v4, %v2824_v16 }
 0x53f   : > { %v2710_v58 = vpop.f32.mrf.mxu1  ;;  %v2868_v28 = vpop.f32.mrf.mxu3 }
 0x540   : > { %v2711_v9 = vadd.f32 %v2710_v58, %v2670_v56 }
 0x543   : > { %v2827_v0 = vpop.f32.mrf.mxu2 }
 0x544   : > { %v4496_v41 = vpop.f32.mrf.mxu0  ;;  %v2869_v4 = vadd.f32 %v2868_v28, %v2827_v0 }
 0x547   : > { %v2871_v52 = vpop.f32.mrf.mxu3 }
 0x54c   : > { %v4504_v44 = vpop.f32.mrf.mxu0 }
 0x54f   : > { %v2874_v19 = vpop.f32.mrf.mxu3 }
 0x554   : > { %v4506_v55 = vpop.f32.mrf.mxu0 }
 0x55c   : > { %v4508_v10 = vpop.f32.mrf.mxu0 }
 0x55d   : > { %4623 = vst [vmem:[#allocation18_spill] sm:$0xff] %v4508_v10  ;;  %v2667_v10 = vadd.f32 %v2666_v32, %v2626_v7  ;;  %v2550_v32 = vadd.f32 %v2549_v18, %v4456_v34  ;;  %v2553_v34 = vadd.f32 %v4480_v14, %v4459_v50  ;;  %v2556_v14 = vadd.f32 %v4486_v2, %v4462_v25 }
 0x55f   : > { %v2708_v23 = vadd.f32 %v2707_v8, %v2667_v10  ;;  %v2713_v8 = vpop.f32.mrf.mxu1  ;;  %v2597_v58 = vadd.f32 %v4484_v29, %v2556_v14 }
 0x564   : > { %v2900_v35 = vpop.f32.mrf.mxu0 }
 0x565   : > { %v2901_v5 = vadd.f32 %v2900_v35, %v2860_v20 }
 0x567   : > { %v2924_v31 = vadd.f32 %v2901_v5, %v2705_v62  ;;  %v2830_v62 = vpop.f32.mrf.mxu2  ;;  %v2716_v48 = vpop.f32.mrf.mxu1 }
 0x569   : > { %v2937_v42 = vadd.f32 %v4510_v24, %v2924_v31 }
 0x56b   : > { %v2945_v27 = vadd.f32 %v2937_v42, %v4070_v49  ;;  %v2591_v49 = vadd.f32 %v4474_v59, %v2550_v32 }
 0x56c   : > { %v2903_v60 = vpop.f32.mrf.mxu0 }
 0x56d   : > { %v2953_v47 = vmax.f32 %v2945_v27, 0.0  ;;  %v2904_v13 = vadd.f32 %v2903_v60, %v2863_v54  ;;  %v2632_v20 = vadd.f32 %v4472_v39, %v2591_v49 }
 0x56f   : > { %2961 = vst [vmem:[%s4519_s6] sm:$0xff] %v2953_v47  ;;  %v2925_v17 = vadd.f32 %v2904_v13, %v2708_v23  ;;  %v2673_v18 = vadd.f32 %v4488_v26, %v2632_v20  ;;  %v2833_v27 = vpop.f32.mrf.mxu2  ;;  %v2638_v13 = vadd.f32 %v4482_v6, %v2597_v58  ;;  %v2719_v2 = vpop.f32.mrf.mxu1 }
 0x570   : > { %v2875_v28 = vadd.f32 %v2874_v19, %v2833_v27 }
 0x571   : > { %v2938_v45 = vadd.f32 %v4510_v24, %v2925_v17  ;;  %v2714_v7 = vadd.f32 %v2713_v8, %v2673_v18  ;;  %v2679_v29 = vadd.f32 %v4504_v44, %v2638_v13 }
 0x573   : > { %v2946_v10 = vadd.f32 %v2938_v45, %v4081_v37  ;;  %v2594_v37 = vadd.f32 %v4478_v33, %v2553_v34  ;;  %v2720_v32 = vadd.f32 %v2719_v2, %v2679_v29  ;;  %v2877_v45 = vpop.f32.mrf.mxu3 }
 0x574   : > { %v2906_v15 = vpop.f32.mrf.mxu0 }
 0x575   : > { %v2954_v11 = vmax.f32 %v2946_v10, 0.0  ;;  %v2907_v53 = vadd.f32 %v2906_v15, %v2866_v61  ;;  %v2635_v42 = vadd.f32 %v4476_v43, %v2594_v37 }
 0x577   : > { %2962 = vst [vmem:[%s4519_s6 + $0x8] sm:$0xff] %v2954_v11  ;;  %v2926_v35 = vadd.f32 %v2907_v53, %v2711_v9  ;;  %v2676_v26 = vadd.f32 %v4496_v41, %v2635_v42  ;;  %v2559_v41 = vadd.f32 %v4494_v63, %v4465_v38  ;;  %v2836_v49 = vpop.f32.mrf.mxu2  ;;  %v2562_v63 = vadd.f32 %v4502_v46, %v4470_v51  ;;  %v2722_v10 = vpop.f32.mrf.mxu1 }
 0x578   : > { %v2878_v8 = vadd.f32 %v2877_v45, %v2836_v49 }
 0x579   : > { %v2939_v59 = vadd.f32 %v4510_v24, %v2926_v35  ;;  %v2717_v23 = vadd.f32 %v2716_v48, %v2676_v26 }
 0x57b   : > { %v2947_v5 = vadd.f32 %v2939_v59, %v4095_v36  ;;  %v2872_v36 = vadd.f32 %v2871_v52, %v2830_v62  ;;  %v2880_v35 = vpop.f32.mrf.mxu3  ;;  %v4625_v52 = vld [vmem:[#allocation16_spill] sm:$0xff] }
 0x57c   : > { %v2909_v16 = vpop.f32.mrf.mxu0 }
 0x57d   : > { %v2955_v39 = vmax.f32 %v2947_v5, 0.0  ;;  %v2910_v31 = vadd.f32 %v2909_v16, %v2869_v4 }
 0x57f   : > { %2963 = vst [vmem:[%s4519_s6 + $0x10] sm:$0xff] %v2955_v39  ;;  %v2927_v50 = vadd.f32 %v2910_v31, %v2714_v7  ;;  %v2839_v20 = vpop.f32.mrf.mxu2  ;;  %v4626_v7 = vld [vmem:[#allocation17_spill] sm:$0xff] }
 0x580   : > { %v2881_v18 = vadd.f32 %v2880_v35, %v2839_v20 }
 0x581   : > { %v2940_v33 = vadd.f32 %v4510_v24, %v2927_v50 }
 0x583   : > { %v2948_v54 = vadd.f32 %v2940_v33, %v4113_v40  ;;  %v2600_v40 = vadd.f32 %v4492_v1, %v2559_v41 }
 0x584   : > { %v2912_v60 = vpop.f32.mrf.mxu0 }
 0x585   : > { %v2956_v43 = vmax.f32 %v2948_v54, 0.0  ;;  %v2913_v47 = vadd.f32 %v2912_v60, %v2872_v36  ;;  %v2641_v61 = vadd.f32 %v4490_v21, %v2600_v40 }
 0x587   : > { %2964 = vst [vmem:[%s4519_s6 + $0x18] sm:$0xff] %v2956_v43  ;;  %v2928_v25 = vadd.f32 %v2913_v47, %v2717_v23  ;;  %v2682_v44 = vadd.f32 %v4506_v55, %v2641_v61  ;;  %v4624_v55 = vld [vmem:[#allocation18_spill] sm:$0xff] }
 0x589   : > { %v2941_v3 = vadd.f32 %v4510_v24, %v2928_v25  ;;  %v2723_v11 = vadd.f32 %v2722_v10, %v2682_v44 }
 0x58b   : > { %v2949_v17 = vadd.f32 %v2941_v3, %v4131_v30  ;;  %v2603_v30 = vadd.f32 %v4500_v57, %v2562_v63 }
 0x58c   : > { %v2915_v0 = vpop.f32.mrf.mxu0 }
 0x58d   : > { %v2957_v56 = vmax.f32 %v2949_v17, 0.0  ;;  %v2916_v6 = vadd.f32 %v2915_v0, %v2875_v28  ;;  %v2644_v51 = vadd.f32 %v4498_v12, %v2603_v30 }
 0x58f   : > { %2965 = vst [vmem:[%s4519_s6 + $0x20] sm:$0xff] %v2957_v56  ;;  %v2929_v38 = vadd.f32 %v2916_v6, %v2720_v32  ;;  %v2685_v34 = vadd.f32 %v4624_v55, %v2644_v51 }
 0x591   : > { %v2942_v1 = vadd.f32 %v4510_v24, %v2929_v38 }
 0x593   : > { %v2950_v15 = vadd.f32 %v2942_v1, %v4149_v22  ;;  %v2725_v22 = vpop.f32.mrf.mxu1 }
 0x594   : > { %v2918_v9 = vpop.f32.mrf.mxu0  ;;  %v2726_v37 = vadd.f32 %v2725_v22, %v2685_v34 }
 0x595   : > { %v2958_v21 = vmax.f32 %v2950_v15, 0.0  ;;  %v2919_v53 = vadd.f32 %v2918_v9, %v2878_v8 }
 0x597   : > { %2966 = vst [vmem:[%s4519_s6 + $0x28] sm:$0xff] %v2958_v21  ;;  %v2930_v46 = vadd.f32 %v2919_v53, %v2723_v11 }
 0x599   : > { %v2943_v57 = vadd.f32 %v4510_v24, %v2930_v46 }
 0x59b   : > { %v2951_v59 = vadd.f32 %v2943_v57, %v4625_v52 }
 0x59c   : > { %v2921_v62 = vpop.f32.mrf.mxu0 }
 0x59d   : > { %v2959_v4 = vmax.f32 %v2951_v59, 0.0  ;;  %v2922_v5 = vadd.f32 %v2921_v62, %v2881_v18 }
 0x59f   : > { %2967 = vst [vmem:[%s4519_s6 + $0x30] sm:$0xff] %v2959_v4  ;;  %v2931_v12 = vadd.f32 %v2922_v5, %v2726_v37 }
 0x5a1   : > { %v2944_v16 = vadd.f32 %v4510_v24, %v2931_v12 }
 0x5a3   : > { %v2952_v39 = vadd.f32 %v2944_v16, %v4626_v7 }
 0x5a5   : > { %v2960_v31 = vmax.f32 %v2952_v39, 0.0 }
 0x5a7   : > { %2968 = vst [vmem:[%s4519_s6 + $0x38] sm:$0xff] %v2960_v31 }
 0x5a8   : > { %3363 = shalt.err (!%p3360_p8)
}
 0x5a9   : > { %s3422_s23 = smov 128   ;;  %s3423_s25 = smov 8  }
 0x5aa   : > { %3136 = dma.vmem_to_hbm [thread:$0]  (%p3492_p5), %s2983_s15, 1024, %s2985_s16, %s2970_s22, %s3422_s23, %s3422_s23, %s3423_s25  }
 0x5ab PF: > { %p3163_p9 = scmp.ge.s32.totalorder %s3410_s21, 2  ;;  %s2999_s26 = sand.u32 1, %s3398_s18  }
 0x5ac   : > { %s3000_s6 = scalar_lea.sflag [#allocation5], %s2999_s26 }
 0x5ad   : > { %p3152_p10 = pnand %p3163_p9, %p3496_p6 }
 0x5af   : > { %p3153_p11 = pneg %p3152_p10 }
 0x5b1   : > { %3393 = dma.done.wait (%p3153_p11), %s3000_s6, 1024  }
 0x5b2   : > { %3395 = vsyncadd (%p3153_p11), %s3000_s6, 4294966272  ;;  %p18_p12 = scmp.ge.s32.totalorder %s3479_s24, 4   ;;  %s4627_s18 = smov %s3402_s19 }
 0x5b3   : > { %s4628_s19 = smov %s3406_s20  ;;  %s4629_s20 = smov %s3490_s27 }
 0x5b4   : > { %s4630_s21 = smov %s3479_s24  ;;  %20 = sbr.rel (!%p18_p12) target bundleno = 8 (0x8), region = 108 }
 0x5b9   :  { %3006 = vsyncpa [#allocation4], 1 }
 0x5ba   :  { %3008 = vsyncpa [#allocation4 + $0x1], 1 }
 0x5bb   :  { %3009 = vsyncpa [#allocation7], 1 }
 0x5bc   :  { %3010 = vsyncpa [#allocation10], 1 }
 0x5bd   :  { %3011 = vsyncpa [#allocation5], 1 }
 0x5be   :  { %3013 = vsyncpa [#allocation5 + $0x1], 1 }

</bundles_post_ra>
